<compile_context>
chip_gen: v7x
topology: tpu7x:2x2x1
jax: 0.10.0
libtpu: 0.0.40
codegen_flags: <defaults>
</compile_context>

<pallas_src>
import functools
import math

import jax
import jax.numpy as jnp
from jax.experimental import pallas as pl
from jax.experimental.pallas import tpu as pltpu


# ----------------------------------------------------------------------------
# In-kernel helpers: activations are flat (H*W, C) slabs (C on the lane axis).
# ----------------------------------------------------------------------------
def _shift_flat(x, s):
    """y[p] = x[p + s] if 0 <= p + s < N else 0.   x: (N, C)."""
    if s == 0:
        return x
    n, c = x.shape
    z = jnp.zeros((abs(s), c), x.dtype)
    if s > 0:
        return jnp.concatenate([x[s:], z], axis=0)
    return jnp.concatenate([z, x[:n + s]], axis=0)


def _border_masks(H, W):
    """(H*W, 1) boolean masks of the w == 0 and w == W-1 image columns."""
    col = jax.lax.broadcasted_iota(jnp.int32, (H * W, 1), 0) % W
    return col == 0, col == W - 1


def _conv3x3_taps(x, H, W, w_ref, b, left, right):
    """3x3 SAME conv + folded BN shift + ReLU via 9 accumulated MXU matmuls.

    x:      (H*W, Cin) bf16 activation slab.
    w_ref:  (9, Cin, Cout) bf16 ref, tap index k = ky*3 + kx (BN scale folded).
    b:      (1, Cout) f32 per-channel shift (conv bias + BN).
    left/right: (H*W, 1) bool border-column masks (shared across layers).
    """
    hw = x.shape[0]
    cout = w_ref.shape[-1]
    zero = jnp.zeros((), x.dtype)
    acc = jnp.zeros((hw, cout), jnp.float32)
    for kx, dx in enumerate((-1, 0, 1)):
        xc = _shift_flat(x, dx)                       # column shift (bf16)
        if dx == -1:
            xc = jnp.where(left, zero, xc)            # left image border
        elif dx == 1:
            xc = jnp.where(right, zero, xc)           # right image border
        for ky, dy in enumerate((-1, 0, 1)):
            t = _shift_flat(xc, dy * W)               # row shift, zero filled
            acc = acc + jnp.dot(t, w_ref[ky * 3 + kx],
                                preferred_element_type=jnp.float32)
    return jnp.maximum(acc + b, 0.0)


def _maxpool2x2(x, H, W, scratch):
    """Exact 2x2 stride-2 max pool of a flat (H*W, C) slab -> (H/2, W/2, C).

    scratch: (H//2, 2*W, C) f32 VMEM ref.  After the two pair-maxes, the pooled
    value for anchor (2i, 2j) sits at flat position 2i*W + 2j, i.e. sublane 2j
    (an even index < W) of row group i, so one sublane-strided read selects all
    anchors.  Wrapped / zero-filled partners only land on odd h / odd w rows,
    which are never selected, so the pool is exact regardless of sign.
    """
    m = jnp.maximum(x, _shift_flat(x, 1))             # pair max along w
    m = jnp.maximum(m, _shift_flat(m, W))             # pair max along h
    for g in range(H // 2):                           # aligned sublane slices
        scratch[g] = m[g * 2 * W:(g + 1) * 2 * W, :]
    return scratch[:, pl.ds(0, W // 2, stride=2), :]  # (H//2, W//2, C)


def _vgg_kernel(H, W,
                x_ref,
                w1_ref, b1_ref,
                w2_ref, b2_ref,
                w3_ref, b3_ref,
                w4_ref, b4_ref,
                o_ref,
                p1_ref, p2_ref):
    H2, W2 = H // 2, W // 2

    # Layer 1: wrapper-side im2col -> one lane-dense MXU matmul.
    h = jnp.dot(x_ref[0], w1_ref[...], preferred_element_type=jnp.float32)
    h = jnp.maximum(h + b1_ref[...], 0.0)                       # (H*W, 64) f32

    # Layer 2 (full resolution).
    left, right = _border_masks(H, W)
    h = _conv3x3_taps(h.astype(jnp.bfloat16), H, W, w2_ref, b2_ref[...],
                      left, right)                              # (H*W, 64)

    # Pool 1.
    h = _maxpool2x2(h, H, W, p1_ref).reshape(H2 * W2, -1)       # (H*W/4, 64)

    # Layers 3 and 4 (half resolution) share the half-res border masks.
    left2, right2 = _border_masks(H2, W2)
    h = _conv3x3_taps(h.astype(jnp.bfloat16), H2, W2, w3_ref, b3_ref[...],
                      left2, right2)                            # (H*W/4, 128)
    h = _conv3x3_taps(h.astype(jnp.bfloat16), H2, W2, w4_ref, b4_ref[...],
                      left2, right2)                            # (H*W/4, 128)

    # Pool 2 -> straight into the lane-dense (H/4, W/4, 128) output block.
    o_ref[0] = _maxpool2x2(h, H2, W2, p2_ref)


# ----------------------------------------------------------------------------
# Wrapper
# ----------------------------------------------------------------------------
K1 = 128  # layer-1 im2col lanes: 9 taps * 3 channels = 27, zero-padded to 128


def _fold_conv(w_hwio, scale):
    """(3,3,Cin,Cout) HWIO weight * BN scale -> (9, Cin, Cout) bf16 taps."""
    kh, kw, cin, cout = w_hwio.shape
    return (w_hwio * scale).reshape(kh * kw, cin, cout).astype(jnp.bfloat16)


def _fold_conv_l1(w_hwio, scale, k_pad):
    """Layer-1 weight: fold BN scale, flatten to (27, Cout), pad rows, bf16."""
    kh, kw, cin, cout = w_hwio.shape
    wf = (w_hwio * scale).reshape(kh * kw * cin, cout)
    return jnp.pad(wf, ((0, k_pad - kh * kw * cin), (0, 0))).astype(jnp.bfloat16)


def _im2col_l1(x_nhwc, k_pad):
    """Wrapper-side 3x3 im2col of the 3-channel input, padded to k_pad lanes."""
    B, H, W, C = x_nhwc.shape
    xp = jnp.pad(x_nhwc, ((0, 0), (1, 1), (1, 1), (0, 0)))
    taps = [xp[:, 1 + dy:1 + dy + H, 1 + dx:1 + dx + W, :]
            for dy in (-1, 0, 1) for dx in (-1, 0, 1)]
    patches = jnp.concatenate(taps, axis=-1)                     # (B,H,W,27)
    patches = jnp.pad(patches, ((0, 0), (0, 0), (0, 0), (0, k_pad - 9 * C)))
    return patches.reshape(B, H * W, k_pad).astype(jnp.bfloat16)


@jax.jit
def vgg_extractor_forward(x_nchw, params):
    """NCHW f32 input (B, 3, H, W) -> NCHW f32 output (B, 128, H/4, W/4)."""
    B, _, H, W = x_nchw.shape
    # TODO(synk): relax with a row-tiled grid; keeps in-kernel reshapes layout
    #             no-ops for now.
    assert H % 4 == 0 and W % 16 == 0, (H, W)

    x = jnp.transpose(x_nchw, (0, 2, 3, 1))                      # NCHW -> NHWC
    x_in = _im2col_l1(x, K1)                                     # (B,H*W,128) bf16

    w1, a1, b1 = params["l1"]
    w2, a2, b2 = params["l2"]
    w3, a3, b3 = params["l3"]
    w4, a4, b4 = params["mu"]
    w1f = _fold_conv_l1(w1, a1[0], K1)        # (128, 64)
    w2f = _fold_conv(w2, a2[0])               # (9, 64, 64)
    w3f = _fold_conv(w3, a3[0])               # (9, 64, 128)
    w4f = _fold_conv(w4, a4[0])               # (9, 128, 128)

    def full(arr):
        nd = arr.ndim
        return pl.BlockSpec(arr.shape, lambda n: (0,) * nd)

    Ho, Wo = H // 4, W // 4
    out_nhwc = pl.pallas_call(
        functools.partial(_vgg_kernel, H, W),
        out_shape=jax.ShapeDtypeStruct((B, Ho, Wo, 128), jnp.float32),
        grid=(B,),
        in_specs=[
            pl.BlockSpec((1, H * W, K1), lambda n: (n, 0, 0)),
            full(w1f), full(b1),
            full(w2f), full(b2),
            full(w3f), full(b3),
            full(w4f), full(b4),
        ],
        out_specs=pl.BlockSpec((1, Ho, Wo, 128), lambda n: (n, 0, 0, 0)),
        scratch_shapes=[
            pltpu.VMEM((H // 2, 2 * W, 64), jnp.float32),        # pool-1 slab
            pltpu.VMEM((H // 4, W, 128), jnp.float32),           # pool-2 slab
        ],
        compiler_params=pltpu.CompilerParams(
            dimension_semantics=("parallel",)),
    )(x_in, w1f, b1, w2f, b2, w3f, b3, w4f, b4)

    return jnp.transpose(out_nhwc, (0, 3, 1, 2))                 # NHWC -> NCHW


# ----------------------------------------------------------------------------
# Parameter init (deterministic, synthetic) — mirrors nn.Conv2d + nn.BatchNorm2d
# (eval mode, running_mean=0, running_var=1): per-channel scale a, shift b.
# ----------------------------------------------------------------------------
def init_conv_bn(key, cin, cout, eps=1e-5):
    k1, k2, k3, k4 = jax.random.split(key, 4)
    w = jax.random.normal(k1, (3, 3, cin, cout), jnp.float32) / math.sqrt(9 * cin)
    bias = 0.01 * jax.random.normal(k2, (cout,), jnp.float32)
    gamma = 1.0 + 0.1 * jax.random.normal(k3, (cout,), jnp.float32)
    beta = 0.1 * jax.random.normal(k4, (cout,), jnp.float32)
    mean = jnp.zeros((cout,), jnp.float32)
    var = jnp.ones((cout,), jnp.float32)
    scale = gamma / jnp.sqrt(var + eps)
    a = scale.reshape(1, cout)
    b = ((bias - mean) * scale + beta).reshape(1, cout)
    return w, a, b


def init_params(key):
    ks = jax.random.split(key, 4)
    return {
        "l1": init_conv_bn(ks[0], 3, 64),
        "l2": init_conv_bn(ks[1], 64, 64),
        "l3": init_conv_bn(ks[2], 64, 128),
        "mu": init_conv_bn(ks[3], 128, 128),
    }


# TODO(synk): info_model=True branch (logvar head + torch.randn_like
#             reparameterization) is not exercised by the default forward and
#             is not implemented here.


# ----------------------------------------------------------------------------
# Pure-JAX reference.  Mirrors the kernel's quantization choices (BN scale
# folded into the weight, weights and activations rounded to bf16 before each
# conv, f32 accumulation), so the remaining difference is accumulation order.
# Pooling is exact in both.
# ----------------------------------------------------------------------------
def ref_forward(x_nchw, params):
    def cbr(x, w, a, b):
        xb = x.astype(jnp.bfloat16).astype(jnp.float32)
        wb = (w * a[0]).astype(jnp.bfloat16).astype(jnp.float32)
        y = jax.lax.conv_general_dilated(
            xb, wb, window_strides=(1, 1), padding="SAME",
            dimension_numbers=("NHWC", "HWIO", "NHWC"),
            precision=jax.lax.Precision.HIGHEST)
        return jnp.maximum(y + b[0], 0.0)

    def pool(x):
        return jax.lax.reduce_window(
            x, -jnp.inf, jax.lax.max, (1, 2, 2, 1), (1, 2, 2, 1), "VALID")

    x = jnp.transpose(x_nchw, (0, 2, 3, 1))
    h = cbr(x, *params["l1"])
    h = cbr(h, *params["l2"])
    h = pool(h)
    h = cbr(h, *params["l3"])
    h = cbr(h, *params["mu"])
    h = pool(h)
    return jnp.transpose(h, (0, 3, 1, 2))


if __name__ == "__main__":
    key = jax.random.PRNGKey(0)
    kx, kp = jax.random.split(key)

    # PyTorch-style NCHW input: batch=2, channels=3, spatial=16x16
    x = jax.random.normal(kx, (2, 3, 16, 16), jnp.float32)
    params = init_params(kp)

    out = jax.block_until_ready(vgg_extractor_forward(x, params))
    assert out.shape == (2, 128, 4, 4), out.shape

    ref = ref_forward(x, params)
    max_err = float(jnp.max(jnp.abs(out - ref)))
    # Tolerance covers bf16 operand rounding differences (identical rounding in
    # kernel and reference; residual is f32 accumulation order over 4 layers).
    assert jnp.allclose(out, ref, atol=3e-2, rtol=3e-2), max_err

    print("KERNEL_OK")
</pallas_src>

<mosaic_0001>
module attributes {stable_mosaic.version = 11 : i64} {
  func.func @_vgg_kernel(%arg0: i32, %arg1: memref<1x256x128xbf16, #tpu.memory_space<vmem>>, %arg2: memref<128x64xbf16, #tpu.memory_space<vmem>>, %arg3: memref<1x64xf32, #tpu.memory_space<vmem>>, %arg4: memref<9x64x64xbf16, #tpu.memory_space<vmem>>, %arg5: memref<1x64xf32, #tpu.memory_space<vmem>>, %arg6: memref<9x64x128xbf16, #tpu.memory_space<vmem>>, %arg7: memref<1x128xf32, #tpu.memory_space<vmem>>, %arg8: memref<9x128x128xbf16, #tpu.memory_space<vmem>>, %arg9: memref<1x128xf32, #tpu.memory_space<vmem>>, %arg10: memref<1x4x4x128xf32, #tpu.memory_space<vmem>>, %arg11: memref<8x32x64xf32, #tpu.memory_space<vmem>>, %arg12: memref<4x16x128xf32, #tpu.memory_space<vmem>>) attributes {dimension_semantics = [#tpu.dimension_semantics<parallel>], iteration_bounds = array<i64: 2>, scalar_prefetch = 0 : i64, scratch_operands = 2 : i64, tpu.core_type = #tpu.core_type<tc>, window_params = [{transform_indices = @transform_0, window_bounds = array<i64: 1, 256, 128>}, {pipeline_mode = #tpu.pipeline_mode<synchronous>, transform_indices = @transform_1, window_bounds = array<i64: 128, 64>}, {pipeline_mode = #tpu.pipeline_mode<synchronous>, transform_indices = @transform_2, window_bounds = array<i64: 1, 64>}, {pipeline_mode = #tpu.pipeline_mode<synchronous>, transform_indices = @transform_3, window_bounds = array<i64: 9, 64, 64>}, {pipeline_mode = #tpu.pipeline_mode<synchronous>, transform_indices = @transform_4, window_bounds = array<i64: 1, 64>}, {pipeline_mode = #tpu.pipeline_mode<synchronous>, transform_indices = @transform_5, window_bounds = array<i64: 9, 64, 128>}, {pipeline_mode = #tpu.pipeline_mode<synchronous>, transform_indices = @transform_6, window_bounds = array<i64: 1, 128>}, {pipeline_mode = #tpu.pipeline_mode<synchronous>, transform_indices = @transform_7, window_bounds = array<i64: 9, 128, 128>}, {pipeline_mode = #tpu.pipeline_mode<synchronous>, transform_indices = @transform_8, window_bounds = array<i64: 1, 128>}, {transform_indices = @transform_9, window_bounds = array<i64: 1, 4, 4, 128>}]} {
    %c0 = arith.constant 0 : index
    %c0_0 = arith.constant 0 : index
    %c0_1 = arith.constant 0 : index
    %0 = vector.load %arg1[%c0, %c0_0, %c0_1] : memref<1x256x128xbf16, #tpu.memory_space<vmem>>, vector<1x256x128xbf16>
    %1 = vector.shape_cast %0 : vector<1x256x128xbf16> to vector<256x128xbf16>
    %c0_2 = arith.constant 0 : index
    %c0_3 = arith.constant 0 : index
    %2 = vector.load %arg2[%c0_2, %c0_3] : memref<128x64xbf16, #tpu.memory_space<vmem>>, vector<128x64xbf16>
    %cst = arith.constant dense<0.000000e+00> : vector<256x64xf32>
    %3 = tpu.matmul %1, %2, %cst {dimension_numbers = #tpu.dot_dimension_numbers<[1], [0], [0], [1], [0, 0, 1, 1], [], []>} : vector<256x128xbf16>, vector<128x64xbf16>, vector<256x64xf32> -> vector<256x64xf32>
    %c0_4 = arith.constant 0 : index
    %c0_5 = arith.constant 0 : index
    %4 = vector.load %arg3[%c0_4, %c0_5] : memref<1x64xf32, #tpu.memory_space<vmem>>, vector<1x64xf32>
    %5 = vector.broadcast %4 : vector<1x64xf32> to vector<256x64xf32>
    %6 = arith.addf %3, %5 : vector<256x64xf32>
    %cst_6 = arith.constant 0.000000e+00 : f32
    %7 = vector.broadcast %cst_6 : f32 to vector<256x64xf32>
    %8 = arith.maximumf %6, %7 : vector<256x64xf32>
    %9 = tpu.iota {dimensions = array<i32: 0>} : vector<256x1xi32>
    %c16_i32 = arith.constant 16 : i32
    %c0_i32 = arith.constant 0 : i32
    %10 = arith.cmpi eq, %c16_i32, %c0_i32 : i32
    %c1_i32 = arith.constant 1 : i32
    %11 = arith.select %10, %c1_i32, %c16_i32 : i32
    %12 = vector.broadcast %11 : i32 to vector<256x1xi32>
    %13 = arith.remsi %9, %12 : vector<256x1xi32>
    %c0_i32_7 = arith.constant 0 : i32
    %14 = vector.broadcast %c0_i32_7 : i32 to vector<256x1xi32>
    %15 = arith.cmpi ne, %13, %14 : vector<256x1xi32>
    %c0_i32_8 = arith.constant 0 : i32
    %16 = vector.broadcast %c0_i32_8 : i32 to vector<256x1xi32>
    %17 = arith.cmpi slt, %13, %16 : vector<256x1xi32>
    %c0_i32_9 = arith.constant 0 : i32
    %18 = arith.cmpi slt, %11, %c0_i32_9 : i32
    %19 = vector.broadcast %18 : i1 to vector<256x1xi1>
    %20 = vector.broadcast %19 : vector<256x1xi1> to vector<256x1xi1>
    %21 = arith.xori %17, %20 : vector<256x1xi1>
    %22 = arith.andi %21, %15 : vector<256x1xi1>
    %23 = vector.broadcast %11 : i32 to vector<256x1xi32>
    %24 = arith.addi %13, %23 : vector<256x1xi32>
    %25 = arith.select %22, %24, %13 : vector<256x1xi1>, vector<256x1xi32>
    %c0_i32_10 = arith.constant 0 : i32
    %26 = vector.broadcast %c0_i32_10 : i32 to vector<256x1xi32>
    %27 = arith.cmpi eq, %25, %26 : vector<256x1xi32>
    %c15_i32 = arith.constant 15 : i32
    %28 = vector.broadcast %c15_i32 : i32 to vector<256x1xi32>
    %29 = arith.cmpi eq, %25, %28 : vector<256x1xi32>
    %30 = arith.truncf %8 : vector<256x64xf32> to vector<256x64xbf16>
    %c0_11 = arith.constant 0 : index
    %c0_12 = arith.constant 0 : index
    %31 = vector.load %arg5[%c0_11, %c0_12] : memref<1x64xf32, #tpu.memory_space<vmem>>, vector<1x64xf32>
    %cst_13 = arith.constant 0.000000e+00 : f32
    %32 = vector.broadcast %cst_13 : f32 to vector<256x64xf32>
    %cst_14 = arith.constant 0.000000e+00 : bf16
    %33 = vector.broadcast %cst_14 : bf16 to vector<1x64xbf16>
    %34 = vector.extract_strided_slice %30 {offsets = [0, 0], sizes = [255, 64], strides = [1, 1]} : vector<256x64xbf16> to vector<255x64xbf16>
    %35 = tpu.concatenate %33, %34 in 0 : vector<1x64xbf16>, vector<255x64xbf16> -> vector<256x64xbf16>
    %cst_15 = arith.constant 0.000000e+00 : bf16
    %36 = vector.shape_cast %27 : vector<256x1xi1> to vector<256x1xi1>
    %37 = vector.broadcast %36 : vector<256x1xi1> to vector<256x64xi1>
    %38 = vector.broadcast %cst_15 : bf16 to vector<256x64xbf16>
    %39 = arith.select %37, %38, %35 : vector<256x64xi1>, vector<256x64xbf16>
    %cst_16 = arith.constant 0.000000e+00 : bf16
    %40 = vector.broadcast %cst_16 : bf16 to vector<16x64xbf16>
    %41 = vector.extract_strided_slice %39 {offsets = [0, 0], sizes = [240, 64], strides = [1, 1]} : vector<256x64xbf16> to vector<240x64xbf16>
    %42 = tpu.concatenate %40, %41 in 0 : vector<16x64xbf16>, vector<240x64xbf16> -> vector<256x64xbf16>
    %c0_17 = arith.constant 0 : index
    %c0_18 = arith.constant 0 : index
    %c0_19 = arith.constant 0 : index
    %43 = vector.load %arg4[%c0_17, %c0_18, %c0_19] : memref<9x64x64xbf16, #tpu.memory_space<vmem>>, vector<1x64x64xbf16>
    %44 = vector.shape_cast %43 : vector<1x64x64xbf16> to vector<64x64xbf16>
    %cst_20 = arith.constant dense<0.000000e+00> : vector<256x64xf32>
    %45 = tpu.matmul %42, %44, %cst_20 {dimension_numbers = #tpu.dot_dimension_numbers<[1], [0], [0], [1], [0, 0, 1, 1], [], []>} : vector<256x64xbf16>, vector<64x64xbf16>, vector<256x64xf32> -> vector<256x64xf32>
    %46 = arith.addf %32, %45 : vector<256x64xf32>
    %c3 = arith.constant 3 : index
    %c0_21 = arith.constant 0 : index
    %c0_22 = arith.constant 0 : index
    %47 = vector.load %arg4[%c3, %c0_21, %c0_22] : memref<9x64x64xbf16, #tpu.memory_space<vmem>>, vector<1x64x64xbf16>
    %48 = vector.shape_cast %47 : vector<1x64x64xbf16> to vector<64x64xbf16>
    %cst_23 = arith.constant dense<0.000000e+00> : vector<256x64xf32>
    %49 = tpu.matmul %39, %48, %cst_23 {dimension_numbers = #tpu.dot_dimension_numbers<[1], [0], [0], [1], [0, 0, 1, 1], [], []>} : vector<256x64xbf16>, vector<64x64xbf16>, vector<256x64xf32> -> vector<256x64xf32>
    %50 = arith.addf %46, %49 : vector<256x64xf32>
    %cst_24 = arith.constant 0.000000e+00 : bf16
    %51 = vector.broadcast %cst_24 : bf16 to vector<16x64xbf16>
    %52 = vector.extract_strided_slice %39 {offsets = [16, 0], sizes = [240, 64], strides = [1, 1]} : vector<256x64xbf16> to vector<240x64xbf16>
    %53 = tpu.concatenate %52, %51 in 0 : vector<240x64xbf16>, vector<16x64xbf16> -> vector<256x64xbf16>
    %c6 = arith.constant 6 : index
    %c0_25 = arith.constant 0 : index
    %c0_26 = arith.constant 0 : index
    %54 = vector.load %arg4[%c6, %c0_25, %c0_26] : memref<9x64x64xbf16, #tpu.memory_space<vmem>>, vector<1x64x64xbf16>
    %55 = vector.shape_cast %54 : vector<1x64x64xbf16> to vector<64x64xbf16>
    %cst_27 = arith.constant dense<0.000000e+00> : vector<256x64xf32>
    %56 = tpu.matmul %53, %55, %cst_27 {dimension_numbers = #tpu.dot_dimension_numbers<[1], [0], [0], [1], [0, 0, 1, 1], [], []>} : vector<256x64xbf16>, vector<64x64xbf16>, vector<256x64xf32> -> vector<256x64xf32>
    %57 = arith.addf %50, %56 : vector<256x64xf32>
    %cst_28 = arith.constant 0.000000e+00 : bf16
    %58 = vector.broadcast %cst_28 : bf16 to vector<16x64xbf16>
    %59 = vector.extract_strided_slice %30 {offsets = [0, 0], sizes = [240, 64], strides = [1, 1]} : vector<256x64xbf16> to vector<240x64xbf16>
    %60 = tpu.concatenate %58, %59 in 0 : vector<16x64xbf16>, vector<240x64xbf16> -> vector<256x64xbf16>
    %c1 = arith.constant 1 : index
    %c0_29 = arith.constant 0 : index
    %c0_30 = arith.constant 0 : index
    %61 = vector.load %arg4[%c1, %c0_29, %c0_30] : memref<9x64x64xbf16, #tpu.memory_space<vmem>>, vector<1x64x64xbf16>
    %62 = vector.shape_cast %61 : vector<1x64x64xbf16> to vector<64x64xbf16>
    %cst_31 = arith.constant dense<0.000000e+00> : vector<256x64xf32>
    %63 = tpu.matmul %60, %62, %cst_31 {dimension_numbers = #tpu.dot_dimension_numbers<[1], [0], [0], [1], [0, 0, 1, 1], [], []>} : vector<256x64xbf16>, vector<64x64xbf16>, vector<256x64xf32> -> vector<256x64xf32>
    %64 = arith.addf %57, %63 : vector<256x64xf32>
    %c4 = arith.constant 4 : index
    %c0_32 = arith.constant 0 : index
    %c0_33 = arith.constant 0 : index
    %65 = vector.load %arg4[%c4, %c0_32, %c0_33] : memref<9x64x64xbf16, #tpu.memory_space<vmem>>, vector<1x64x64xbf16>
    %66 = vector.shape_cast %65 : vector<1x64x64xbf16> to vector<64x64xbf16>
    %cst_34 = arith.constant dense<0.000000e+00> : vector<256x64xf32>
    %67 = tpu.matmul %30, %66, %cst_34 {dimension_numbers = #tpu.dot_dimension_numbers<[1], [0], [0], [1], [0, 0, 1, 1], [], []>} : vector<256x64xbf16>, vector<64x64xbf16>, vector<256x64xf32> -> vector<256x64xf32>
    %68 = arith.addf %64, %67 : vector<256x64xf32>
    %cst_35 = arith.constant 0.000000e+00 : bf16
    %69 = vector.broadcast %cst_35 : bf16 to vector<16x64xbf16>
    %70 = vector.extract_strided_slice %30 {offsets = [16, 0], sizes = [240, 64], strides = [1, 1]} : vector<256x64xbf16> to vector<240x64xbf16>
    %71 = tpu.concatenate %70, %69 in 0 : vector<240x64xbf16>, vector<16x64xbf16> -> vector<256x64xbf16>
    %c7 = arith.constant 7 : index
    %c0_36 = arith.constant 0 : index
    %c0_37 = arith.constant 0 : index
    %72 = vector.load %arg4[%c7, %c0_36, %c0_37] : memref<9x64x64xbf16, #tpu.memory_space<vmem>>, vector<1x64x64xbf16>
    %73 = vector.shape_cast %72 : vector<1x64x64xbf16> to vector<64x64xbf16>
    %cst_38 = arith.constant dense<0.000000e+00> : vector<256x64xf32>
    %74 = tpu.matmul %71, %73, %cst_38 {dimension_numbers = #tpu.dot_dimension_numbers<[1], [0], [0], [1], [0, 0, 1, 1], [], []>} : vector<256x64xbf16>, vector<64x64xbf16>, vector<256x64xf32> -> vector<256x64xf32>
    %75 = arith.addf %68, %74 : vector<256x64xf32>
    %cst_39 = arith.constant 0.000000e+00 : bf16
    %76 = vector.broadcast %cst_39 : bf16 to vector<1x64xbf16>
    %77 = vector.extract_strided_slice %30 {offsets = [1, 0], sizes = [255, 64], strides = [1, 1]} : vector<256x64xbf16> to vector<255x64xbf16>
    %78 = tpu.concatenate %77, %76 in 0 : vector<255x64xbf16>, vector<1x64xbf16> -> vector<256x64xbf16>
    %cst_40 = arith.constant 0.000000e+00 : bf16
    %79 = vector.shape_cast %29 : vector<256x1xi1> to vector<256x1xi1>
    %80 = vector.broadcast %79 : vector<256x1xi1> to vector<256x64xi1>
    %81 = vector.broadcast %cst_40 : bf16 to vector<256x64xbf16>
    %82 = arith.select %80, %81, %78 : vector<256x64xi1>, vector<256x64xbf16>
    %cst_41 = arith.constant 0.000000e+00 : bf16
    %83 = vector.broadcast %cst_41 : bf16 to vector<16x64xbf16>
    %84 = vector.extract_strided_slice %82 {offsets = [0, 0], sizes = [240, 64], strides = [1, 1]} : vector<256x64xbf16> to vector<240x64xbf16>
    %85 = tpu.concatenate %83, %84 in 0 : vector<16x64xbf16>, vector<240x64xbf16> -> vector<256x64xbf16>
    %c2 = arith.constant 2 : index
    %c0_42 = arith.constant 0 : index
    %c0_43 = arith.constant 0 : index
    %86 = vector.load %arg4[%c2, %c0_42, %c0_43] : memref<9x64x64xbf16, #tpu.memory_space<vmem>>, vector<1x64x64xbf16>
    %87 = vector.shape_cast %86 : vector<1x64x64xbf16> to vector<64x64xbf16>
    %cst_44 = arith.constant dense<0.000000e+00> : vector<256x64xf32>
    %88 = tpu.matmul %85, %87, %cst_44 {dimension_numbers = #tpu.dot_dimension_numbers<[1], [0], [0], [1], [0, 0, 1, 1], [], []>} : vector<256x64xbf16>, vector<64x64xbf16>, vector<256x64xf32> -> vector<256x64xf32>
    %89 = arith.addf %75, %88 : vector<256x64xf32>
    %c5 = arith.constant 5 : index
    %c0_45 = arith.constant 0 : index
    %c0_46 = arith.constant 0 : index
    %90 = vector.load %arg4[%c5, %c0_45, %c0_46] : memref<9x64x64xbf16, #tpu.memory_space<vmem>>, vector<1x64x64xbf16>
    %91 = vector.shape_cast %90 : vector<1x64x64xbf16> to vector<64x64xbf16>
    %cst_47 = arith.constant dense<0.000000e+00> : vector<256x64xf32>
    %92 = tpu.matmul %82, %91, %cst_47 {dimension_numbers = #tpu.dot_dimension_numbers<[1], [0], [0], [1], [0, 0, 1, 1], [], []>} : vector<256x64xbf16>, vector<64x64xbf16>, vector<256x64xf32> -> vector<256x64xf32>
    %93 = arith.addf %89, %92 : vector<256x64xf32>
    %cst_48 = arith.constant 0.000000e+00 : bf16
    %94 = vector.broadcast %cst_48 : bf16 to vector<16x64xbf16>
    %95 = vector.extract_strided_slice %82 {offsets = [16, 0], sizes = [240, 64], strides = [1, 1]} : vector<256x64xbf16> to vector<240x64xbf16>
    %96 = tpu.concatenate %95, %94 in 0 : vector<240x64xbf16>, vector<16x64xbf16> -> vector<256x64xbf16>
    %c8 = arith.constant 8 : index
    %c0_49 = arith.constant 0 : index
    %c0_50 = arith.constant 0 : index
    %97 = vector.load %arg4[%c8, %c0_49, %c0_50] : memref<9x64x64xbf16, #tpu.memory_space<vmem>>, vector<1x64x64xbf16>
    %98 = vector.shape_cast %97 : vector<1x64x64xbf16> to vector<64x64xbf16>
    %cst_51 = arith.constant dense<0.000000e+00> : vector<256x64xf32>
    %99 = tpu.matmul %96, %98, %cst_51 {dimension_numbers = #tpu.dot_dimension_numbers<[1], [0], [0], [1], [0, 0, 1, 1], [], []>} : vector<256x64xbf16>, vector<64x64xbf16>, vector<256x64xf32> -> vector<256x64xf32>
    %100 = arith.addf %93, %99 : vector<256x64xf32>
    %101 = vector.broadcast %31 : vector<1x64xf32> to vector<256x64xf32>
    %102 = arith.addf %100, %101 : vector<256x64xf32>
    %cst_52 = arith.constant 0.000000e+00 : f32
    %103 = vector.broadcast %cst_52 : f32 to vector<256x64xf32>
    %104 = arith.maximumf %102, %103 : vector<256x64xf32>
    %cst_53 = arith.constant 0.000000e+00 : f32
    %105 = vector.broadcast %cst_53 : f32 to vector<1x64xf32>
    %106 = vector.extract_strided_slice %104 {offsets = [1, 0], sizes = [255, 64], strides = [1, 1]} : vector<256x64xf32> to vector<255x64xf32>
    %107 = tpu.concatenate %106, %105 in 0 : vector<255x64xf32>, vector<1x64xf32> -> vector<256x64xf32>
    %108 = arith.maximumf %104, %107 : vector<256x64xf32>
    %cst_54 = arith.constant 0.000000e+00 : f32
    %109 = vector.broadcast %cst_54 : f32 to vector<16x64xf32>
    %110 = vector.extract_strided_slice %108 {offsets = [16, 0], sizes = [240, 64], strides = [1, 1]} : vector<256x64xf32> to vector<240x64xf32>
    %111 = tpu.concatenate %110, %109 in 0 : vector<240x64xf32>, vector<16x64xf32> -> vector<256x64xf32>
    %112 = arith.maximumf %108, %111 : vector<256x64xf32>
    %113 = vector.extract_strided_slice %112 {offsets = [0, 0], sizes = [32, 64], strides = [1, 1]} : vector<256x64xf32> to vector<32x64xf32>
    %c0_55 = arith.constant 0 : index
    %c0_56 = arith.constant 0 : index
    %c0_57 = arith.constant 0 : index
    %114 = vector.load %arg11[%c0_55, %c0_56, %c0_57] : memref<8x32x64xf32, #tpu.memory_space<vmem>>, vector<1x32x64xf32>
    %115 = vector.shape_cast %114 : vector<1x32x64xf32> to vector<32x64xf32>
    %116 = vector.shape_cast %113 : vector<32x64xf32> to vector<1x32x64xf32>
    tpu.vector_store %arg11[%c0_55, %c0_56, %c0_57], %116 {strides = array<i32>} : memref<8x32x64xf32, #tpu.memory_space<vmem>>, vector<1x32x64xf32>,
    %117 = vector.extract_strided_slice %112 {offsets = [32, 0], sizes = [32, 64], strides = [1, 1]} : vector<256x64xf32> to vector<32x64xf32>
    %c1_58 = arith.constant 1 : index
    %c0_59 = arith.constant 0 : index
    %c0_60 = arith.constant 0 : index
    %118 = vector.load %arg11[%c1_58, %c0_59, %c0_60] : memref<8x32x64xf32, #tpu.memory_space<vmem>>, vector<1x32x64xf32>
    %119 = vector.shape_cast %118 : vector<1x32x64xf32> to vector<32x64xf32>
    %120 = vector.shape_cast %117 : vector<32x64xf32> to vector<1x32x64xf32>
    tpu.vector_store %arg11[%c1_58, %c0_59, %c0_60], %120 {strides = array<i32>} : memref<8x32x64xf32, #tpu.memory_space<vmem>>, vector<1x32x64xf32>,
    %121 = vector.extract_strided_slice %112 {offsets = [64, 0], sizes = [32, 64], strides = [1, 1]} : vector<256x64xf32> to vector<32x64xf32>
    %c2_61 = arith.constant 2 : index
    %c0_62 = arith.constant 0 : index
    %c0_63 = arith.constant 0 : index
    %122 = vector.load %arg11[%c2_61, %c0_62, %c0_63] : memref<8x32x64xf32, #tpu.memory_space<vmem>>, vector<1x32x64xf32>
    %123 = vector.shape_cast %122 : vector<1x32x64xf32> to vector<32x64xf32>
    %124 = vector.shape_cast %121 : vector<32x64xf32> to vector<1x32x64xf32>
    tpu.vector_store %arg11[%c2_61, %c0_62, %c0_63], %124 {strides = array<i32>} : memref<8x32x64xf32, #tpu.memory_space<vmem>>, vector<1x32x64xf32>,
    %125 = vector.extract_strided_slice %112 {offsets = [96, 0], sizes = [32, 64], strides = [1, 1]} : vector<256x64xf32> to vector<32x64xf32>
    %c3_64 = arith.constant 3 : index
    %c0_65 = arith.constant 0 : index
    %c0_66 = arith.constant 0 : index
    %126 = vector.load %arg11[%c3_64, %c0_65, %c0_66] : memref<8x32x64xf32, #tpu.memory_space<vmem>>, vector<1x32x64xf32>
    %127 = vector.shape_cast %126 : vector<1x32x64xf32> to vector<32x64xf32>
    %128 = vector.shape_cast %125 : vector<32x64xf32> to vector<1x32x64xf32>
    tpu.vector_store %arg11[%c3_64, %c0_65, %c0_66], %128 {strides = array<i32>} : memref<8x32x64xf32, #tpu.memory_space<vmem>>, vector<1x32x64xf32>,
    %129 = vector.extract_strided_slice %112 {offsets = [128, 0], sizes = [32, 64], strides = [1, 1]} : vector<256x64xf32> to vector<32x64xf32>
    %c4_67 = arith.constant 4 : index
    %c0_68 = arith.constant 0 : index
    %c0_69 = arith.constant 0 : index
    %130 = vector.load %arg11[%c4_67, %c0_68, %c0_69] : memref<8x32x64xf32, #tpu.memory_space<vmem>>, vector<1x32x64xf32>
    %131 = vector.shape_cast %130 : vector<1x32x64xf32> to vector<32x64xf32>
    %132 = vector.shape_cast %129 : vector<32x64xf32> to vector<1x32x64xf32>
    tpu.vector_store %arg11[%c4_67, %c0_68, %c0_69], %132 {strides = array<i32>} : memref<8x32x64xf32, #tpu.memory_space<vmem>>, vector<1x32x64xf32>,
    %133 = vector.extract_strided_slice %112 {offsets = [160, 0], sizes = [32, 64], strides = [1, 1]} : vector<256x64xf32> to vector<32x64xf32>
    %c5_70 = arith.constant 5 : index
    %c0_71 = arith.constant 0 : index
    %c0_72 = arith.constant 0 : index
    %134 = vector.load %arg11[%c5_70, %c0_71, %c0_72] : memref<8x32x64xf32, #tpu.memory_space<vmem>>, vector<1x32x64xf32>
    %135 = vector.shape_cast %134 : vector<1x32x64xf32> to vector<32x64xf32>
    %136 = vector.shape_cast %133 : vector<32x64xf32> to vector<1x32x64xf32>
    tpu.vector_store %arg11[%c5_70, %c0_71, %c0_72], %136 {strides = array<i32>} : memref<8x32x64xf32, #tpu.memory_space<vmem>>, vector<1x32x64xf32>,
    %137 = vector.extract_strided_slice %112 {offsets = [192, 0], sizes = [32, 64], strides = [1, 1]} : vector<256x64xf32> to vector<32x64xf32>
    %c6_73 = arith.constant 6 : index
    %c0_74 = arith.constant 0 : index
    %c0_75 = arith.constant 0 : index
    %138 = vector.load %arg11[%c6_73, %c0_74, %c0_75] : memref<8x32x64xf32, #tpu.memory_space<vmem>>, vector<1x32x64xf32>
    %139 = vector.shape_cast %138 : vector<1x32x64xf32> to vector<32x64xf32>
    %140 = vector.shape_cast %137 : vector<32x64xf32> to vector<1x32x64xf32>
    tpu.vector_store %arg11[%c6_73, %c0_74, %c0_75], %140 {strides = array<i32>} : memref<8x32x64xf32, #tpu.memory_space<vmem>>, vector<1x32x64xf32>,
    %141 = vector.extract_strided_slice %112 {offsets = [224, 0], sizes = [32, 64], strides = [1, 1]} : vector<256x64xf32> to vector<32x64xf32>
    %c7_76 = arith.constant 7 : index
    %c0_77 = arith.constant 0 : index
    %c0_78 = arith.constant 0 : index
    %142 = vector.load %arg11[%c7_76, %c0_77, %c0_78] : memref<8x32x64xf32, #tpu.memory_space<vmem>>, vector<1x32x64xf32>
    %143 = vector.shape_cast %142 : vector<1x32x64xf32> to vector<32x64xf32>
    %144 = vector.shape_cast %141 : vector<32x64xf32> to vector<1x32x64xf32>
    tpu.vector_store %arg11[%c7_76, %c0_77, %c0_78], %144 {strides = array<i32>} : memref<8x32x64xf32, #tpu.memory_space<vmem>>, vector<1x32x64xf32>,
    %c0_79 = arith.constant 0 : index
    %c0_80 = arith.constant 0 : index
    %c0_81 = arith.constant 0 : index
    %145 = tpu.strided_load %arg11[%c0_79, %c0_80, %c0_81] {strides = array<i32: 1, 2, 1>} : memref<8x32x64xf32, #tpu.memory_space<vmem>>, vector<8x8x64xf32>
    %146 = vector.shape_cast %145 : vector<8x8x64xf32> to vector<64x64xf32>
    %147 = tpu.iota {dimensions = array<i32: 0>} : vector<64x1xi32>
    %c8_i32 = arith.constant 8 : i32
    %c0_i32_82 = arith.constant 0 : i32
    %148 = arith.cmpi eq, %c8_i32, %c0_i32_82 : i32
    %c1_i32_83 = arith.constant 1 : i32
    %149 = arith.select %148, %c1_i32_83, %c8_i32 : i32
    %150 = vector.broadcast %149 : i32 to vector<64x1xi32>
    %151 = arith.remsi %147, %150 : vector<64x1xi32>
    %c0_i32_84 = arith.constant 0 : i32
    %152 = vector.broadcast %c0_i32_84 : i32 to vector<64x1xi32>
    %153 = arith.cmpi ne, %151, %152 : vector<64x1xi32>
    %c0_i32_85 = arith.constant 0 : i32
    %154 = vector.broadcast %c0_i32_85 : i32 to vector<64x1xi32>
    %155 = arith.cmpi slt, %151, %154 : vector<64x1xi32>
    %c0_i32_86 = arith.constant 0 : i32
    %156 = arith.cmpi slt, %149, %c0_i32_86 : i32
    %157 = vector.broadcast %156 : i1 to vector<64x1xi1>
    %158 = vector.broadcast %157 : vector<64x1xi1> to vector<64x1xi1>
    %159 = arith.xori %155, %158 : vector<64x1xi1>
    %160 = arith.andi %159, %153 : vector<64x1xi1>
    %161 = vector.broadcast %149 : i32 to vector<64x1xi32>
    %162 = arith.addi %151, %161 : vector<64x1xi32>
    %163 = arith.select %160, %162, %151 : vector<64x1xi1>, vector<64x1xi32>
    %c0_i32_87 = arith.constant 0 : i32
    %164 = vector.broadcast %c0_i32_87 : i32 to vector<64x1xi32>
    %165 = arith.cmpi eq, %163, %164 : vector<64x1xi32>
    %c7_i32 = arith.constant 7 : i32
    %166 = vector.broadcast %c7_i32 : i32 to vector<64x1xi32>
    %167 = arith.cmpi eq, %163, %166 : vector<64x1xi32>
    %168 = arith.truncf %146 : vector<64x64xf32> to vector<64x64xbf16>
    %c0_88 = arith.constant 0 : index
    %c0_89 = arith.constant 0 : index
    %169 = vector.load %arg7[%c0_88, %c0_89] : memref<1x128xf32, #tpu.memory_space<vmem>>, vector<1x128xf32>
    %cst_90 = arith.constant 0.000000e+00 : f32
    %170 = vector.broadcast %cst_90 : f32 to vector<64x128xf32>
    %cst_91 = arith.constant 0.000000e+00 : bf16
    %171 = vector.broadcast %cst_91 : bf16 to vector<1x64xbf16>
    %172 = vector.extract_strided_slice %168 {offsets = [0, 0], sizes = [63, 64], strides = [1, 1]} : vector<64x64xbf16> to vector<63x64xbf16>
    %173 = tpu.concatenate %171, %172 in 0 : vector<1x64xbf16>, vector<63x64xbf16> -> vector<64x64xbf16>
    %cst_92 = arith.constant 0.000000e+00 : bf16
    %174 = vector.shape_cast %165 : vector<64x1xi1> to vector<64x1xi1>
    %175 = vector.broadcast %174 : vector<64x1xi1> to vector<64x64xi1>
    %176 = vector.broadcast %cst_92 : bf16 to vector<64x64xbf16>
    %177 = arith.select %175, %176, %173 : vector<64x64xi1>, vector<64x64xbf16>
    %cst_93 = arith.constant 0.000000e+00 : bf16
    %178 = vector.broadcast %cst_93 : bf16 to vector<8x64xbf16>
    %179 = vector.extract_strided_slice %177 {offsets = [0, 0], sizes = [56, 64], strides = [1, 1]} : vector<64x64xbf16> to vector<56x64xbf16>
    %180 = tpu.concatenate %178, %179 in 0 : vector<8x64xbf16>, vector<56x64xbf16> -> vector<64x64xbf16>
    %c0_94 = arith.constant 0 : index
    %c0_95 = arith.constant 0 : index
    %c0_96 = arith.constant 0 : index
    %181 = vector.load %arg6[%c0_94, %c0_95, %c0_96] : memref<9x64x128xbf16, #tpu.memory_space<vmem>>, vector<1x64x128xbf16>
    %182 = vector.shape_cast %181 : vector<1x64x128xbf16> to vector<64x128xbf16>
    %cst_97 = arith.constant dense<0.000000e+00> : vector<64x128xf32>
    %183 = tpu.matmul %180, %182, %cst_97 {dimension_numbers = #tpu.dot_dimension_numbers<[1], [0], [0], [1], [0, 0, 1, 1], [], []>} : vector<64x64xbf16>, vector<64x128xbf16>, vector<64x128xf32> -> vector<64x128xf32>
    %184 = arith.addf %170, %183 : vector<64x128xf32>
    %c3_98 = arith.constant 3 : index
    %c0_99 = arith.constant 0 : index
    %c0_100 = arith.constant 0 : index
    %185 = vector.load %arg6[%c3_98, %c0_99, %c0_100] : memref<9x64x128xbf16, #tpu.memory_space<vmem>>, vector<1x64x128xbf16>
    %186 = vector.shape_cast %185 : vector<1x64x128xbf16> to vector<64x128xbf16>
    %cst_101 = arith.constant dense<0.000000e+00> : vector<64x128xf32>
    %187 = tpu.matmul %177, %186, %cst_101 {dimension_numbers = #tpu.dot_dimension_numbers<[1], [0], [0], [1], [0, 0, 1, 1], [], []>} : vector<64x64xbf16>, vector<64x128xbf16>, vector<64x128xf32> -> vector<64x128xf32>
    %188 = arith.addf %184, %187 : vector<64x128xf32>
    %cst_102 = arith.constant 0.000000e+00 : bf16
    %189 = vector.broadcast %cst_102 : bf16 to vector<8x64xbf16>
    %190 = vector.extract_strided_slice %177 {offsets = [8, 0], sizes = [56, 64], strides = [1, 1]} : vector<64x64xbf16> to vector<56x64xbf16>
    %191 = tpu.concatenate %190, %189 in 0 : vector<56x64xbf16>, vector<8x64xbf16> -> vector<64x64xbf16>
    %c6_103 = arith.constant 6 : index
    %c0_104 = arith.constant 0 : index
    %c0_105 = arith.constant 0 : index
    %192 = vector.load %arg6[%c6_103, %c0_104, %c0_105] : memref<9x64x128xbf16, #tpu.memory_space<vmem>>, vector<1x64x128xbf16>
    %193 = vector.shape_cast %192 : vector<1x64x128xbf16> to vector<64x128xbf16>
    %cst_106 = arith.constant dense<0.000000e+00> : vector<64x128xf32>
    %194 = tpu.matmul %191, %193, %cst_106 {dimension_numbers = #tpu.dot_dimension_numbers<[1], [0], [0], [1], [0, 0, 1, 1], [], []>} : vector<64x64xbf16>, vector<64x128xbf16>, vector<64x128xf32> -> vector<64x128xf32>
    %195 = arith.addf %188, %194 : vector<64x128xf32>
    %cst_107 = arith.constant 0.000000e+00 : bf16
    %196 = vector.broadcast %cst_107 : bf16 to vector<8x64xbf16>
    %197 = vector.extract_strided_slice %168 {offsets = [0, 0], sizes = [56, 64], strides = [1, 1]} : vector<64x64xbf16> to vector<56x64xbf16>
    %198 = tpu.concatenate %196, %197 in 0 : vector<8x64xbf16>, vector<56x64xbf16> -> vector<64x64xbf16>
    %c1_108 = arith.constant 1 : index
    %c0_109 = arith.constant 0 : index
    %c0_110 = arith.constant 0 : index
    %199 = vector.load %arg6[%c1_108, %c0_109, %c0_110] : memref<9x64x128xbf16, #tpu.memory_space<vmem>>, vector<1x64x128xbf16>
    %200 = vector.shape_cast %199 : vector<1x64x128xbf16> to vector<64x128xbf16>
    %cst_111 = arith.constant dense<0.000000e+00> : vector<64x128xf32>
    %201 = tpu.matmul %198, %200, %cst_111 {dimension_numbers = #tpu.dot_dimension_numbers<[1], [0], [0], [1], [0, 0, 1, 1], [], []>} : vector<64x64xbf16>, vector<64x128xbf16>, vector<64x128xf32> -> vector<64x128xf32>
    %202 = arith.addf %195, %201 : vector<64x128xf32>
    %c4_112 = arith.constant 4 : index
    %c0_113 = arith.constant 0 : index
    %c0_114 = arith.constant 0 : index
    %203 = vector.load %arg6[%c4_112, %c0_113, %c0_114] : memref<9x64x128xbf16, #tpu.memory_space<vmem>>, vector<1x64x128xbf16>
    %204 = vector.shape_cast %203 : vector<1x64x128xbf16> to vector<64x128xbf16>
    %cst_115 = arith.constant dense<0.000000e+00> : vector<64x128xf32>
    %205 = tpu.matmul %168, %204, %cst_115 {dimension_numbers = #tpu.dot_dimension_numbers<[1], [0], [0], [1], [0, 0, 1, 1], [], []>} : vector<64x64xbf16>, vector<64x128xbf16>, vector<64x128xf32> -> vector<64x128xf32>
    %206 = arith.addf %202, %205 : vector<64x128xf32>
    %cst_116 = arith.constant 0.000000e+00 : bf16
    %207 = vector.broadcast %cst_116 : bf16 to vector<8x64xbf16>
    %208 = vector.extract_strided_slice %168 {offsets = [8, 0], sizes = [56, 64], strides = [1, 1]} : vector<64x64xbf16> to vector<56x64xbf16>
    %209 = tpu.concatenate %208, %207 in 0 : vector<56x64xbf16>, vector<8x64xbf16> -> vector<64x64xbf16>
    %c7_117 = arith.constant 7 : index
    %c0_118 = arith.constant 0 : index
    %c0_119 = arith.constant 0 : index
    %210 = vector.load %arg6[%c7_117, %c0_118, %c0_119] : memref<9x64x128xbf16, #tpu.memory_space<vmem>>, vector<1x64x128xbf16>
    %211 = vector.shape_cast %210 : vector<1x64x128xbf16> to vector<64x128xbf16>
    %cst_120 = arith.constant dense<0.000000e+00> : vector<64x128xf32>
    %212 = tpu.matmul %209, %211, %cst_120 {dimension_numbers = #tpu.dot_dimension_numbers<[1], [0], [0], [1], [0, 0, 1, 1], [], []>} : vector<64x64xbf16>, vector<64x128xbf16>, vector<64x128xf32> -> vector<64x128xf32>
    %213 = arith.addf %206, %212 : vector<64x128xf32>
    %cst_121 = arith.constant 0.000000e+00 : bf16
    %214 = vector.broadcast %cst_121 : bf16 to vector<1x64xbf16>
    %215 = vector.extract_strided_slice %168 {offsets = [1, 0], sizes = [63, 64], strides = [1, 1]} : vector<64x64xbf16> to vector<63x64xbf16>
    %216 = tpu.concatenate %215, %214 in 0 : vector<63x64xbf16>, vector<1x64xbf16> -> vector<64x64xbf16>
    %cst_122 = arith.constant 0.000000e+00 : bf16
    %217 = vector.shape_cast %167 : vector<64x1xi1> to vector<64x1xi1>
    %218 = vector.broadcast %217 : vector<64x1xi1> to vector<64x64xi1>
    %219 = vector.broadcast %cst_122 : bf16 to vector<64x64xbf16>
    %220 = arith.select %218, %219, %216 : vector<64x64xi1>, vector<64x64xbf16>
    %cst_123 = arith.constant 0.000000e+00 : bf16
    %221 = vector.broadcast %cst_123 : bf16 to vector<8x64xbf16>
    %222 = vector.extract_strided_slice %220 {offsets = [0, 0], sizes = [56, 64], strides = [1, 1]} : vector<64x64xbf16> to vector<56x64xbf16>
    %223 = tpu.concatenate %221, %222 in 0 : vector<8x64xbf16>, vector<56x64xbf16> -> vector<64x64xbf16>
    %c2_124 = arith.constant 2 : index
    %c0_125 = arith.constant 0 : index
    %c0_126 = arith.constant 0 : index
    %224 = vector.load %arg6[%c2_124, %c0_125, %c0_126] : memref<9x64x128xbf16, #tpu.memory_space<vmem>>, vector<1x64x128xbf16>
    %225 = vector.shape_cast %224 : vector<1x64x128xbf16> to vector<64x128xbf16>
    %cst_127 = arith.constant dense<0.000000e+00> : vector<64x128xf32>
    %226 = tpu.matmul %223, %225, %cst_127 {dimension_numbers = #tpu.dot_dimension_numbers<[1], [0], [0], [1], [0, 0, 1, 1], [], []>} : vector<64x64xbf16>, vector<64x128xbf16>, vector<64x128xf32> -> vector<64x128xf32>
    %227 = arith.addf %213, %226 : vector<64x128xf32>
    %c5_128 = arith.constant 5 : index
    %c0_129 = arith.constant 0 : index
    %c0_130 = arith.constant 0 : index
    %228 = vector.load %arg6[%c5_128, %c0_129, %c0_130] : memref<9x64x128xbf16, #tpu.memory_space<vmem>>, vector<1x64x128xbf16>
    %229 = vector.shape_cast %228 : vector<1x64x128xbf16> to vector<64x128xbf16>
    %cst_131 = arith.constant dense<0.000000e+00> : vector<64x128xf32>
    %230 = tpu.matmul %220, %229, %cst_131 {dimension_numbers = #tpu.dot_dimension_numbers<[1], [0], [0], [1], [0, 0, 1, 1], [], []>} : vector<64x64xbf16>, vector<64x128xbf16>, vector<64x128xf32> -> vector<64x128xf32>
    %231 = arith.addf %227, %230 : vector<64x128xf32>
    %cst_132 = arith.constant 0.000000e+00 : bf16
    %232 = vector.broadcast %cst_132 : bf16 to vector<8x64xbf16>
    %233 = vector.extract_strided_slice %220 {offsets = [8, 0], sizes = [56, 64], strides = [1, 1]} : vector<64x64xbf16> to vector<56x64xbf16>
    %234 = tpu.concatenate %233, %232 in 0 : vector<56x64xbf16>, vector<8x64xbf16> -> vector<64x64xbf16>
    %c8_133 = arith.constant 8 : index
    %c0_134 = arith.constant 0 : index
    %c0_135 = arith.constant 0 : index
    %235 = vector.load %arg6[%c8_133, %c0_134, %c0_135] : memref<9x64x128xbf16, #tpu.memory_space<vmem>>, vector<1x64x128xbf16>
    %236 = vector.shape_cast %235 : vector<1x64x128xbf16> to vector<64x128xbf16>
    %cst_136 = arith.constant dense<0.000000e+00> : vector<64x128xf32>
    %237 = tpu.matmul %234, %236, %cst_136 {dimension_numbers = #tpu.dot_dimension_numbers<[1], [0], [0], [1], [0, 0, 1, 1], [], []>} : vector<64x64xbf16>, vector<64x128xbf16>, vector<64x128xf32> -> vector<64x128xf32>
    %238 = arith.addf %231, %237 : vector<64x128xf32>
    %239 = vector.broadcast %169 : vector<1x128xf32> to vector<64x128xf32>
    %240 = arith.addf %238, %239 : vector<64x128xf32>
    %cst_137 = arith.constant 0.000000e+00 : f32
    %241 = vector.broadcast %cst_137 : f32 to vector<64x128xf32>
    %242 = arith.maximumf %240, %241 : vector<64x128xf32>
    %243 = arith.truncf %242 : vector<64x128xf32> to vector<64x128xbf16>
    %c0_138 = arith.constant 0 : index
    %c0_139 = arith.constant 0 : index
    %244 = vector.load %arg9[%c0_138, %c0_139] : memref<1x128xf32, #tpu.memory_space<vmem>>, vector<1x128xf32>
    %cst_140 = arith.constant 0.000000e+00 : f32
    %245 = vector.broadcast %cst_140 : f32 to vector<64x128xf32>
    %cst_141 = arith.constant 0.000000e+00 : bf16
    %246 = vector.broadcast %cst_141 : bf16 to vector<1x128xbf16>
    %247 = vector.extract_strided_slice %243 {offsets = [0, 0], sizes = [63, 128], strides = [1, 1]} : vector<64x128xbf16> to vector<63x128xbf16>
    %248 = tpu.concatenate %246, %247 in 0 : vector<1x128xbf16>, vector<63x128xbf16> -> vector<64x128xbf16>
    %cst_142 = arith.constant 0.000000e+00 : bf16
    %249 = vector.shape_cast %165 : vector<64x1xi1> to vector<64x1xi1>
    %250 = vector.broadcast %249 : vector<64x1xi1> to vector<64x128xi1>
    %251 = vector.broadcast %cst_142 : bf16 to vector<64x128xbf16>
    %252 = arith.select %250, %251, %248 : vector<64x128xi1>, vector<64x128xbf16>
    %cst_143 = arith.constant 0.000000e+00 : bf16
    %253 = vector.broadcast %cst_143 : bf16 to vector<8x128xbf16>
    %254 = vector.extract_strided_slice %252 {offsets = [0, 0], sizes = [56, 128], strides = [1, 1]} : vector<64x128xbf16> to vector<56x128xbf16>
    %255 = tpu.concatenate %253, %254 in 0 : vector<8x128xbf16>, vector<56x128xbf16> -> vector<64x128xbf16>
    %c0_144 = arith.constant 0 : index
    %c0_145 = arith.constant 0 : index
    %c0_146 = arith.constant 0 : index
    %256 = vector.load %arg8[%c0_144, %c0_145, %c0_146] : memref<9x128x128xbf16, #tpu.memory_space<vmem>>, vector<1x128x128xbf16>
    %257 = vector.shape_cast %256 : vector<1x128x128xbf16> to vector<128x128xbf16>
    %cst_147 = arith.constant dense<0.000000e+00> : vector<64x128xf32>
    %258 = tpu.matmul %255, %257, %cst_147 {dimension_numbers = #tpu.dot_dimension_numbers<[1], [0], [0], [1], [0, 0, 1, 1], [], []>} : vector<64x128xbf16>, vector<128x128xbf16>, vector<64x128xf32> -> vector<64x128xf32>
    %259 = arith.addf %245, %258 : vector<64x128xf32>
    %c3_148 = arith.constant 3 : index
    %c0_149 = arith.constant 0 : index
    %c0_150 = arith.constant 0 : index
    %260 = vector.load %arg8[%c3_148, %c0_149, %c0_150] : memref<9x128x128xbf16, #tpu.memory_space<vmem>>, vector<1x128x128xbf16>
    %261 = vector.shape_cast %260 : vector<1x128x128xbf16> to vector<128x128xbf16>
    %cst_151 = arith.constant dense<0.000000e+00> : vector<64x128xf32>
    %262 = tpu.matmul %252, %261, %cst_151 {dimension_numbers = #tpu.dot_dimension_numbers<[1], [0], [0], [1], [0, 0, 1, 1], [], []>} : vector<64x128xbf16>, vector<128x128xbf16>, vector<64x128xf32> -> vector<64x128xf32>
    %263 = arith.addf %259, %262 : vector<64x128xf32>
    %cst_152 = arith.constant 0.000000e+00 : bf16
    %264 = vector.broadcast %cst_152 : bf16 to vector<8x128xbf16>
    %265 = vector.extract_strided_slice %252 {offsets = [8, 0], sizes = [56, 128], strides = [1, 1]} : vector<64x128xbf16> to vector<56x128xbf16>
    %266 = tpu.concatenate %265, %264 in 0 : vector<56x128xbf16>, vector<8x128xbf16> -> vector<64x128xbf16>
    %c6_153 = arith.constant 6 : index
    %c0_154 = arith.constant 0 : index
    %c0_155 = arith.constant 0 : index
    %267 = vector.load %arg8[%c6_153, %c0_154, %c0_155] : memref<9x128x128xbf16, #tpu.memory_space<vmem>>, vector<1x128x128xbf16>
    %268 = vector.shape_cast %267 : vector<1x128x128xbf16> to vector<128x128xbf16>
    %cst_156 = arith.constant dense<0.000000e+00> : vector<64x128xf32>
    %269 = tpu.matmul %266, %268, %cst_156 {dimension_numbers = #tpu.dot_dimension_numbers<[1], [0], [0], [1], [0, 0, 1, 1], [], []>} : vector<64x128xbf16>, vector<128x128xbf16>, vector<64x128xf32> -> vector<64x128xf32>
    %270 = arith.addf %263, %269 : vector<64x128xf32>
    %cst_157 = arith.constant 0.000000e+00 : bf16
    %271 = vector.broadcast %cst_157 : bf16 to vector<8x128xbf16>
    %272 = vector.extract_strided_slice %243 {offsets = [0, 0], sizes = [56, 128], strides = [1, 1]} : vector<64x128xbf16> to vector<56x128xbf16>
    %273 = tpu.concatenate %271, %272 in 0 : vector<8x128xbf16>, vector<56x128xbf16> -> vector<64x128xbf16>
    %c1_158 = arith.constant 1 : index
    %c0_159 = arith.constant 0 : index
    %c0_160 = arith.constant 0 : index
    %274 = vector.load %arg8[%c1_158, %c0_159, %c0_160] : memref<9x128x128xbf16, #tpu.memory_space<vmem>>, vector<1x128x128xbf16>
    %275 = vector.shape_cast %274 : vector<1x128x128xbf16> to vector<128x128xbf16>
    %cst_161 = arith.constant dense<0.000000e+00> : vector<64x128xf32>
    %276 = tpu.matmul %273, %275, %cst_161 {dimension_numbers = #tpu.dot_dimension_numbers<[1], [0], [0], [1], [0, 0, 1, 1], [], []>} : vector<64x128xbf16>, vector<128x128xbf16>, vector<64x128xf32> -> vector<64x128xf32>
    %277 = arith.addf %270, %276 : vector<64x128xf32>
    %c4_162 = arith.constant 4 : index
    %c0_163 = arith.constant 0 : index
    %c0_164 = arith.constant 0 : index
    %278 = vector.load %arg8[%c4_162, %c0_163, %c0_164] : memref<9x128x128xbf16, #tpu.memory_space<vmem>>, vector<1x128x128xbf16>
    %279 = vector.shape_cast %278 : vector<1x128x128xbf16> to vector<128x128xbf16>
    %cst_165 = arith.constant dense<0.000000e+00> : vector<64x128xf32>
    %280 = tpu.matmul %243, %279, %cst_165 {dimension_numbers = #tpu.dot_dimension_numbers<[1], [0], [0], [1], [0, 0, 1, 1], [], []>} : vector<64x128xbf16>, vector<128x128xbf16>, vector<64x128xf32> -> vector<64x128xf32>
    %281 = arith.addf %277, %280 : vector<64x128xf32>
    %cst_166 = arith.constant 0.000000e+00 : bf16
    %282 = vector.broadcast %cst_166 : bf16 to vector<8x128xbf16>
    %283 = vector.extract_strided_slice %243 {offsets = [8, 0], sizes = [56, 128], strides = [1, 1]} : vector<64x128xbf16> to vector<56x128xbf16>
    %284 = tpu.concatenate %283, %282 in 0 : vector<56x128xbf16>, vector<8x128xbf16> -> vector<64x128xbf16>
    %c7_167 = arith.constant 7 : index
    %c0_168 = arith.constant 0 : index
    %c0_169 = arith.constant 0 : index
    %285 = vector.load %arg8[%c7_167, %c0_168, %c0_169] : memref<9x128x128xbf16, #tpu.memory_space<vmem>>, vector<1x128x128xbf16>
    %286 = vector.shape_cast %285 : vector<1x128x128xbf16> to vector<128x128xbf16>
    %cst_170 = arith.constant dense<0.000000e+00> : vector<64x128xf32>
    %287 = tpu.matmul %284, %286, %cst_170 {dimension_numbers = #tpu.dot_dimension_numbers<[1], [0], [0], [1], [0, 0, 1, 1], [], []>} : vector<64x128xbf16>, vector<128x128xbf16>, vector<64x128xf32> -> vector<64x128xf32>
    %288 = arith.addf %281, %287 : vector<64x128xf32>
    %cst_171 = arith.constant 0.000000e+00 : bf16
    %289 = vector.broadcast %cst_171 : bf16 to vector<1x128xbf16>
    %290 = vector.extract_strided_slice %243 {offsets = [1, 0], sizes = [63, 128], strides = [1, 1]} : vector<64x128xbf16> to vector<63x128xbf16>
    %291 = tpu.concatenate %290, %289 in 0 : vector<63x128xbf16>, vector<1x128xbf16> -> vector<64x128xbf16>
    %cst_172 = arith.constant 0.000000e+00 : bf16
    %292 = vector.shape_cast %167 : vector<64x1xi1> to vector<64x1xi1>
    %293 = vector.broadcast %292 : vector<64x1xi1> to vector<64x128xi1>
    %294 = vector.broadcast %cst_172 : bf16 to vector<64x128xbf16>
    %295 = arith.select %293, %294, %291 : vector<64x128xi1>, vector<64x128xbf16>
    %cst_173 = arith.constant 0.000000e+00 : bf16
    %296 = vector.broadcast %cst_173 : bf16 to vector<8x128xbf16>
    %297 = vector.extract_strided_slice %295 {offsets = [0, 0], sizes = [56, 128], strides = [1, 1]} : vector<64x128xbf16> to vector<56x128xbf16>
    %298 = tpu.concatenate %296, %297 in 0 : vector<8x128xbf16>, vector<56x128xbf16> -> vector<64x128xbf16>
    %c2_174 = arith.constant 2 : index
    %c0_175 = arith.constant 0 : index
    %c0_176 = arith.constant 0 : index
    %299 = vector.load %arg8[%c2_174, %c0_175, %c0_176] : memref<9x128x128xbf16, #tpu.memory_space<vmem>>, vector<1x128x128xbf16>
    %300 = vector.shape_cast %299 : vector<1x128x128xbf16> to vector<128x128xbf16>
    %cst_177 = arith.constant dense<0.000000e+00> : vector<64x128xf32>
    %301 = tpu.matmul %298, %300, %cst_177 {dimension_numbers = #tpu.dot_dimension_numbers<[1], [0], [0], [1], [0, 0, 1, 1], [], []>} : vector<64x128xbf16>, vector<128x128xbf16>, vector<64x128xf32> -> vector<64x128xf32>
    %302 = arith.addf %288, %301 : vector<64x128xf32>
    %c5_178 = arith.constant 5 : index
    %c0_179 = arith.constant 0 : index
    %c0_180 = arith.constant 0 : index
    %303 = vector.load %arg8[%c5_178, %c0_179, %c0_180] : memref<9x128x128xbf16, #tpu.memory_space<vmem>>, vector<1x128x128xbf16>
    %304 = vector.shape_cast %303 : vector<1x128x128xbf16> to vector<128x128xbf16>
    %cst_181 = arith.constant dense<0.000000e+00> : vector<64x128xf32>
    %305 = tpu.matmul %295, %304, %cst_181 {dimension_numbers = #tpu.dot_dimension_numbers<[1], [0], [0], [1], [0, 0, 1, 1], [], []>} : vector<64x128xbf16>, vector<128x128xbf16>, vector<64x128xf32> -> vector<64x128xf32>
    %306 = arith.addf %302, %305 : vector<64x128xf32>
    %cst_182 = arith.constant 0.000000e+00 : bf16
    %307 = vector.broadcast %cst_182 : bf16 to vector<8x128xbf16>
    %308 = vector.extract_strided_slice %295 {offsets = [8, 0], sizes = [56, 128], strides = [1, 1]} : vector<64x128xbf16> to vector<56x128xbf16>
    %309 = tpu.concatenate %308, %307 in 0 : vector<56x128xbf16>, vector<8x128xbf16> -> vector<64x128xbf16>
    %c8_183 = arith.constant 8 : index
    %c0_184 = arith.constant 0 : index
    %c0_185 = arith.constant 0 : index
    %310 = vector.load %arg8[%c8_183, %c0_184, %c0_185] : memref<9x128x128xbf16, #tpu.memory_space<vmem>>, vector<1x128x128xbf16>
    %311 = vector.shape_cast %310 : vector<1x128x128xbf16> to vector<128x128xbf16>
    %cst_186 = arith.constant dense<0.000000e+00> : vector<64x128xf32>
    %312 = tpu.matmul %309, %311, %cst_186 {dimension_numbers = #tpu.dot_dimension_numbers<[1], [0], [0], [1], [0, 0, 1, 1], [], []>} : vector<64x128xbf16>, vector<128x128xbf16>, vector<64x128xf32> -> vector<64x128xf32>
    %313 = arith.addf %306, %312 : vector<64x128xf32>
    %314 = vector.broadcast %244 : vector<1x128xf32> to vector<64x128xf32>
    %315 = arith.addf %313, %314 : vector<64x128xf32>
    %cst_187 = arith.constant 0.000000e+00 : f32
    %316 = vector.broadcast %cst_187 : f32 to vector<64x128xf32>
    %317 = arith.maximumf %315, %316 : vector<64x128xf32>
    %cst_188 = arith.constant 0.000000e+00 : f32
    %318 = vector.broadcast %cst_188 : f32 to vector<1x128xf32>
    %319 = vector.extract_strided_slice %317 {offsets = [1, 0], sizes = [63, 128], strides = [1, 1]} : vector<64x128xf32> to vector<63x128xf32>
    %320 = tpu.concatenate %319, %318 in 0 : vector<63x128xf32>, vector<1x128xf32> -> vector<64x128xf32>
    %321 = arith.maximumf %317, %320 : vector<64x128xf32>
    %cst_189 = arith.constant 0.000000e+00 : f32
    %322 = vector.broadcast %cst_189 : f32 to vector<8x128xf32>
    %323 = vector.extract_strided_slice %321 {offsets = [8, 0], sizes = [56, 128], strides = [1, 1]} : vector<64x128xf32> to vector<56x128xf32>
    %324 = tpu.concatenate %323, %322 in 0 : vector<56x128xf32>, vector<8x128xf32> -> vector<64x128xf32>
    %325 = arith.maximumf %321, %324 : vector<64x128xf32>
    %326 = vector.extract_strided_slice %325 {offsets = [0, 0], sizes = [16, 128], strides = [1, 1]} : vector<64x128xf32> to vector<16x128xf32>
    %c0_190 = arith.constant 0 : index
    %c0_191 = arith.constant 0 : index
    %c0_192 = arith.constant 0 : index
    %327 = vector.load %arg12[%c0_190, %c0_191, %c0_192] : memref<4x16x128xf32, #tpu.memory_space<vmem>>, vector<1x16x128xf32>
    %328 = vector.shape_cast %327 : vector<1x16x128xf32> to vector<16x128xf32>
    %329 = vector.shape_cast %326 : vector<16x128xf32> to vector<1x16x128xf32>
    tpu.vector_store %arg12[%c0_190, %c0_191, %c0_192], %329 {strides = array<i32>} : memref<4x16x128xf32, #tpu.memory_space<vmem>>, vector<1x16x128xf32>,
    %330 = vector.extract_strided_slice %325 {offsets = [16, 0], sizes = [16, 128], strides = [1, 1]} : vector<64x128xf32> to vector<16x128xf32>
    %c1_193 = arith.constant 1 : index
    %c0_194 = arith.constant 0 : index
    %c0_195 = arith.constant 0 : index
    %331 = vector.load %arg12[%c1_193, %c0_194, %c0_195] : memref<4x16x128xf32, #tpu.memory_space<vmem>>, vector<1x16x128xf32>
    %332 = vector.shape_cast %331 : vector<1x16x128xf32> to vector<16x128xf32>
    %333 = vector.shape_cast %330 : vector<16x128xf32> to vector<1x16x128xf32>
    tpu.vector_store %arg12[%c1_193, %c0_194, %c0_195], %333 {strides = array<i32>} : memref<4x16x128xf32, #tpu.memory_space<vmem>>, vector<1x16x128xf32>,
    %334 = vector.extract_strided_slice %325 {offsets = [32, 0], sizes = [16, 128], strides = [1, 1]} : vector<64x128xf32> to vector<16x128xf32>
    %c2_196 = arith.constant 2 : index
    %c0_197 = arith.constant 0 : index
    %c0_198 = arith.constant 0 : index
    %335 = vector.load %arg12[%c2_196, %c0_197, %c0_198] : memref<4x16x128xf32, #tpu.memory_space<vmem>>, vector<1x16x128xf32>
    %336 = vector.shape_cast %335 : vector<1x16x128xf32> to vector<16x128xf32>
    %337 = vector.shape_cast %334 : vector<16x128xf32> to vector<1x16x128xf32>
    tpu.vector_store %arg12[%c2_196, %c0_197, %c0_198], %337 {strides = array<i32>} : memref<4x16x128xf32, #tpu.memory_space<vmem>>, vector<1x16x128xf32>,
    %338 = vector.extract_strided_slice %325 {offsets = [48, 0], sizes = [16, 128], strides = [1, 1]} : vector<64x128xf32> to vector<16x128xf32>
    %c3_199 = arith.constant 3 : index
    %c0_200 = arith.constant 0 : index
    %c0_201 = arith.constant 0 : index
    %339 = vector.load %arg12[%c3_199, %c0_200, %c0_201] : memref<4x16x128xf32, #tpu.memory_space<vmem>>, vector<1x16x128xf32>
    %340 = vector.shape_cast %339 : vector<1x16x128xf32> to vector<16x128xf32>
    %341 = vector.shape_cast %338 : vector<16x128xf32> to vector<1x16x128xf32>
    tpu.vector_store %arg12[%c3_199, %c0_200, %c0_201], %341 {strides = array<i32>} : memref<4x16x128xf32, #tpu.memory_space<vmem>>, vector<1x16x128xf32>,
    %c0_202 = arith.constant 0 : index
    %c0_203 = arith.constant 0 : index
    %c0_204 = arith.constant 0 : index
    %342 = tpu.strided_load %arg12[%c0_202, %c0_203, %c0_204] {strides = array<i32: 1, 2, 1>} : memref<4x16x128xf32, #tpu.memory_space<vmem>>, vector<4x4x128xf32>
    %c0_205 = arith.constant 0 : index
    %c0_206 = arith.constant 0 : index
    %c0_207 = arith.constant 0 : index
    %c0_208 = arith.constant 0 : index
    %343 = vector.load %arg10[%c0_205, %c0_206, %c0_207, %c0_208] : memref<1x4x4x128xf32, #tpu.memory_space<vmem>>, vector<1x4x4x128xf32>
    %344 = vector.shape_cast %343 : vector<1x4x4x128xf32> to vector<4x4x128xf32>
    %345 = vector.shape_cast %342 : vector<4x4x128xf32> to vector<1x4x4x128xf32>
    tpu.vector_store %arg10[%c0_205, %c0_206, %c0_207, %c0_208], %345 {strides = array<i32>} : memref<1x4x4x128xf32, #tpu.memory_space<vmem>>, vector<1x4x4x128xf32>,
    return
  }
  func.func @transform_0(%arg0: i32) -> (i32, i32, i32) {
    %c0_i32 = arith.constant 0 : i32
    %c0_i32_0 = arith.constant 0 : i32
    %c0_i32_1 = arith.constant 0 : i32
    return %arg0, %c0_i32, %c0_i32_0 : i32, i32, i32
  }
  func.func @transform_1(%arg0: i32) -> (i32, i32) {
    %c0_i32 = arith.constant 0 : i32
    %c0_i32_0 = arith.constant 0 : i32
    %c0_i32_1 = arith.constant 0 : i32
    return %c0_i32, %c0_i32_0 : i32, i32
  }
  func.func @transform_2(%arg0: i32) -> (i32, i32) {
    %c0_i32 = arith.constant 0 : i32
    %c0_i32_0 = arith.constant 0 : i32
    %c0_i32_1 = arith.constant 0 : i32
    return %c0_i32, %c0_i32_0 : i32, i32
  }
  func.func @transform_3(%arg0: i32) -> (i32, i32, i32) {
    %c0_i32 = arith.constant 0 : i32
    %c0_i32_0 = arith.constant 0 : i32
    %c0_i32_1 = arith.constant 0 : i32
    %c0_i32_2 = arith.constant 0 : i32
    return %c0_i32, %c0_i32_0, %c0_i32_1 : i32, i32, i32
  }
  func.func @transform_4(%arg0: i32) -> (i32, i32) {
    %c0_i32 = arith.constant 0 : i32
    %c0_i32_0 = arith.constant 0 : i32
    %c0_i32_1 = arith.constant 0 : i32
    return %c0_i32, %c0_i32_0 : i32, i32
  }
  func.func @transform_5(%arg0: i32) -> (i32, i32, i32) {
    %c0_i32 = arith.constant 0 : i32
    %c0_i32_0 = arith.constant 0 : i32
    %c0_i32_1 = arith.constant 0 : i32
    %c0_i32_2 = arith.constant 0 : i32
    return %c0_i32, %c0_i32_0, %c0_i32_1 : i32, i32, i32
  }
  func.func @transform_6(%arg0: i32) -> (i32, i32) {
    %c0_i32 = arith.constant 0 : i32
    %c0_i32_0 = arith.constant 0 : i32
    %c0_i32_1 = arith.constant 0 : i32
    return %c0_i32, %c0_i32_0 : i32, i32
  }
  func.func @transform_7(%arg0: i32) -> (i32, i32, i32) {
    %c0_i32 = arith.constant 0 : i32
    %c0_i32_0 = arith.constant 0 : i32
    %c0_i32_1 = arith.constant 0 : i32
    %c0_i32_2 = arith.constant 0 : i32
    return %c0_i32, %c0_i32_0, %c0_i32_1 : i32, i32, i32
  }
  func.func @transform_8(%arg0: i32) -> (i32, i32) {
    %c0_i32 = arith.constant 0 : i32
    %c0_i32_0 = arith.constant 0 : i32
    %c0_i32_1 = arith.constant 0 : i32
    return %c0_i32, %c0_i32_0 : i32, i32
  }
  func.func @transform_9(%arg0: i32) -> (i32, i32, i32, i32) {
    %c0_i32 = arith.constant 0 : i32
    %c0_i32_0 = arith.constant 0 : i32
    %c0_i32_1 = arith.constant 0 : i32
    %c0_i32_2 = arith.constant 0 : i32
    return %arg0, %c0_i32, %c0_i32_0, %c0_i32_1 : i32, i32, i32, i32
  }
}

</mosaic_0001>

<bundles_post_ra>
// kernel: vgg_extractor_forward.1
= control target key start
LH: loop header
LB: loop body
LE: loop exit
PB: predicated region body
PF: predicated region fallthrough
CT: control target
= control target key end

     0   :  { %14 = vsyncpa [#allocation5], 0  ;;  %s12286_s0 = inlined_call_operand.vmem [shape: bf16[2,256,128], index: 0, kind: input, shape index: {}]   ;;  %s12287_s1 = inlined_call_operand.vmem [shape: bf16[128,64], index: 1, kind: input, shape index: {}]   ;;  %s12288_s2 = inlined_call_operand.vmem [shape: f32[1,64], index: 2, kind: input, shape index: {}]   ;;  %s12289_s3 = inlined_call_operand.vmem [shape: bf16[9,64,64], index: 3, kind: input, shape index: {}]   ;;  %s12290_s4 = inlined_call_operand.vmem [shape: f32[1,64], index: 4, kind: input, shape index: {}]   ;;  %s12291_s5 = inlined_call_operand.vmem [shape: bf16[9,64,128], index: 5, kind: input, shape index: {}]   ;;  %s12292_s6 = inlined_call_operand.vmem [shape: f32[1,128], index: 6, kind: input, shape index: {}]   ;;  %s12293_s7 = inlined_call_operand.vmem [shape: bf16[9,128,128], index: 7, kind: input, shape index: {}]   ;;  %s12294_s8 = inlined_call_operand.vmem [shape: f32[1,128], index: 8, kind: input, shape index: {}]   ;;  %s12295_s9 = inlined_call_operand.hbm [shape: f32[2,4,4,128], index: 9, kind: output, shape index: {}]  }
   0x1   :  { %16 = vsyncpa [#allocation5 + $0x1], 0  ;;  %s9695_s30 = smov 0   ;;  %s9697_s10 = smov 0  }
   0x2   :  { %s9699_s11 = smov 0   ;;  %s9701_s12 = smov 0  }
   0x3 LB: > { %s9716_s13 = sadd.s32 4294967295, %s9638_s12   ;;  %s7140_s14 = sadd.s32 4294967294, %s9638_s12   ;;  %s9638_s12 = sphi %s9701_s12, %s12559_s12   ;;  %s9634_s11 = sphi %s9699_s11, %s12558_s11   ;;  %s9630_s10 = sphi %s9697_s10, %s12557_s10   ;;  %s9626_s30 = sphi %s9695_s30, %s12556_s30  }
   0x4   : > { %s9720_s15 = sadd.s32 1, %s9638_s12   ;;  %s223_s16 = sadd.s32 1, %s9634_s11 }
   0x5   : > { %s220_s17 = ssub.s32 %s9638_s12, %s9720_s15  ;;  %p233_p0 = scmp.ne.s32.totalorder %s9634_s11, %s9630_s10 }
   0x6   : > { %p221_p1 = scmp.eq.s32.totalorder %s220_s17, 0  ;;  %p234_p2 = scmp.eq.s32.totalorder %s9716_s13, 1 }
   0x7   : > { %p239_p3 = scmp.ne.s32.totalorder %s9630_s10, %s9626_s30  ;;  %p240_p4 = scmp.eq.s32.totalorder %s7140_s14, 1 }
   0x8   : > { %s9731_s18 = scalar_select %p221_p1, %s9634_s11, %s223_s16  }
   0x9   : > { %p9733_p5 = por %p234_p2, %p233_p0  ;;  %p9737_p6 = por %p240_p4, %p239_p3 }
   0xa   : > { %p7143_p7 = scmp.ge.s32.totalorder %s9638_s12, 1  ;;  %p290_p8 = scmp.lt.s32.totalorder %s9638_s12, 3 }
   0xc   : > { %p291_p9 = pnand %p7143_p7, %p290_p8 }
   0xe   : > { %294 = sbr.rel (%p291_p9) target bundleno = 1968 (0x7b0), region = 56 }
  0x15   : > { %v9408_v0 = vld [vmem:[%s12287_s1] sm:$0xff]   ;;  %p326_p10 = scmp.lt.s32.totalorder %s9716_s13, 1  ;;  %v9409_v1 = vld [vmem:[%s12287_s1 + $0x8] sm:$0xff]   ;;  %v9410_v2 = vld [vmem:[%s12287_s1 + $0x10] sm:$0xff]   ;;  %v726_v29 = vlaneseq  ;;  %vm9640_vm2 = vmmov 0   ;;  %v12296_v46 = vmov 0  }
  0x16   : > { %8205 = vmatprep.subr.bf16.mxu0 %v9408_v0  ;;  %v9411_v3 = vld [vmem:[%s12287_s1 + $0x18] sm:$0xff]   ;;  %v9412_v5 = vld [vmem:[%s12287_s1 + $0x20] sm:$0xff]   ;;  %v9413_v6 = vld [vmem:[%s12287_s1 + $0x28] sm:$0xff]   ;;  %s323_s26 = sand.u32 1, %s9630_s10   ;;  %s7820_s29 = sshll.u32 %s9716_s13, 8 }
  0x17   : > { %s327_s25 = scalar_select %p326_p10, %s9716_s13, 1  ;;  %8206 = vmatpush3.bf16.msra.mxu0 %v9408_v0  ;;  %v9414_v7 = vld [vmem:[%s12287_s1 + $0x30] sm:$0xff]   ;;  %v9415_v8 = vld [vmem:[%s12287_s1 + $0x38] sm:$0xff]   ;;  %v9432_v24 = vld [vmem:[%s12289_s3 + $0x60] sm:$0xff]   ;;  %v9808_v30 = vshrl.u32 %v726_v29, 7 }
  0x18   : > { %8207 = vmatprep.subr.bf16.mxu0 %v9409_v1  ;;  %8973 = vmatprep.subr.bf16.mxu1 %v9432_v24  ;;  %v9433_v25 = vld [vmem:[%s12289_s3 + $0x68] sm:$0xff]   ;;  %v9434_v26 = vld [vmem:[%s12289_s3 + $0x70] sm:$0xff]   ;;  %v9435_v27 = vld [vmem:[%s12289_s3 + $0x78] sm:$0xff]   ;;  %s7144_s27 = sshll.u32 %s323_s26, 4  ;;  %s12239_s22 = scalar_lea.hbm %s12295_s9, %s7820_s29 }
  0x19   : > { %s7819_s28 = sshll.u32 %s327_s25, 7  ;;  %8977 = vmatpush3.bf16.msra.mxu1 %v9432_v24  ;;  %v9805_v28 = vld [vmem:[%s12289_s3] sm:$0xff]   ;;  %12327 = vst [vmem:[#allocation7_spill] sm:$0xff] %v9808_v30  ;;  %v9811_v31 = vadd.s32 16, %v9808_v30  ;;  %v763_v32 = vand.u32 15, %v9808_v30  ;;  %v9816_v34 = vadd.s32 8, %v9808_v30  ;;  %vm1436_vm3 = vmpackc.low %vm9640_vm2, %vm9640_vm2 }
  0x1a   : > { %s9757_s16 = scalar_lea.vmem %s12286_s0, %s7819_s28  ;;  %8974 = vmatprep.subr.bf16.mxu1 %v9433_v25  ;;  %v9819_v35 = vadd.s32 32, %v9808_v30  ;;  %v9822_v36 = vadd.s32 48, %v9808_v30  ;;  %v9834_v40 = vadd.s32 24, %v9808_v30  ;;  %v9838_v42 = vadd.s32 40, %v9808_v30  ;;  %s325_s28 = scalar_lea.vmem [#allocation4], %s7144_s27 }
  0x1b   : > { %8208 = vmatpush3.bf16.msra.mxu0 %v9409_v1  ;;  %v9416_v4 = vld [vmem:[%s9757_s16] sm:$0xff]   ;;  %v9417_v9 = vld [vmem:[%s9757_s16 + $0x8] sm:$0xff]   ;;  %v9418_v10 = vld [vmem:[%s9757_s16 + $0x10] sm:$0xff]   ;;  %12328 = vst [vmem:[#allocation8_spill] sm:$0xff] %v9811_v31  ;;  %v777_v33 = vand.u32 15, %v9811_v31  ;;  %vm9824_vm0 = vcmp.eq.s32.totalorder %v763_v32, 0 }
  0x1c   : > { %8209 = vmatprep.subr.bf16.mxu0 %v9410_v2  ;;  %8221 = vmatprep.mubr.bf16.mxu0 %v9416_v4  ;;  %v9419_v11 = vld [vmem:[%s9757_s16 + $0x18] sm:$0xff]   ;;  %v9420_v12 = vld [vmem:[%s9757_s16 + $0x20] sm:$0xff]   ;;  %v9421_v13 = vld [vmem:[%s9757_s16 + $0x28] sm:$0xff]   ;;  %12329 = vst [vmem:[#allocation9_spill] sm:$0xff] %v9816_v34  ;;  %v770_v39 = vand.u32 15, %v9816_v34  ;;  %v791_v41 = vand.u32 15, %v9819_v35 }
  0x1d   : > { %v9422_v14 = vld [vmem:[%s9757_s16 + $0x30] sm:$0xff]   ;;  %v9423_v15 = vld [vmem:[%s9757_s16 + $0x38] sm:$0xff]   ;;  %v9424_v16 = vld [vmem:[%s9757_s16 + $0x40] sm:$0xff]   ;;  %8978 = vmatpush3.bf16.msra.mxu1 %v9433_v25  ;;  %12330 = vst [vmem:[#allocation10_spill] sm:$0xff] %v9819_v35  ;;  %vm9828_vm1 = vcmp.eq.s32.totalorder %v777_v33, 0  ;;  %v805_v43 = vand.u32 15, %v9822_v36 }
  0x1e   : > { %v9425_v17 = vld [vmem:[%s9757_s16 + $0x48] sm:$0xff]   ;;  %v9426_v18 = vld [vmem:[%s9757_s16 + $0x50] sm:$0xff]   ;;  %v9427_v19 = vld [vmem:[%s9757_s16 + $0x58] sm:$0xff]   ;;  %8975 = vmatprep.subr.bf16.mxu1 %v9434_v26  ;;  %12331 = vst [vmem:[#allocation11_spill] sm:$0xff] %v9822_v36  ;;  %v737_v44 = vadd.s32 80, %v9808_v30  ;;  %v735_v45 = vadd.s32 64, %v9808_v30 }
  0x1f   : > { %8210 = vmatpush3.bf16.msra.mxu0 %v9410_v2  ;;  %v9428_v20 = vld [vmem:[%s9757_s16 + $0x60] sm:$0xff]   ;;  %v9429_v21 = vld [vmem:[%s9757_s16 + $0x68] sm:$0xff]   ;;  %v9430_v22 = vld [vmem:[%s9757_s16 + $0x70] sm:$0xff]   ;;  %12336 = vst [vmem:[#allocation12_spill] sm:$0xff] %v9834_v40  ;;  %v9850_v47 = vsel %vm1436_vm3, 65537, %v12296_v46  ;;  %vm9852_vm6 = vcmp.eq.s32.totalorder %v770_v39, 15 }
  0x20   : > { %8211 = vmatprep.subr.bf16.mxu0 %v9411_v3  ;;  %v9431_v23 = vld [vmem:[%s9757_s16 + $0x78] sm:$0xff]   ;;  %12337 = vst [vmem:[#allocation13_spill] sm:$0xff] %v9838_v42  ;;  %vm1435_vm4 = vmpackc.low %vm9824_vm0, %vm9824_vm0  ;;  %v784_v49 = vand.u32 15, %v9834_v40  ;;  %v9858_v50 = vadd.s32 56, %v9808_v30  ;;  %vm9863_vm7 = vcmp.eq.s32.totalorder %v791_v41, 0  ;;  %v798_v53 = vand.u32 15, %v9838_v42 }
  0x21   : > { %8979 = vmatpush3.bf16.msra.mxu1 %v9434_v26  ;;  %vm1437_vm5 = vmpackc.low %vm9828_vm1, %vm9828_vm1  ;;  %v9861_v51 = vsel %vm1435_vm4, 65537, %v12296_v46  ;;  %v736_v54 = vadd.s32 72, %v9808_v30  ;;  %vm9872_vm8 = vcmp.eq.s32.totalorder %v805_v43, 0  ;;  %v833_v57 = vand.u32 15, %v737_v44  ;;  %s7078_s14 = sshll.u32 %s325_s28, 4  ;;  %s12245_s23 = scalar_lea.sflag [#allocation5], %s323_s26  ;;  %s12241_s14 = int_to_ptr.vmem [resolvable:$true] %s7078_s14 }
  0x22   : > { %8976 = vmatprep.subr.bf16.mxu1 %v9435_v27  ;;  %12340 = vst [vmem:[#allocation14_spill] sm:$0xff] %v9858_v50  ;;  %v9870_v55 = vsel %vm1437_vm5, 65537, %v12296_v46  ;;  %v741_v58 = vadd.s32 112, %v9808_v30  ;;  %v819_v59 = vand.u32 15, %v735_v45  ;;  %v739_v60 = vadd.s32 96, %v9808_v30  ;;  %vm3086_vm9 = vmpackc.low %vm9852_vm6, %vm9852_vm6  ;;  %s9576_s13 = scalar_lea.vmem %s12241_s14, 256 }
  0x23   : > { %8212 = vmatpush3.bf16.msra.mxu0 %v9411_v3  ;;  %v7172_v61 = vcombine.low %v9861_v51, %v9850_v47  ;;  %vm1439_vm10 = vmpackc.low %vm9863_vm7, %vm9863_vm7  ;;  %vm9886_vm11 = vcmp.eq.s32.totalorder %v784_v49, 15  ;;  %v812_v63 = vand.u32 15, %v9858_v50  ;;  %v738_v0 = vadd.s32 88, %v9808_v30  ;;  %p9577_p11 = scmp.ne.s32.totalorder %s12241_s14, %s9576_s13  ;;  %s9642_s24 = smov [#allocation4]  }
  0x24   : > { %8213 = vmatprep.subr.bf16.mxu0 %v9412_v5  ;;  %v7173_v1 = vcombine.low %v9870_v55, %v9850_v47  ;;  %vm1441_vm12 = vmpackc.low %vm9872_vm8, %vm9872_vm8  ;;  %vm9897_vm13 = vcmp.eq.s32.totalorder %v798_v53, 15  ;;  %v826_v3 = vand.u32 15, %v736_v54  ;;  %v740_v4 = vadd.s32 104, %v9808_v30  ;;  %s9580_s16 = sshll.u32 %s9642_s24, 4  ;;  %s9581_s16 = int_to_ptr.vmem [resolvable:$false] %s9580_s16 }
  0x25   : > { %8980 = vmatpush3.bf16.msra.mxu1 %v9435_v27  ;;  %vm9902_vm14 = vcmp.eq.s32.totalorder %v833_v57, 0  ;;  %vm9913_vm15 = vcmp.eq.s32.totalorder %v819_v59, 0  ;;  %vm3088_vm0 = vmpackc.low %vm9886_vm11, %vm9886_vm11  ;;  %vm9927_vm2 = vcmp.eq.s32.totalorder %v812_v63, 15  ;;  %v747_v29 = vadd.s32 160, %v9808_v30  ;;  %p9578_p12 = pnand %p9577_p11, %p9733_p5  ;;  %s9582_s25 = scalar_lea.vmem %s9581_s16, 512 }
  0x26   : > { %8293 = vmatprep.subr.bf16.mxu1 %v9805_v28  ;;  %vm3090_vm1 = vmpackc.low %vm9897_vm13, %vm9897_vm13  ;;  %vm9937_vm4 = vcmp.eq.s32.totalorder %v826_v3, 15  ;;  %v9968_v32 = vsel %vm3088_vm0, 65537, %v12296_v46  ;;  %v746_v38 = vadd.s32 152, %v9808_v30  ;;  %v748_v44 = vadd.s32 168, %v9808_v30  ;;  %p9583_p0 = scmp.lt.s32.totalorder %s12241_s14, %s9581_s16  ;;  %p9584_p1 = scmp.lt.s32.totalorder %s9582_s25, %s9576_s13 }
  0x27   : > { %8214 = vmatpush3.bf16.msra.mxu0 %v9412_v5  ;;  %vm1445_vm3 = vmpackc.low %vm9902_vm14, %vm9902_vm14  ;;  %v9987_v39 = vsel %vm3090_vm1, 65537, %v12296_v46  ;;  %v753_v52 = vadd.s32 208, %v9808_v30  ;;  %v903_v54 = vand.u32 15, %v747_v29  ;;  %v751_v56 = vadd.s32 192, %v9808_v30  ;;  %p9579_p13 = pneg %p9578_p12 }
  0x28   : > { %8215 = vmatprep.subr.bf16.mxu0 %v9413_v6  ;;  %vm1443_vm5 = vmpackc.low %vm9913_vm15, %vm9913_vm15  ;;  %v10000_v45 = vsel %vm1445_vm3, 65537, %v12296_v46  ;;  %v7345_v57 = vcombine.low %v9850_v47, %v9968_v32  ;;  %v896_v62 = vand.u32 15, %v746_v38  ;;  %v910_v2 = vand.u32 15, %v748_v44  ;;  %p9585_p2 = por %p9584_p1, %p9583_p0 }
  0x29   : > { %vm3092_vm8 = vmpackc.low %vm9927_vm2, %vm9927_vm2  ;;  %v750_v3 = vadd.s32 184, %v9808_v30  ;;  %v945_v5 = vand.u32 15, %v753_v52  ;;  %vm10078_vm3 = vcmp.eq.s32.totalorder %v903_v54, 0  ;;  %v12415_v42 = vcombine.low %v10000_v45, %v9850_v47 }
  0x2a   : > { %p9586_p3 = pnand %p9585_p2, %p9579_p13 }
  0x2b   : > { %8216 = vmatpush3.bf16.msra.mxu0 %v9413_v6  ;;  %v861_v6 = vand.u32 15, %v741_v58  ;;  %v10026_v58 = vsel %vm1443_vm5, 65537, %v12296_v46 }
  0x2c   : > { %8217 = vmatprep.subr.bf16.mxu0 %v9414_v7 }
  0x2d   : > { %vm9947_vm6 = vcmp.eq.s32.totalorder %v861_v6, 0  ;;  %v10060_v6 = vsel %vm3092_vm8, 65537, %v12296_v46 }
  0x2f   : > { %8218 = vmatpush3.bf16.msra.mxu0 %v9414_v7  ;;  %v745_v7 = vadd.s32 144, %v9808_v30 }
  0x30   : > { %8219 = vmatprep.subr.bf16.mxu0 %v9415_v8 }
  0x33   : > { %8220 = vmatpush3.bf16.msra.mxu0 %v9415_v8  ;;  %v9908_v8 = vsel %vm3086_vm9, 65537, %v12296_v46  ;;  %vm3094_vm9 = vmpackc.low %vm9937_vm4, %vm9937_vm4 }
  0x34   : > { %8253 = vmatprep.subr.bf16.mxu0 %v9432_v24 }
  0x36   : > { %8222 = vmatmul.mubr.bf16.vlgmr.msra.gmra.mrb[0].mxu0 %v9417_v9  ;;  %v9911_v9 = vsel %vm1439_vm10, 65537, %v12296_v46 }
  0x37   : > { %8225 = vmatprep.mubr.bf16.mxu0 %v9418_v10  ;;  %8254 = vmatpush3.bf16.msra.mxu0 %v9432_v24  ;;  %v749_v24 = vadd.s32 176, %v9808_v30  ;;  %v12406_v31 = vcombine.low %v9911_v9, %v9850_v47 }
  0x38   : > { %8255 = vmatprep.subr.bf16.mxu0 %v9433_v25 }
  0x39   : > { %v917_v49 = vand.u32 15, %v749_v24  ;;  %v924_v24 = vand.u32 15, %v750_v3 }
  0x3b   : > { %8256 = vmatpush3.bf16.msra.mxu0 %v9433_v25  ;;  %vm10050_vm14 = vcmp.eq.s32.totalorder %v917_v49, 0 }
  0x3c   : > { %8257 = vmatprep.subr.bf16.mxu0 %v9434_v26 }
  0x3e   : > { %8226 = vmatmul.mubr.bf16.gmra.mrb[4].mxu0 %v9419_v11  ;;  %v847_v11 = vand.u32 15, %v739_v60 }
  0x3f   : > { %8229 = vmatprep.mubr.bf16.mxu0 %v9420_v12  ;;  %8258 = vmatpush3.bf16.msra.mxu0 %v9434_v26  ;;  %v743_v12 = vadd.s32 128, %v9808_v30  ;;  %v10137_v26 = vld [vmem:[%s12288_s2] ss:$0 sm:$0xff] }
  0x40   : > { %8259 = vmatprep.subr.bf16.mxu0 %v9435_v27  ;;  %vm9954_vm7 = vcmp.eq.s32.totalorder %v847_v11, 0 }
  0x41   : > { %vm12377_vm4 = vmpackc.low %vm9954_vm7, %vm9954_vm7 }
  0x42   : > { %vm1457_vm7 = vmpackc.low %vm10050_vm14, %vm10050_vm14  ;;  %vm1224_vm14 = vsmask.f32 256 }
  0x43   : > { %8260 = vmatpush3.bf16.msra.mxu0 %v9435_v27  ;;  %v875_v27 = vand.u32 15, %v743_v12  ;;  %v931_v12 = vand.u32 15, %v751_v56 }
  0x45   : > { %vm10010_vm1 = vcmp.eq.s32.totalorder %v875_v27, 0 }
  0x46   : > { %8230 = vmatmul.mubr.bf16.gmra.mrb[8].mxu0 %v9421_v13  ;;  %v9922_v13 = vsel %vm1441_vm12, 65537, %v12296_v46  ;;  %vm1449_vm12 = vmpackc.low %vm9947_vm6, %vm9947_vm6 }
  0x47   : > { %8233 = vmatprep.mubr.bf16.mxu0 %v9422_v14  ;;  %v7175_v25 = vcombine.low %v9922_v13, %v9850_v47  ;;  %v10076_v10 = vsel %vm1449_vm12, 65537, %v12296_v46  ;;  %v752_v14 = vadd.s32 200, %v9808_v30  ;;  %vm10130_vm12 = vcmp.eq.s32.totalorder %v910_v2, 15 }
  0x49   : > { %v938_v44 = vand.u32 15, %v752_v14 }
  0x4e   : > { %8234 = vmatmul.mubr.bf16.gmra.mrb[12].mxu0 %v9423_v15  ;;  %v840_v15 = vand.u32 15, %v738_v0 }
  0x4f   : > { %8237 = vmatprep.mubr.bf16.mxu0 %v9424_v16  ;;  %v742_v16 = vadd.s32 120, %v9808_v30 }
  0x50   : > { %vm9973_vm10 = vcmp.eq.s32.totalorder %v840_v15, 15 }
  0x51   : > { %v868_v37 = vand.u32 15, %v742_v16  ;;  %v10094_v16 = vsel %vm12377_vm4, 65537, %v12296_v46  ;;  %vm12378_vm6 = vmpackc.low %vm9973_vm10, %vm9973_vm10  ;;  %vm10160_vm4 = vcmp.eq.s32.totalorder %v931_v12, 0  ;;  %v12401_v12 = vmov 0 }
  0x53   : > { %vm10033_vm13 = vcmp.eq.s32.totalorder %v868_v37, 15 }
  0x54   : > { %vm3100_vm2 = vmpackc.low %vm10033_vm13, %vm10033_vm13 }
  0x55   : > { %vm3106_vm13 = vmpackc.low %vm10130_vm12, %vm10130_vm12  ;;  %vm10283_vm12 = vcmp.ne.s16.totalorder %v7172_v61, 0  ;;  %v10299_v61 = vadd.s32 240, %v9808_v30 }
  0x56   : > { %8238 = vmatmul.mubr.bf16.gmra.mrb[16].mxu0 %v9425_v17  ;;  %v7344_v17 = vcombine.low %v9850_v47, %v9908_v8  ;;  %v10321_v8 = vadd.s32 224, %v9808_v30 }
  0x57   : > { %8241 = vmatprep.mubr.bf16.mxu0 %v9426_v18  ;;  %v10102_v18 = vsel %vm12378_vm6, 65537, %v12296_v46 }
  0x5e   : > { %8242 = vmatmul.mubr.bf16.gmra.mrb[20].mxu0 %v9427_v19  ;;  %v854_v19 = vand.u32 15, %v740_v4 }
  0x5f   : > { %8245 = vmatprep.mubr.bf16.mxu0 %v9428_v20  ;;  %v744_v20 = vadd.s32 136, %v9808_v30 }
  0x60   : > { %vm9989_vm11 = vcmp.eq.s32.totalorder %v854_v19, 15 }
  0x61   : > { %v882_v43 = vand.u32 15, %v744_v20  ;;  %vm12381_vm10 = vmpackc.low %vm9989_vm11, %vm9989_vm11  ;;  %vm10144_vm11 = vcmp.eq.s32.totalorder %v945_v5, 0 }
  0x63   : > { %vm10042_vm5 = vcmp.eq.s32.totalorder %v882_v43, 15  ;;  %v10170_v43 = vsel %vm3100_vm2, 65537, %v12296_v46  ;;  %vm10206_vm2 = vcmp.eq.s32.totalorder %v924_v24, 15 }
  0x64   : > { %vm3102_vm8 = vmpackc.low %vm10042_vm5, %vm10042_vm5 }
  0x65   : > { %v10204_v2 = vsel %vm3102_vm8, 65537, %v12296_v46  ;;  %vm1459_vm5 = vmpackc.low %vm10160_vm4, %vm10160_vm4  ;;  %vm10350_vm4 = vcmp.ne.s16.totalorder %v7345_v57, 0 }
  0x66   : > { %8246 = vmatmul.mubr.bf16.gmra.mrb[24].mxu0 %v9429_v21  ;;  %vm3108_vm8 = vmpackc.low %vm10206_vm2, %vm10206_vm2 }
  0x67   : > { %8249 = vmatprep.mubr.bf16.mxu0 %v9430_v22  ;;  %v10128_v22 = vsel %vm12381_vm10, 65537, %v12296_v46  ;;  %vm2954_vm10 = vsmask.f32 7424 }
  0x6e   : > { %8250 = vmatmul.mubr.bf16.gmra.mrb[28].mxu0 %v9431_v23  ;;  %v889_v23 = vand.u32 15, %v745_v7  ;;  %v10068_v7 = vsel %vm3094_vm9, 65537, %v12296_v46  ;;  %vm10107_vm9 = vcmp.eq.s32.totalorder %v896_v62, 15  ;;  %v10193_v62 = vsel %vm1457_vm7, 65537, %v12296_v46 }
  0x6f   : > { %vm3104_vm6 = vmpackc.low %vm10107_vm9, %vm10107_vm9  ;;  %vm1368_vm7 = vcmask 1040384   ;;  %vm10266_vm9 = vcmp.ne.s16.totalorder %v7173_v1, 0 }
  0x70   : > { %vm10005_vm0 = vcmp.eq.s32.totalorder %v889_v23, 0  ;;  %v10233_v11 = vsel %vm3104_vm6, 65537, %v12296_v46  ;;  %v10278_v23 = vsel %vm1459_vm5, 65537, %v12296_v46  ;;  %vm10358_vm6 = vmand %vm1368_vm7, %vm1224_vm14  ;;  %vm10434_vm5 = vcmp.ne.s16.totalorder %v12415_v42, 0 }
  0x71   : > { %vm1453_vm15 = vmpackc.low %vm10005_vm0, %vm10005_vm0  ;;  %v12402_v12 = vsel %vm10358_vm6, 4294967295, %v12401_v12 }
  0x72   : > { %v10117_v20 = vsel %vm1453_vm15, 65537, %v12296_v46  ;;  %vm1455_vm0 = vmpackc.low %vm10078_vm3, %vm10078_vm3  ;;  %vm10243_vm3 = vcmp.eq.s32.totalorder %v938_v44, 15  ;;  %12403 = vst [vmem:[#allocation15_spill] sm:$0xff] %v12402_v12 }
  0x73   : > { %vm12386_vm15 = vmpackc.low %vm10010_vm1, %vm10010_vm1  ;;  %v10219_v0 = vsel %vm1455_vm0, 65537, %v12296_v46 }
  0x74   : > { %v10158_v38 = vsel %vm12386_vm15, 65537, %v12296_v46  ;;  %vm1461_vm1 = vmpackc.low %vm10144_vm11, %vm10144_vm11  ;;  %vm1620_vm11 = vcmask 523264   ;;  %vm10304_vm15 = vcmp.ne.s16.totalorder %v7344_v17, 0  ;;  %v10324_v17 = vadd.s32 216, %v9808_v30 }
  0x75   : > { %v10256_v52 = vsel %vm1461_vm1, 65537, %v12296_v46  ;;  %vm3110_vm0 = vmpackc.low %vm10243_vm3, %vm10243_vm3  ;;  %vm10373_vm1 = vcmp.ne.s16.totalorder %v12406_v31, 0 }
 0x109   : > { %v8223_v48 = vpop.f32.mrb[0].mxu0 }
 0x10a   : > { %v576_v56 = vadd.f32 %v8223_v48, %v10137_v26  ;;  %v567_v60 = vpop.f32.mrb[1].mxu0 }
 0x10b   : > { %v568_v4 = vadd.f32 %v10137_v26, %v567_v60  ;;  %v8224_v5 = vpop.f32.mrb[2].mxu0  ;;  %v10241_v60 = vsel %vm3106_vm13, 65537, %v12296_v46  ;;  %vm10366_vm13 = vcmp.ne.s16.totalorder %v7175_v25, 0 }
 0x10c   : > { %v579_v24 = vadd.f32 %v8224_v5, %v10137_v26  ;;  %v570_v48 = vpop.f32.mrb[3].mxu0  ;;  %v696_v44 = vmax.f32 %v576_v56, 0.0 }
 0x10d   : > { %v571_v5 = vadd.f32 %v10137_v26, %v570_v48  ;;  %v694_v56 = vmax.f32 %v568_v4, 0.0  ;;  %v12412_v4 = vcombine.low %v9850_v47, %v10060_v6  ;;  %v12418_v6 = vcombine.low %v10026_v58, %v9850_v47 }
 0x10e   : > { %v697_v48 = vmax.f32 %v579_v24, 0.0 }
 0x10f   : > { %v695_v24 = vmax.f32 %v571_v5, 0.0  ;;  %v10314_v5 = vsel %vm3108_vm8, 65537, %v12296_v46  ;;  %vm10426_vm7 = vcmp.ne.s16.totalorder %v12412_v4, 0  ;;  %vm10441_vm3 = vcmp.ne.s16.totalorder %v12418_v6, 0 }
 0x110   : > { %v10294_v41 = vpack.c.bf16 %v697_v48, %v696_v44 }
 0x111   : > { %v10316_v44 = vpack.c.bf16 %v695_v24, %v694_v56  ;;  %v8227_v48 = vpop.f32.mrb[4].mxu0  ;;  %v10335_v56 = vsel %vm3110_vm0, 65537, %v12296_v46 }
 0x112   : > { %v1233_v29 = vshrl.u32 %v10294_v41, 16  ;;  %v1236_v1 = vshll.u32 %v10294_v41, 16  ;;  %v592_v3 = vadd.f32 %v8227_v48, %v10137_v26  ;;  %v583_v14 = vpop.f32.mrb[5].mxu0 }
 0x113   : > { %v584_v24 = vadd.f32 %v10137_v26, %v583_v14  ;;  %v8228_v51 = vpop.f32.mrb[6].mxu0  ;;  %v1226_v54 = vshrl.u32 %v10316_v44, 16  ;;  %v1229_v49 = vshll.u32 %v10316_v44, 16 }
 0x114   : > { %v595_v48 = vadd.f32 %v8228_v51, %v10137_v26  ;;  %v586_v53 = vpop.f32.mrb[7].mxu0  ;;  %v10343_v37 = vrot.slane %v1233_v29, 7  ;;  %v2957_v15 = vrot.slane %v1236_v1, 1  ;;  %v700_v27 = vmax.f32 %v592_v3, 0.0 }
 0x115   : > { %v587_v46 = vadd.f32 %v10137_v26, %v586_v53  ;;  %v1228_v63 = vrot.slane %v1226_v54, 7  ;;  %v2955_v14 = vrot.slane %v1229_v49, 1  ;;  %v698_v21 = vmax.f32 %v584_v24, 0.0 }
 0x116   : > { %v701_v59 = vmax.f32 %v595_v48, 0.0  ;;  %v1238_v53 = vor.u32 %v1236_v1, %v10343_v37  ;;  %v2959_v57 = vor.u32 %v2957_v15, %v1233_v29  ;;  %v12409_v29 = vcombine.low %v9850_v47, %v9987_v39 }
 0x117   : > { %v699_v51 = vmax.f32 %v587_v46, 0.0  ;;  %v1231_v3 = vor.u32 %v1229_v49, %v1228_v63  ;;  %v2956_v48 = vor.u32 %v2955_v14, %v1226_v54 }
 0x118   : > { %v10377_v1 = vpack.c.bf16 %v701_v59, %v700_v27  ;;  %v1239_v13 = vsel %vm1224_vm14, %v1228_v63, %v1238_v53  ;;  %vm10384_vm2 = vcmp.ne.s16.totalorder %v12409_v29, 0 }
 0x119   : > { %v10389_v9 = vpack.c.bf16 %v699_v51, %v698_v21  ;;  %v8231_v31 = vpop.f32.mrb[8].mxu0  ;;  %v1370_v59 = vsel %vm10358_vm6, 0, %v1231_v3  ;;  %v10395_v63 = vsel %vm10266_vm9, 0, %v1239_v13  ;;  %v2958_v27 = vsel %vm2954_vm10, %v2956_v48, %v2957_v15 }
 0x11a   : > { %v608_v39 = vadd.f32 %v8231_v31, %v10137_v26  ;;  %v599_v54 = vpop.f32.mrb[9].mxu0  ;;  %v10401_v24 = vsel %vm10283_vm12, 0, %v1370_v59  ;;  %v1249_v21 = vshrl.u32 %v10377_v1, 16  ;;  %v1252_v14 = vshll.u32 %v10377_v1, 16 }
 0x11b   : > { %v600_v51 = vadd.f32 %v10137_v26, %v599_v54  ;;  %v8232_v53 = vpop.f32.mrb[10].mxu0  ;;  %8261 = vmatprep.mubr.msk.bf16.mxu0 %vm1620_vm11, %v10401_v24  ;;  %v1241_v19 = vshrl.u32 %v10389_v9, 16  ;;  %v1244_v15 = vshll.u32 %v10389_v9, 16  ;;  %v10412_v3 = vsel %vm10304_vm15, 0, %v2958_v27 }
 0x11c   : > { %v611_v55 = vadd.f32 %v8232_v53, %v10137_v26  ;;  %v602_v48 = vpop.f32.mrb[11].mxu0  ;;  %8262 = vmatmul.mubr.msk.bf16.vlgmr.msra.gmra.mrb[32].mxu0 %vm1620_vm11, %v10395_v63  ;;  %v10417_v13 = vrot.slane %v1249_v21, 7  ;;  %v2963_v29 = vrot.slane %v1252_v14, 1  ;;  %v10420_v31 = vadd.s32 232, %v9808_v30 }
 0x11d   : > { %v704_v59 = vmax.f32 %v608_v39, 0.0  ;;  %v603_v54 = vadd.f32 %v10137_v26, %v602_v48  ;;  %v1243_v49 = vrot.slane %v1241_v19, 7  ;;  %v2960_v25 = vrot.slane %v1244_v15, 1 }
 0x11e   : > { %v702_v53 = vmax.f32 %v600_v51, 0.0  ;;  %v705_v12 = vmax.f32 %v611_v55, 0.0  ;;  %v1254_v50 = vor.u32 %v1252_v14, %v10417_v13  ;;  %v2965_v48 = vor.u32 %v2963_v29, %v1249_v21 }
 0x11f   : > { %v703_v36 = vmax.f32 %v603_v54, 0.0  ;;  %v1246_v35 = vor.u32 %v1244_v15, %v1243_v49  ;;  %v2961_v51 = vsel %vm2954_vm10, %v2959_v57, %v2960_v25  ;;  %v2962_v14 = vor.u32 %v2960_v25, %v1241_v19 }
 0x120   : > { %v10446_v55 = vpack.c.bf16 %v705_v12, %v704_v59  ;;  %v1255_v42 = vsel %vm1224_vm14, %v1243_v49, %v1254_v50  ;;  %v10451_v45 = vsel %vm10350_vm4, 0, %v2961_v51  ;;  %v12422_v21 = vcombine.low %v9850_v47, %v10068_v7 }
 0x121   : > { %12421 = vst [vmem:[#allocation16_spill] sm:$0xff] %v10451_v45  ;;  %v10461_v15 = vadd.s32 248, %v9808_v30  ;;  %v10463_v57 = vpack.c.bf16 %v703_v36, %v702_v53  ;;  %v8235_v12 = vpop.f32.mrb[12].mxu0  ;;  %v1247_v50 = vsel %vm1224_vm14, %v10343_v37, %v1246_v35  ;;  %v10469_v33 = vsel %vm10366_vm13, 0, %v1255_v42 }
 0x122   : > { %vm10456_vm8 = vcmp.ne.s16.totalorder %v12422_v21, 0  ;;  %v2964_v25 = vsel %vm2954_vm10, %v2962_v14, %v2963_v29  ;;  %v624_v7 = vadd.f32 %v8235_v12, %v10137_v26  ;;  %v615_v49 = vpop.f32.mrb[13].mxu0  ;;  %v10475_v19 = vsel %vm10373_vm1, 0, %v1247_v50 }
 0x123   : > { %v1265_v36 = vshrl.u32 %v10446_v55, 16  ;;  %v1268_v59 = vshll.u32 %v10446_v55, 16  ;;  %v616_v54 = vadd.f32 %v10137_v26, %v615_v49  ;;  %v8236_v35 = vpop.f32.mrb[14].mxu0  ;;  %8265 = vmatprep.mubr.msk.bf16.mxu0 %vm1620_vm11, %v10475_v19  ;;  %v1257_v37 = vshrl.u32 %v10463_v57, 16 }
 0x124   : > { %v1260_v32 = vshll.u32 %v10463_v57, 16  ;;  %v10486_v29 = vsel %vm10384_vm2, 0, %v2964_v25  ;;  %v627_v40 = vadd.f32 %v8236_v35, %v10137_v26  ;;  %v618_v53 = vpop.f32.mrb[15].mxu0  ;;  %8266 = vmatmul.mubr.msk.bf16.gmra.mrb[36].mxu0 %vm1620_vm11, %v10469_v33  ;;  %v12426_v51 = vand.u32 15, %v10299_v61 }
 0x125   : > { %12425 = vst [vmem:[#allocation17_spill] sm:$0xff] %v10486_v29  ;;  %v10491_v6 = vrot.slane %v1265_v36, 7  ;;  %v2969_v42 = vrot.slane %v1268_v59, 1  ;;  %v708_v21 = vmax.f32 %v624_v7, 0.0  ;;  %v619_v46 = vadd.f32 %v10137_v26, %v618_v53 }
 0x126   : > { %vm10495_vm9 = vcmp.eq.s32.totalorder %v12426_v51, 0  ;;  %v1259_v12 = vrot.slane %v1257_v37, 7  ;;  %v2966_v50 = vrot.slane %v1260_v32, 1  ;;  %v12429_v25 = vcombine.low %v9850_v47, %v10102_v18 }
 0x127   : > { %v706_v35 = vmax.f32 %v616_v54, 0.0  ;;  %v709_v34 = vmax.f32 %v627_v40, 0.0  ;;  %v1270_v61 = vor.u32 %v1268_v59, %v10491_v6  ;;  %v12432_v51 = vcombine.low %v10076_v10, %v9850_v47  ;;  %vm1465_vm1 = vmpackc.low %vm10495_vm9, %vm10495_vm9 }
 0x128   : > { %vm10503_vm12 = vcmp.ne.s16.totalorder %v12429_v25, 0  ;;  %v12435_v53 = vand.u32 15, %v10321_v8  ;;  %v2971_v18 = vor.u32 %v2969_v42, %v1265_v36  ;;  %v707_v25 = vmax.f32 %v619_v46, 0.0 }
 0x129   : > { %vm10511_vm0 = vcmp.ne.s16.totalorder %v12432_v51, 0  ;;  %v1262_v29 = vor.u32 %v1260_v32, %v1259_v12  ;;  %v12438_v54 = vcombine.low %v10094_v16, %v9850_v47  ;;  %v2967_v10 = vsel %vm2954_vm10, %v2965_v48, %v2966_v50  ;;  %v8239_v48 = vpop.f32.mrb[16].mxu0 }
 0x12a   : > { %vm10517_vm15 = vcmp.eq.s32.totalorder %v12435_v53, 0  ;;  %v2968_v40 = vor.u32 %v2966_v50, %v1257_v37  ;;  %v10529_v51 = vpack.c.bf16 %v709_v34, %v708_v21  ;;  %v1271_v8 = vsel %vm1224_vm14, %v1259_v12, %v1270_v61  ;;  %v631_v21 = vpop.f32.mrb[17].mxu0 }
 0x12b   : > { %vm10524_vm4 = vcmp.ne.s16.totalorder %v12438_v54, 0  ;;  %v10534_v53 = vsel %vm10426_vm7, 0, %v2967_v10  ;;  %v12442_v36 = vcombine.low %v9850_v47, %v10128_v22  ;;  %v10544_v46 = vpack.c.bf16 %v707_v25, %v706_v35  ;;  %vm1463_vm9 = vmpackc.low %vm10517_vm15, %vm10517_vm15 }
 0x12c   : > { %12441 = vst [vmem:[#allocation18_spill] sm:$0xff] %v10534_v53  ;;  %v1263_v34 = vsel %vm1224_vm14, %v10417_v13, %v1262_v29  ;;  %v10550_v27 = vsel %vm10434_vm5, 0, %v1271_v8  ;;  %v2970_v37 = vsel %vm2954_vm10, %v2968_v40, %v2969_v42  ;;  %v640_v22 = vadd.f32 %v8239_v48, %v10137_v26  ;;  %v8240_v13 = vpop.f32.mrb[18].mxu0 }
 0x12d   : > { %vm10539_vm13 = vcmp.ne.s16.totalorder %v12442_v36, 0  ;;  %v10556_v12 = vsel %vm10441_vm3, 0, %v1263_v34  ;;  %v1281_v50 = vshrl.u32 %v10529_v51, 16  ;;  %v1284_v35 = vshll.u32 %v10529_v51, 16  ;;  %v634_v25 = vpop.f32.mrb[19].mxu0 }
 0x12e   : > { %v632_v61 = vadd.f32 %v10137_v26, %v631_v21  ;;  %8269 = vmatprep.mubr.msk.bf16.mxu0 %vm1620_vm11, %v10556_v12  ;;  %v1273_v39 = vshrl.u32 %v10544_v46, 16  ;;  %v1276_v29 = vshll.u32 %v10544_v46, 16  ;;  %v10567_v42 = vsel %vm10456_vm8, 0, %v2970_v37 }
 0x12f   : > { %12445 = vst [vmem:[#allocation19_spill] sm:$0xff] %v10567_v42  ;;  %v643_v4 = vadd.f32 %v8240_v13, %v10137_v26  ;;  %8270 = vmatmul.mubr.msk.bf16.gmra.mrb[40].mxu0 %vm1620_vm11, %v10550_v27  ;;  %v10572_v54 = vrot.slane %v1281_v50, 7  ;;  %v2975_v10 = vrot.slane %v1284_v35, 1  ;;  %v980_v40 = vand.u32 15, %v10461_v15 }
 0x130   : > { %v712_v8 = vmax.f32 %v640_v22, 0.0  ;;  %v635_v36 = vadd.f32 %v10137_v26, %v634_v25  ;;  %v1275_v48 = vrot.slane %v1273_v39, 7  ;;  %v2972_v58 = vrot.slane %v1276_v29, 1 }
 0x131   : > { %v12446_v34 = vcombine.low %v9850_v47, %v10170_v43  ;;  %v710_v21 = vmax.f32 %v632_v61, 0.0  ;;  %v713_v13 = vmax.f32 %v643_v4, 0.0  ;;  %v1286_v15 = vor.u32 %v1284_v35, %v10572_v54 }
 0x132   : > { %v12449_v22 = vcombine.low %v10117_v20, %v9850_v47  ;;  %v2977_v32 = vor.u32 %v2975_v10, %v1281_v50  ;;  %v12452_v42 = vand.u32 15, %v10324_v17  ;;  %v1278_v53 = vor.u32 %v1276_v29, %v1275_v48 }
 0x133   : > { %vm10582_vm2 = vcmp.ne.s16.totalorder %v12446_v34, 0  ;;  %v711_v34 = vmax.f32 %v635_v36, 0.0  ;;  %v12455_v61 = vcombine.low %v10158_v38, %v9850_v47  ;;  %v2973_v20 = vsel %vm2954_vm10, %v2971_v18, %v2972_v58 }
 0x134   : > { %vm10590_vm7 = vcmp.ne.s16.totalorder %v12449_v22, 0  ;;  %vm10596_vm5 = vcmp.eq.s32.totalorder %v12452_v42, 15  ;;  %v2974_v4 = vor.u32 %v2972_v58, %v1273_v39  ;;  %v10608_v22 = vpack.c.bf16 %v713_v13, %v712_v8  ;;  %v8243_v8 = vpop.f32.mrb[20].mxu0 }
 0x135   : > { %vm10603_vm3 = vcmp.ne.s16.totalorder %v12455_v61, 0  ;;  %v1287_v17 = vsel %vm1224_vm14, %v1275_v48, %v1286_v15  ;;  %v12458_v50 = vmov 0   ;;  %v10621_v38 = vsel %vm10503_vm12, 0, %v2973_v20  ;;  %v647_v48 = vpop.f32.mrb[21].mxu0 }
 0x136   : > { %v10617_v29 = vsel %vm1465_vm1, 65537, %v12458_v50  ;;  %12459 = vst [vmem:[#allocation20_spill] sm:$0xff] %v10621_v38  ;;  %v12460_v18 = vcombine.low %v9850_v47, %v10204_v2  ;;  %v10630_v42 = vpack.c.bf16 %v711_v34, %v710_v21  ;;  %v1279_v14 = vsel %vm1224_vm14, %v10491_v6, %v1278_v53  ;;  %v8244_v53 = vpop.f32.mrb[22].mxu0  ;;  %vm3112_vm1 = vmpackc.low %vm10596_vm5, %vm10596_vm5  ;;  %v9440_v38 = vld [vmem:[%s12289_s3 + $0xc0] sm:$0xff]  }
 0x137   : > { %v10636_v36 = vsel %vm10511_vm0, 0, %v1287_v17  ;;  %v2976_v2 = vsel %vm2954_vm10, %v2974_v4, %v2975_v10  ;;  %v656_v49 = vadd.f32 %v8243_v8, %v10137_v26  ;;  %v10645_v58 = vsel %vm10524_vm4, 0, %v1279_v14  ;;  %v650_v34 = vpop.f32.mrb[23].mxu0 }
 0x138   : > { %vm10626_vm8 = vcmp.ne.s16.totalorder %v12460_v18, 0  ;;  %v1297_v21 = vshrl.u32 %v10608_v22, 16  ;;  %v1300_v6 = vshll.u32 %v10608_v22, 16  ;;  %v648_v7 = vadd.f32 %v10137_v26, %v647_v48  ;;  %8273 = vmatprep.mubr.msk.bf16.mxu0 %vm1620_vm11, %v10645_v58 }
 0x139   : > { %v1289_v13 = vshrl.u32 %v10630_v42, 16  ;;  %v1292_v10 = vshll.u32 %v10630_v42, 16  ;;  %v10656_v15 = vsel %vm10539_vm13, 0, %v2976_v2  ;;  %v659_v59 = vadd.f32 %v8244_v53, %v10137_v26  ;;  %8274 = vmatmul.mubr.msk.bf16.gmra.mrb[44].mxu0 %vm1620_vm11, %v10636_v36 }
 0x13a   : > { %12463 = vst [vmem:[#allocation21_spill] sm:$0xff] %v10656_v15  ;;  %v10661_v61 = vrot.slane %v1297_v21, 7  ;;  %v10669_v20 = vsel %vm1463_vm9, 65537, %v12458_v50  ;;  %v2981_v4 = vrot.slane %v1300_v6, 1  ;;  %v716_v16 = vmax.f32 %v656_v49, 0.0 }
 0x13b   : > { %v651_v17 = vadd.f32 %v10137_v26, %v650_v34  ;;  %v1291_v18 = vrot.slane %v1289_v13, 7  ;;  %v2978_v8 = vrot.slane %v1292_v10, 1  ;;  %v12464_v14 = vcombine.low %v9850_v47, %v10233_v11 }
 0x13c   : > { %v714_v48 = vmax.f32 %v648_v7, 0.0  ;;  %v717_v53 = vmax.f32 %v659_v59, 0.0  ;;  %v1302_v30 = vor.u32 %v1300_v6, %v10661_v61  ;;  %v12467_v15 = vcombine.low %v10193_v62, %v9850_v47 }
 0x13d   : > { %vm10675_vm12 = vcmp.ne.s16.totalorder %v12464_v14, 0  ;;  %v2983_v34 = vor.u32 %v2981_v4, %v1297_v21  ;;  %vm10687_vm15 = vcmp.eq.s32.totalorder %v980_v40, 15  ;;  %v715_v11 = vmax.f32 %v651_v17, 0.0 }
 0x13e   : > { %vm10683_vm0 = vcmp.ne.s16.totalorder %v12467_v15, 0  ;;  %v1294_v14 = vor.u32 %v1292_v10, %v1291_v18  ;;  %v12472_v7 = vcombine.low %v10219_v0, %v9850_v47  ;;  %v2979_v62 = vsel %vm2954_vm10, %v2977_v32, %v2978_v8  ;;  %vm3116_vm9 = vmpackc.low %vm10687_vm15, %vm10687_vm15 }
 0x13f   : > { %v2980_v6 = vor.u32 %v2978_v8, %v1289_v13  ;;  %v10699_v15 = vpack.c.bf16 %v717_v53, %v716_v16  ;;  %v1303_v21 = vsel %vm1224_vm14, %v1291_v18, %v1302_v30  ;;  %v10706_v10 = vsel %vm10582_vm2, 0, %v2979_v62  ;;  %v8247_v13 = vpop.f32.mrb[24].mxu0 }
 0x140   : > { %vm10694_vm4 = vcmp.ne.s16.totalorder %v12472_v7, 0  ;;  %12475 = vst [vmem:[#allocation22_spill] sm:$0xff] %v10706_v10  ;;  %v12476_v0 = vcombine.low %v9850_v47, %v10241_v60  ;;  %v10715_v32 = vpack.c.bf16 %v715_v11, %v714_v48  ;;  %v1295_v16 = vsel %vm1224_vm14, %v10572_v54, %v1294_v14  ;;  %v663_v8 = vpop.f32.mrb[25].mxu0  ;;  %v9437_v54 = vld [vmem:[%s12289_s3 + $0x8] sm:$0xff]  }
 0x141   : > { %v10721_v18 = vsel %vm10590_vm7, 0, %v1303_v21  ;;  %v2982_v37 = vsel %vm2954_vm10, %v2980_v6, %v2981_v4  ;;  %v672_v60 = vadd.f32 %v8247_v13, %v10137_v26  ;;  %v10730_v48 = vsel %vm10603_vm3, 0, %v1295_v16  ;;  %v8248_v14 = vpop.f32.mrb[26].mxu0 }
 0x142   : > { %vm10711_vm13 = vcmp.ne.s16.totalorder %v12476_v0, 0  ;;  %v1313_v25 = vshrl.u32 %v10699_v15, 16  ;;  %v1316_v53 = vshll.u32 %v10699_v15, 16  ;;  %v12479_v4 = vand.u32 15, %v10420_v31  ;;  %8277 = vmatprep.mubr.msk.bf16.mxu1 %vm1620_vm11, %v10730_v48  ;;  %v666_v6 = vpop.f32.mrb[27].mxu0 }
 0x143   : > { %v664_v11 = vadd.f32 %v10137_v26, %v663_v8  ;;  %v1305_v35 = vshrl.u32 %v10715_v32, 16  ;;  %v1308_v7 = vshll.u32 %v10715_v32, 16  ;;  %v10750_v62 = vsel %vm10626_vm8, 0, %v2982_v37  ;;  %8278 = vmatmul.mubr.msk.bf16.vlgmr.msra.gmra.mrb[0].mxu1 %vm1620_vm11, %v10721_v18 }
 0x144   : > { %vm10739_vm2 = vcmp.eq.s32.totalorder %v12479_v4, 15  ;;  %12482 = vst [vmem:[#allocation23_spill] sm:$0xff] %v10750_v62  ;;  %v675_v31 = vadd.f32 %v8248_v14, %v10137_v26  ;;  %v10755_v21 = vrot.slane %v1313_v25, 7  ;;  %v2987_v0 = vrot.slane %v1316_v53, 1  ;;  %8294 = vmatpush3.bf16.msra.mxu1 %v9805_v28 }
 0x145   : > { %v10763_v13 = vsel %vm3112_vm1, 65537, %v12458_v50  ;;  %v720_v39 = vmax.f32 %v672_v60, 0.0  ;;  %v667_v16 = vadd.f32 %v10137_v26, %v666_v6  ;;  %v1307_v37 = vrot.slane %v1305_v35, 7  ;;  %8295 = vmatprep.subr.bf16.mxu1 %v9437_v54  ;;  %v9438_v60 = vld [vmem:[%s12289_s3 + $0x10] sm:$0xff]  }
 0x146   : > { %v2984_v8 = vrot.slane %v1308_v7, 1  ;;  %v12483_v4 = vcombine.low %v9850_v47, %v10314_v5  ;;  %v718_v40 = vmax.f32 %v664_v11, 0.0  ;;  %v721_v62 = vmax.f32 %v675_v31, 0.0 }
 0x147   : > { %v1318_v43 = vor.u32 %v1316_v53, %v10755_v21  ;;  %v2989_v6 = vor.u32 %v2987_v0, %v1313_v25  ;;  %v719_v28 = vmax.f32 %v667_v16, 0.0  ;;  %v1310_v10 = vor.u32 %v1308_v7, %v1307_v37 }
 0x148   : > { %vm10770_vm7 = vcmp.ne.s16.totalorder %v12483_v4, 0  ;;  %v12486_v45 = vcombine.low %v10278_v23, %v9850_v47  ;;  %v2985_v11 = vsel %vm2954_vm10, %v2983_v34, %v2984_v8  ;;  %v2986_v31 = vor.u32 %v2984_v8, %v1305_v35  ;;  %8296 = vmatpush3.bf16.msra.mxu1 %v9437_v54 }
 0x149   : > { %v12489_v53 = vcombine.low %v9850_v47, %v10335_v56  ;;  %v10793_v25 = vpack.c.bf16 %v721_v62, %v720_v39  ;;  %v1319_v7 = vsel %vm1224_vm14, %v1307_v37, %v1318_v43  ;;  %v12492_v23 = vcombine.low %v10256_v52, %v9850_v47  ;;  %v8251_v62 = vpop.f32.mrb[28].mxu0  ;;  %8297 = vmatprep.subr.bf16.mxu1 %v9438_v60 }
 0x14a   : > { %vm10781_vm5 = vcmp.ne.s16.totalorder %v12486_v45, 0  ;;  %v10805_v34 = vsel %vm10675_vm12, 0, %v2985_v11  ;;  %v10809_v35 = vpack.c.bf16 %v719_v28, %v718_v40  ;;  %v1311_v39 = vsel %vm1224_vm14, %v10661_v61, %v1310_v10  ;;  %v679_v37 = vpop.f32.mrb[29].mxu0  ;;  %v9439_v10 = vld [vmem:[%s12289_s3 + $0x18] sm:$0xff]  }
 0x14b   : > { %vm10789_vm3 = vcmp.ne.s16.totalorder %v12489_v53, 0  ;;  %vm10799_vm8 = vcmp.ne.s16.totalorder %v12492_v23, 0  ;;  %v10815_v52 = vsel %vm10683_vm0, 0, %v1319_v7  ;;  %v2988_v16 = vsel %vm2954_vm10, %v2986_v31, %v2987_v0  ;;  %v8252_v0 = vpop.f32.mrb[30].mxu0  ;;  %vm3114_vm0 = vmpackc.low %vm10739_vm2, %vm10739_vm2 }
 0x14c   : > { %v688_v2 = vadd.f32 %v8251_v62, %v10137_v26  ;;  %v10824_v40 = vsel %vm10694_vm4, 0, %v1311_v39  ;;  %v1329_v61 = vshrl.u32 %v10793_v25, 16  ;;  %v1332_v49 = vshll.u32 %v10793_v25, 16  ;;  %v682_v11 = vpop.f32.mrb[31].mxu0  ;;  %8298 = vmatpush3.bf16.msra.mxu1 %v9438_v60 }
 0x14d   : > { %vm3018_vm12 = vcmask 1047552   ;;  %v680_v54 = vadd.f32 %v10137_v26, %v679_v37  ;;  %8281 = vmatprep.mubr.msk.bf16.mxu1 %vm1620_vm11, %v10824_v40  ;;  %v1321_v59 = vshrl.u32 %v10809_v35, 16  ;;  %v1324_v8 = vshll.u32 %v10809_v35, 16  ;;  %8299 = vmatprep.subr.bf16.mxu1 %v9439_v10 }
 0x14e   : > { %v10838_v43 = vsel %vm10711_vm13, 0, %v2988_v16  ;;  %v691_v28 = vadd.f32 %v8252_v0, %v10137_v26  ;;  %8282 = vmatmul.mubr.msk.bf16.gmra.mrb[4].mxu1 %vm1620_vm11, %v10815_v52  ;;  %v1331_v31 = vrot.slane %v1329_v61, 7  ;;  %v2993_v53 = vrot.slane %v1332_v49, 1  ;;  %vm10899_vm4 = vmand %vm3018_vm12, %vm2954_vm10 }
 0x14f   : > { %12495 = vst [vmem:[#allocation24_spill] sm:$0xff] %v10838_v43  ;;  %v3148_v7 = vsel %vm3116_vm9, 65537, %v12458_v50  ;;  %v724_v23 = vmax.f32 %v688_v2, 0.0  ;;  %v683_v17 = vadd.f32 %v10137_v26, %v682_v11  ;;  %v1323_v62 = vrot.slane %v1321_v59, 7 }
 0x150   : > { %v2990_v39 = vrot.slane %v1324_v8, 1  ;;  %v722_v16 = vmax.f32 %v680_v54, 0.0  ;;  %v725_v37 = vmax.f32 %v691_v28, 0.0  ;;  %v1334_v0 = vor.u32 %v1332_v49, %v1331_v31  ;;  %8300 = vmatpush3.bf16.msra.mxu1 %v9439_v10 }
 0x151   : > { %v2995_v56 = vor.u32 %v2993_v53, %v1329_v61  ;;  %v723_v43 = vmax.f32 %v683_v17, 0.0  ;;  %v1326_v2 = vor.u32 %v1324_v8, %v1323_v62  ;;  %v3146_v49 = vsel %vm3114_vm0, 65537, %v12458_v50  ;;  %8333 = vmatprep.subr.bf16.mxu1 %v9440_v38 }
 0x152   : > { %v2991_v26 = vsel %vm2954_vm10, %v2989_v6, %v2990_v39  ;;  %v2992_v11 = vor.u32 %v2990_v39, %v1321_v59  ;;  %v10857_v60 = vpack.c.bf16 %v725_v37, %v724_v23  ;;  %v1335_v30 = vsel %vm1224_vm14, %v1323_v62, %v1334_v0 }
 0x153   : > { %v10862_v54 = vsel %vm10770_vm7, 0, %v2991_v26  ;;  %v10865_v28 = vpack.c.bf16 %v723_v43, %v722_v16  ;;  %v1327_v61 = vsel %vm1224_vm14, %v10755_v21, %v1326_v2  ;;  %v7359_v6 = vcombine.low %v9850_v47, %v3148_v7 }
 0x154   : > { %v2994_v8 = vsel %vm2954_vm10, %v2992_v11, %v2993_v53  ;;  %v1345_v59 = vshrl.u32 %v10857_v60, 16  ;;  %v10874_v23 = vsel %vm10781_vm5, 0, %v1327_v61  ;;  %v1348_v14 = vshll.u32 %v10857_v60, 16 }
 0x155   : > { %v10879_v43 = vsel %vm10789_vm3, 0, %v2994_v8  ;;  %8285 = vmatprep.mubr.msk.bf16.mxu1 %vm1620_vm11, %v10874_v23  ;;  %v10885_v21 = vsel %vm10799_vm8, 0, %v1335_v30  ;;  %v1337_v10 = vshrl.u32 %v10865_v28, 16  ;;  %v1340_v5 = vshll.u32 %v10865_v28, 16 }
 0x156   : > { %v7358_v53 = vcombine.low %v9850_v47, %v3146_v49  ;;  %8286 = vmatmul.mubr.msk.bf16.gmra.mrb[8].mxu1 %vm1620_vm11, %v10885_v21  ;;  %v1347_v7 = vrot.slane %v1345_v59, 7  ;;  %v7187_v4 = vcombine.low %v10617_v29, %v9850_v47  ;;  %v2999_v17 = vrot.slane %v1348_v14, 1 }
 0x157   : > { %v1339_v62 = vrot.slane %v1337_v10, 7  ;;  %v2996_v39 = vrot.slane %v1340_v5, 1  ;;  %v12496_v45 = vcombine.low %v9850_v47, %v10763_v13  ;;  %v12499_v37 = vcombine.low %v10669_v20, %v9850_v47 }
 0x158   : > { %v1350_v0 = vor.u32 %v1348_v14, %v1347_v7  ;;  %v3001_v2 = vor.u32 %v2999_v17, %v1345_v59  ;;  %vm3212_vm1 = vcmp.ne.s16.totalorder %v7359_v6, 0  ;;  %vm3211_vm2 = vcmp.ne.s16.totalorder %v7358_v53, 0  ;;  %v9441_v59 = vld [vmem:[%s12289_s3 + $0xc8] sm:$0xff]   ;;  %v9443_v14 = vld [vmem:[%s12289_s3 + $0xd8] sm:$0xff]  }
 0x159   : > { %vm3210_vm15 = vcmp.ne.s16.totalorder %v12496_v45, 0  ;;  %vm1561_vm13 = vcmp.ne.s16.totalorder %v12499_v37, 0  ;;  %v1342_v29 = vor.u32 %v1340_v5, %v1339_v62  ;;  %v2997_v26 = vsel %vm2954_vm10, %v2995_v56, %v2996_v39 }
 0x15a   : > { %v2998_v11 = vor.u32 %v2996_v39, %v1337_v10  ;;  %v1351_v13 = vsel %vm1224_vm14, %v1339_v62, %v1350_v0  ;;  %vm1562_vm7 = vcmp.ne.s16.totalorder %v7187_v4, 0  ;;  %v10908_v30 = vsel %vm3210_vm15, 0, %v2997_v26  ;;  %v9446_v10 = vld [vmem:[%s12289_s3 + $0x30] sm:$0xff]   ;;  %v9453_v0 = vld [vmem:[%s12289_s3 + $0xe8] sm:$0xff]  }
 0x15b   : > { %v3020_v49 = vsel %vm10899_vm4, %v3001_v2, 0  ;;  %v1343_v61 = vsel %vm1224_vm14, %v1331_v31, %v1342_v29  ;;  %v1578_v56 = vsel %vm1562_vm7, 0, %v1351_v13  ;;  %v9442_v31 = vld [vmem:[%s12289_s3 + $0xd0] sm:$0xff]   ;;  %v9456_v29 = vld [vmem:[%s12289_s3 + $0x40] sm:$0xff]   ;;  %v9457_v26 = vld [vmem:[%s12289_s3 + $0x48] sm:$0xff]  }
 0x15c   : > { %v3000_v47 = vsel %vm2954_vm10, %v2998_v11, %v2999_v17  ;;  %v10914_v20 = vsel %vm3212_vm1, 0, %v3020_v49  ;;  %v1577_v8 = vsel %vm1561_vm13, 0, %v1343_v61  ;;  %v9454_v2 = vld [vmem:[%s12289_s3 + $0xf0] sm:$0xff]   ;;  %v9465_v13 = vld [vmem:[%s12289_s3 + $0x108] sm:$0xff]   ;;  %v12509_v61 = vld [vmem:[#allocation7_spill] sm:$0xff] }
 0x15d   : > { %v10916_v6 = vsel %vm3211_vm2, 0, %v3000_v47  ;;  %8289 = vmatprep.mubr.msk.bf16.mxu1 %vm1620_vm11, %v1577_v8  ;;  %v9458_v11 = vld [vmem:[%s12289_s3 + $0x50] sm:$0xff]   ;;  %v4276_v47 = vand.u32 7, %v12509_v61 }
 0x15e   : > { %8290 = vmatmul.mubr.msk.bf16.gmra.mrb[12].mxu1 %vm1620_vm11, %v1578_v56  ;;  %v9466_v49 = vld [vmem:[%s12289_s3 + $0x110] sm:$0xff]  }
 0x15f   : > { %8301 = vmatprep.mubr.bf16.mxu1 %v12458_v50  ;;  %vm4376_vm5 = vcmp.eq.s32.totalorder %v4276_v47, 7 }
 0x160   : > { %vm5206_vm8 = vmpackc.low %vm4376_vm5, %vm4376_vm5 }
 0x166   : > { %8302 = vmatmul.mubr.msk.bf16.vlgmr.msra.gmra.mrb[16].mxu1 %vm1620_vm11, %v10401_v24  ;;  %v9444_v24 = vld [vmem:[%s12289_s3 + $0x20] sm:$0xff]  }
 0x167   : > { %8334 = vmatpush3.bf16.msra.mxu1 %v9440_v38  ;;  %8305 = vmatprep.mubr.msk.bf16.mxu1 %vm1620_vm11, %v10395_v63  ;;  %v9445_v38 = vld [vmem:[%s12289_s3 + $0x28] sm:$0xff]  }
 0x168   : > { %8335 = vmatprep.subr.bf16.mxu1 %v9441_v59 }
 0x16b   : > { %8336 = vmatpush3.bf16.msra.mxu1 %v9441_v59 }
 0x16c   : > { %8337 = vmatprep.subr.bf16.mxu1 %v9442_v31 }
 0x16e   : > { %8306 = vmatmul.mubr.msk.bf16.gmra.mrb[20].mxu1 %vm1620_vm11, %v10475_v19 }
 0x16f   : > { %8309 = vmatprep.mubr.msk.bf16.mxu1 %vm1620_vm11, %v10469_v33  ;;  %8338 = vmatpush3.bf16.msra.mxu1 %v9442_v31  ;;  %v11309_v31 = vld [vmem:[%s12291_s5] sm:$0xff]  }
 0x170   : > { %8339 = vmatprep.subr.bf16.mxu1 %v9443_v14 }
 0x173   : > { %8340 = vmatpush3.bf16.msra.mxu1 %v9443_v14  ;;  %v12511_v14 = vld [vmem:[#allocation10_spill] sm:$0xff] }
 0x174   : > { %8373 = vmatprep.subr.bf16.mxu1 %v9444_v24 }
 0x176   : > { %8310 = vmatmul.mubr.msk.bf16.gmra.mrb[24].mxu1 %vm1620_vm11, %v10556_v12 }
 0x177   : > { %8313 = vmatprep.mubr.msk.bf16.mxu1 %vm1620_vm11, %v10550_v27 }
 0x17e   : > { %8314 = vmatmul.mubr.msk.bf16.gmra.mrb[28].mxu1 %vm1620_vm11, %v10645_v58 }
 0x17f   : > { %8317 = vmatprep.mubr.msk.bf16.mxu1 %vm1620_vm11, %v10636_v36 }
 0x186   : > { %8318 = vmatmul.mubr.msk.bf16.gmra.mrb[0].mxu1 %vm1620_vm11, %v10730_v48 }
 0x187   : > { %8321 = vmatprep.mubr.msk.bf16.mxu1 %vm1620_vm11, %v10721_v18 }
 0x18e   : > { %8322 = vmatmul.mubr.msk.bf16.gmra.mrb[4].mxu1 %vm1620_vm11, %v10824_v40 }
 0x18f   : > { %8325 = vmatprep.mubr.msk.bf16.mxu1 %vm1620_vm11, %v10815_v52 }
 0x196   : > { %8326 = vmatmul.mubr.msk.bf16.gmra.mrb[8].mxu1 %vm1620_vm11, %v10874_v23 }
 0x197   : > { %8329 = vmatprep.mubr.msk.bf16.mxu1 %vm1620_vm11, %v10885_v21 }
 0x19e   : > { %8330 = vmatmul.mubr.msk.bf16.gmra.mrb[12].mxu1 %vm1620_vm11, %v1577_v8 }
 0x19f   : > { %8341 = vmatprep.mubr.msk.bf16.mxu1 %vm1620_vm11, %v10395_v63  ;;  %v9447_v63 = vld [vmem:[%s12289_s3 + $0x38] sm:$0xff]  }
 0x1a6   : > { %8342 = vmatmul.mubr.msk.bf16.vlgmr.msra.gmra.mrb[16].mxu1 %vm1620_vm11, %v10475_v19  ;;  %v9449_v19 = vld [vmem:[%s12289_s3 + $0x88] sm:$0xff]  }
 0x1a7   : > { %8374 = vmatpush3.bf16.msra.mxu1 %v9444_v24  ;;  %8345 = vmatprep.mubr.msk.bf16.mxu1 %vm1620_vm11, %v10469_v33  ;;  %v9448_v33 = vld [vmem:[%s12289_s3 + $0x80] sm:$0xff]   ;;  %v4304_v24 = vand.u32 7, %v12511_v14 }
 0x1a8   : > { %8375 = vmatprep.subr.bf16.mxu1 %v9445_v38 }
 0x1a9   : > { %vm4380_vm12 = vcmp.eq.s32.totalorder %v4304_v24, 7 }
 0x1aa   : > { %vm5210_vm13 = vmpackc.low %vm4380_vm12, %vm4380_vm12 }
 0x1ab   : > { %8376 = vmatpush3.bf16.msra.mxu1 %v9445_v38  ;;  %v12512_v38 = vld [vmem:[#allocation11_spill] sm:$0xff] }
 0x1ac   : > { %8377 = vmatprep.subr.bf16.mxu1 %v9446_v10 }
 0x1ae   : > { %8346 = vmatmul.mubr.msk.bf16.gmra.mrb[20].mxu1 %vm1620_vm11, %v10556_v12  ;;  %v9451_v12 = vld [vmem:[%s12289_s3 + $0x98] sm:$0xff]  }
 0x1af   : > { %8349 = vmatprep.mubr.msk.bf16.mxu1 %vm1620_vm11, %v10550_v27  ;;  %8378 = vmatpush3.bf16.msra.mxu1 %v9446_v10  ;;  %v9450_v27 = vld [vmem:[%s12289_s3 + $0x90] sm:$0xff]   ;;  %v4318_v10 = vand.u32 7, %v12512_v38 }
 0x1b0   : > { %8379 = vmatprep.subr.bf16.mxu1 %v9447_v63 }
 0x1b1   : > { %vm4382_vm15 = vcmp.eq.s32.totalorder %v4318_v10, 7 }
 0x1b2   : > { %vm5212_vm7 = vmpackc.low %vm4382_vm15, %vm4382_vm15 }
 0x1b3   : > { %8380 = vmatpush3.bf16.msra.mxu1 %v9447_v63  ;;  %v12513_v63 = vld [vmem:[#allocation13_spill] sm:$0xff] }
 0x1b4   : > { %8413 = vmatprep.subr.bf16.mxu1 %v9448_v33 }
 0x1b6   : > { %8350 = vmatmul.mubr.msk.bf16.gmra.mrb[24].mxu1 %vm1620_vm11, %v10645_v58 }
 0x1b7   : > { %8353 = vmatprep.mubr.msk.bf16.mxu1 %vm1620_vm11, %v10636_v36  ;;  %v9452_v36 = vld [vmem:[%s12289_s3 + $0xe0] sm:$0xff]  }
 0x1be   : > { %8354 = vmatmul.mubr.msk.bf16.gmra.mrb[28].mxu1 %vm1620_vm11, %v10730_v48 }
 0x1bf   : > { %8357 = vmatprep.mubr.msk.bf16.mxu1 %vm1620_vm11, %v10721_v18 }
 0x1c6   : > { %8358 = vmatmul.mubr.msk.bf16.gmra.mrb[0].mxu1 %vm1620_vm11, %v10824_v40 }
 0x1c7   : > { %8361 = vmatprep.mubr.msk.bf16.mxu1 %vm1620_vm11, %v10815_v52 }
 0x1ce   : > { %8362 = vmatmul.mubr.msk.bf16.gmra.mrb[4].mxu1 %vm1620_vm11, %v10874_v23 }
 0x1cf   : > { %8365 = vmatprep.mubr.msk.bf16.mxu1 %vm1620_vm11, %v10885_v21 }
 0x1d6   : > { %8366 = vmatmul.mubr.msk.bf16.gmra.mrb[8].mxu1 %vm1620_vm11, %v1577_v8 }
 0x1d7   : > { %8369 = vmatprep.mubr.msk.bf16.mxu1 %vm1620_vm11, %v1578_v56 }
 0x1de   : > { %8370 = vmatmul.mubr.bf16.gmra.mrb[12].mxu1 %v12458_v50 }
 0x1df   : > { %8381 = vmatprep.mubr.bf16.mxu1 %v12458_v50 }
 0x1e6   : > { %8382 = vmatmul.mubr.msk.bf16.vlgmr.msra.gmra.mrb[16].mxu1 %vm1620_vm11, %v10316_v44 }
 0x1e7   : > { %8414 = vmatpush3.bf16.msra.mxu1 %v9448_v33  ;;  %8385 = vmatprep.mubr.msk.bf16.mxu1 %vm1620_vm11, %v10294_v41  ;;  %v4311_v33 = vand.u32 7, %v12513_v63 }
 0x1e8   : > { %8415 = vmatprep.subr.bf16.mxu1 %v9449_v19 }
 0x1e9   : > { %vm4381_vm0 = vcmp.eq.s32.totalorder %v4311_v33, 7 }
 0x1ea   : > { %vm5211_vm2 = vmpackc.low %vm4381_vm0, %vm4381_vm0 }
 0x1eb   : > { %8416 = vmatpush3.bf16.msra.mxu1 %v9449_v19  ;;  %v12514_v19 = vld [vmem:[#allocation14_spill] sm:$0xff] }
 0x1ec   : > { %8417 = vmatprep.subr.bf16.mxu1 %v9450_v27 }
 0x1ee   : > { %8386 = vmatmul.mubr.msk.bf16.gmra.mrb[20].mxu1 %vm1620_vm11, %v10389_v9 }
 0x1ef   : > { %8389 = vmatprep.mubr.msk.bf16.mxu1 %vm1620_vm11, %v10377_v1  ;;  %8418 = vmatpush3.bf16.msra.mxu1 %v9450_v27  ;;  %v11028_v58 = vpop.f32.mrb[32].mxu0  ;;  %v4325_v27 = vand.u32 7, %v12514_v19 }
 0x1f0   : > { %8419 = vmatprep.subr.bf16.mxu1 %v9451_v12  ;;  %v11030_v18 = vpop.f32.mrb[33].mxu0 }
 0x1f1   : > { %v11032_v48 = vpop.f32.mrb[34].mxu0  ;;  %vm4383_vm1 = vcmp.eq.s32.totalorder %v4325_v27, 7 }
 0x1f2   : > { %v11034_v52 = vpop.f32.mrb[35].mxu0  ;;  %vm5213_vm5 = vmpackc.low %vm4383_vm1, %vm4383_vm1 }
 0x1f3   : > { %8420 = vmatpush3.bf16.msra.mxu1 %v9451_v12  ;;  %v11325_v12 = vsel %vm5210_vm13, 65537, %v12458_v50 }
 0x1f4   : > { %8453 = vmatprep.subr.bf16.mxu1 %v9452_v36 }
 0x1f6   : > { %8390 = vmatmul.mubr.msk.bf16.gmra.mrb[24].mxu1 %vm1620_vm11, %v10463_v57 }
 0x1f7   : > { %8393 = vmatprep.mubr.msk.bf16.mxu1 %vm1620_vm11, %v10446_v55  ;;  %v11040_v40 = vpop.f32.mrb[36].mxu0 }
 0x1f8   : > { %v11042_v23 = vpop.f32.mrb[37].mxu0 }
 0x1f9   : > { %v11044_v21 = vpop.f32.mrb[38].mxu0 }
 0x1fa   : > { %v11046_v5 = vpop.f32.mrb[39].mxu0 }
 0x1fe   : > { %8394 = vmatmul.mubr.msk.bf16.gmra.mrb[28].mxu1 %vm1620_vm11, %v10544_v46 }
 0x1ff   : > { %8397 = vmatprep.mubr.msk.bf16.mxu1 %vm1620_vm11, %v10529_v51 }
 0x202   : > { %v11052_v53 = vpop.f32.mrb[40].mxu0 }
 0x203   : > { %v11054_v7 = vpop.f32.mrb[41].mxu0 }
 0x204   : > { %v11056_v4 = vpop.f32.mrb[42].mxu0 }
 0x205   : > { %v11058_v17 = vpop.f32.mrb[43].mxu0 }
 0x206   : > { %8398 = vmatmul.mubr.msk.bf16.gmra.mrb[0].mxu1 %vm1620_vm11, %v10630_v42 }
 0x207   : > { %8401 = vmatprep.mubr.msk.bf16.mxu1 %vm1620_vm11, %v10608_v22 }
 0x20c   : > { %v11064_v62 = vpop.f32.mrb[44].mxu0 }
 0x20d   : > { %v11066_v39 = vpop.f32.mrb[45].mxu0 }
 0x20e   : > { %8402 = vmatmul.mubr.msk.bf16.gmra.mrb[4].mxu1 %vm1620_vm11, %v10715_v32  ;;  %v11068_v45 = vpop.f32.mrb[46].mxu0 }
 0x20f   : > { %8405 = vmatprep.mubr.msk.bf16.mxu1 %vm1620_vm11, %v10699_v15  ;;  %v11070_v37 = vpop.f32.mrb[47].mxu0 }
 0x216   : > { %8406 = vmatmul.mubr.msk.bf16.gmra.mrb[8].mxu1 %vm1620_vm11, %v10809_v35 }
 0x217   : > { %8409 = vmatprep.mubr.msk.bf16.mxu1 %vm1620_vm11, %v10793_v25 }
 0x21e   : > { %8410 = vmatmul.mubr.msk.bf16.gmra.mrb[12].mxu1 %vm1620_vm11, %v10865_v28 }
 0x21f   : > { %8421 = vmatprep.mubr.msk.bf16.mxu1 %vm1620_vm11, %v10316_v44  ;;  %v9455_v44 = vld [vmem:[%s12289_s3 + $0xf8] sm:$0xff]  }
 0x226   : > { %8422 = vmatmul.mubr.msk.bf16.vlgmr.msra.gmra.mrb[16].mxu1 %vm1620_vm11, %v10294_v41 }
 0x227   : > { %8454 = vmatpush3.bf16.msra.mxu1 %v9452_v36  ;;  %8425 = vmatprep.mubr.msk.bf16.mxu1 %vm1620_vm11, %v10389_v9  ;;  %v11328_v36 = vsel %vm5211_vm2, 65537, %v12458_v50 }
 0x228   : > { %8455 = vmatprep.subr.bf16.mxu1 %v9453_v0 }
 0x22b   : > { %8456 = vmatpush3.bf16.msra.mxu1 %v9453_v0  ;;  %v7537_v0 = vcombine.low %v11325_v12, %v11328_v36 }
 0x22c   : > { %8457 = vmatprep.subr.bf16.mxu1 %v9454_v2 }
 0x22e   : > { %8426 = vmatmul.mubr.msk.bf16.gmra.mrb[20].mxu1 %vm1620_vm11, %v10377_v1 }
 0x22f   : > { %8429 = vmatprep.mubr.msk.bf16.mxu1 %vm1620_vm11, %v10463_v57  ;;  %8458 = vmatpush3.bf16.msra.mxu1 %v9454_v2  ;;  %v11333_v2 = vsel %vm5212_vm7, 65537, %v12458_v50 }
 0x230   : > { %8459 = vmatprep.subr.bf16.mxu1 %v9455_v44 }
 0x233   : > { %8460 = vmatpush3.bf16.msra.mxu1 %v9455_v44  ;;  %v11336_v44 = vsel %vm5213_vm5, 65537, %v12458_v50 }
 0x234   : > { %8493 = vmatprep.subr.bf16.mxu1 %v9456_v29 }
 0x236   : > { %8430 = vmatmul.mubr.msk.bf16.gmra.mrb[24].mxu1 %vm1620_vm11, %v10446_v55 }
 0x237   : > { %8433 = vmatprep.mubr.msk.bf16.mxu1 %vm1620_vm11, %v10544_v46 }
 0x23e   : > { %8434 = vmatmul.mubr.msk.bf16.gmra.mrb[28].mxu1 %vm1620_vm11, %v10529_v51 }
 0x23f   : > { %8437 = vmatprep.mubr.msk.bf16.mxu1 %vm1620_vm11, %v10630_v42 }
 0x246   : > { %8438 = vmatmul.mubr.msk.bf16.gmra.mrb[0].mxu1 %vm1620_vm11, %v10608_v22 }
 0x247   : > { %8441 = vmatprep.mubr.msk.bf16.mxu1 %vm1620_vm11, %v10715_v32 }
 0x24e   : > { %8442 = vmatmul.mubr.msk.bf16.gmra.mrb[4].mxu1 %vm1620_vm11, %v10699_v15 }
 0x24f   : > { %8445 = vmatprep.mubr.msk.bf16.mxu1 %vm1620_vm11, %v10809_v35 }
 0x256   : > { %8446 = vmatmul.mubr.msk.bf16.gmra.mrb[8].mxu1 %vm1620_vm11, %v10793_v25 }
 0x257   : > { %8449 = vmatprep.mubr.msk.bf16.mxu1 %vm1620_vm11, %v10865_v28 }
 0x25e   : > { %8450 = vmatmul.mubr.msk.bf16.gmra.mrb[12].mxu1 %vm1620_vm11, %v10857_v60 }
 0x25f   : > { %8461 = vmatprep.mubr.msk.bf16.mxu1 %vm1620_vm11, %v10294_v41  ;;  %v9459_v41 = vld [vmem:[%s12289_s3 + $0x58] sm:$0xff]  }
 0x266   : > { %8462 = vmatmul.mubr.msk.bf16.vlgmr.msra.gmra.mrb[16].mxu1 %vm1620_vm11, %v10389_v9  ;;  %v9461_v9 = vld [vmem:[%s12289_s3 + $0xa8] sm:$0xff]  }
 0x267   : > { %8494 = vmatpush3.bf16.msra.mxu1 %v9456_v29  ;;  %8465 = vmatprep.mubr.msk.bf16.mxu1 %vm1620_vm11, %v10377_v1  ;;  %v9460_v1 = vld [vmem:[%s12289_s3 + $0xa0] sm:$0xff]   ;;  %v7538_v29 = vcombine.low %v11333_v2, %v11336_v44 }
 0x268   : > { %8495 = vmatprep.subr.bf16.mxu1 %v9457_v26 }
 0x26b   : > { %8496 = vmatpush3.bf16.msra.mxu1 %v9457_v26  ;;  %v11343_v26 = vld [vmem:[%s12290_s4] ss:$0 sm:$0xff] }
 0x26c   : > { %8497 = vmatprep.subr.bf16.mxu1 %v9458_v11 }
 0x26e   : > { %8466 = vmatmul.mubr.msk.bf16.gmra.mrb[20].mxu1 %vm1620_vm11, %v10463_v57  ;;  %v9462_v57 = vld [vmem:[%s12289_s3 + $0xb0] sm:$0xff]  }
 0x26f   : > { %8469 = vmatprep.mubr.msk.bf16.mxu1 %vm1620_vm11, %v10446_v55  ;;  %8498 = vmatpush3.bf16.msra.mxu1 %v9458_v11  ;;  %v12500_v55 = vld [vmem:[#allocation16_spill] sm:$0xff] }
 0x270   : > { %8499 = vmatprep.subr.bf16.mxu1 %v9459_v41 }
 0x273   : > { %8500 = vmatpush3.bf16.msra.mxu1 %v9459_v41 }
 0x274   : > { %8533 = vmatprep.subr.bf16.mxu1 %v9460_v1 }
 0x276   : > { %8470 = vmatmul.mubr.msk.bf16.gmra.mrb[24].mxu1 %vm1620_vm11, %v10544_v46  ;;  %v12501_v46 = vld [vmem:[#allocation17_spill] sm:$0xff] }
 0x277   : > { %8473 = vmatprep.mubr.msk.bf16.mxu1 %vm1620_vm11, %v10529_v51  ;;  %v9463_v51 = vld [vmem:[%s12289_s3 + $0xb8] sm:$0xff]  }
 0x27e   : > { %8474 = vmatmul.mubr.msk.bf16.gmra.mrb[28].mxu1 %vm1620_vm11, %v10630_v42  ;;  %v9464_v42 = vld [vmem:[%s12289_s3 + $0x100] sm:$0xff]  }
 0x27f   : > { %8477 = vmatprep.mubr.msk.bf16.mxu1 %vm1620_vm11, %v10608_v22  ;;  %v12502_v22 = vld [vmem:[#allocation18_spill] sm:$0xff] }
 0x286   : > { %8478 = vmatmul.mubr.msk.bf16.gmra.mrb[0].mxu1 %vm1620_vm11, %v10715_v32  ;;  %v12504_v32 = vld [vmem:[#allocation20_spill] sm:$0xff] }
 0x287   : > { %8481 = vmatprep.mubr.msk.bf16.mxu1 %vm1620_vm11, %v10699_v15  ;;  %v12503_v15 = vld [vmem:[#allocation19_spill] sm:$0xff] }
 0x28e   : > { %8482 = vmatmul.mubr.msk.bf16.gmra.mrb[4].mxu1 %vm1620_vm11, %v10809_v35  ;;  %v12506_v35 = vld [vmem:[#allocation22_spill] sm:$0xff] }
 0x28f   : > { %8485 = vmatprep.mubr.msk.bf16.mxu1 %vm1620_vm11, %v10793_v25  ;;  %v12505_v25 = vld [vmem:[#allocation21_spill] sm:$0xff] }
 0x296   : > { %8486 = vmatmul.mubr.msk.bf16.gmra.mrb[8].mxu1 %vm1620_vm11, %v10865_v28  ;;  %v12508_v28 = vld [vmem:[#allocation24_spill] sm:$0xff] }
 0x297   : > { %8489 = vmatprep.mubr.msk.bf16.mxu1 %vm1620_vm11, %v10857_v60  ;;  %v12507_v60 = vld [vmem:[#allocation23_spill] sm:$0xff] }
 0x29e   : > { %8490 = vmatmul.mubr.bf16.gmra.mrb[12].mxu1 %v12458_v50 }
 0x29f   : > { %8501 = vmatprep.mubr.bf16.mxu1 %v12458_v50 }
 0x2a6   : > { %8502 = vmatmul.mubr.msk.bf16.vlgmr.msra.gmra.mrb[16].mxu1 %vm1620_vm11, %v10412_v3 }
 0x2a7   : > { %8534 = vmatpush3.bf16.msra.mxu1 %v9460_v1  ;;  %8505 = vmatprep.mubr.msk.bf16.mxu1 %vm1620_vm11, %v12500_v55 }
 0x2a8   : > { %8535 = vmatprep.subr.bf16.mxu1 %v9461_v9 }
 0x2ab   : > { %8536 = vmatpush3.bf16.msra.mxu1 %v9461_v9 }
 0x2ac   : > { %8537 = vmatprep.subr.bf16.mxu1 %v9462_v57 }
 0x2ae   : > { %8506 = vmatmul.mubr.msk.bf16.gmra.mrb[20].mxu1 %vm1620_vm11, %v12501_v46 }
 0x2af   : > { %8509 = vmatprep.mubr.msk.bf16.mxu1 %vm1620_vm11, %v12502_v22  ;;  %8538 = vmatpush3.bf16.msra.mxu1 %v9462_v57 }
 0x2b0   : > { %8539 = vmatprep.subr.bf16.mxu1 %v9463_v51 }
 0x2b3   : > { %8540 = vmatpush3.bf16.msra.mxu1 %v9463_v51 }
 0x2b4   : > { %8573 = vmatprep.subr.bf16.mxu1 %v9464_v42 }
 0x2b6   : > { %8510 = vmatmul.mubr.msk.bf16.gmra.mrb[24].mxu1 %vm1620_vm11, %v12503_v15 }
 0x2b7   : > { %8513 = vmatprep.mubr.msk.bf16.mxu1 %vm1620_vm11, %v12504_v32 }
 0x2be   : > { %8514 = vmatmul.mubr.msk.bf16.gmra.mrb[28].mxu1 %vm1620_vm11, %v12505_v25 }
 0x2bf   : > { %8517 = vmatprep.mubr.msk.bf16.mxu1 %vm1620_vm11, %v12506_v35 }
 0x2c6   : > { %8518 = vmatmul.mubr.msk.bf16.gmra.mrb[0].mxu1 %vm1620_vm11, %v12507_v60 }
 0x2c7   : > { %8521 = vmatprep.mubr.msk.bf16.mxu1 %vm1620_vm11, %v10805_v34 }
 0x2ce   : > { %8522 = vmatmul.mubr.msk.bf16.gmra.mrb[4].mxu1 %vm1620_vm11, %v12508_v28 }
 0x2cf   : > { %8525 = vmatprep.mubr.msk.bf16.mxu1 %vm1620_vm11, %v10862_v54 }
 0x2d6   : > { %8526 = vmatmul.mubr.msk.bf16.gmra.mrb[8].mxu1 %vm1620_vm11, %v10879_v43 }
 0x2d7   : > { %8529 = vmatprep.mubr.msk.bf16.mxu1 %vm1620_vm11, %v10908_v30 }
 0x2de   : > { %8530 = vmatmul.mubr.msk.bf16.gmra.mrb[12].mxu1 %vm1620_vm11, %v10916_v6 }
 0x2df   : > { %8541 = vmatprep.mubr.msk.bf16.mxu1 %vm1620_vm11, %v10412_v3  ;;  %v9467_v3 = vld [vmem:[%s12289_s3 + $0x118] sm:$0xff]  }
 0x2e6   : > { %8542 = vmatmul.mubr.msk.bf16.vlgmr.msra.gmra.mrb[16].mxu1 %vm1620_vm11, %v12500_v55 }
 0x2e7   : > { %8574 = vmatpush3.bf16.msra.mxu1 %v9464_v42  ;;  %8545 = vmatprep.mubr.msk.bf16.mxu1 %vm1620_vm11, %v12501_v46 }
 0x2e8   : > { %8575 = vmatprep.subr.bf16.mxu1 %v9465_v13 }
 0x2eb   : > { %8576 = vmatpush3.bf16.msra.mxu1 %v9465_v13 }
 0x2ec   : > { %8577 = vmatprep.subr.bf16.mxu1 %v9466_v49 }
 0x2ee   : > { %8546 = vmatmul.mubr.msk.bf16.gmra.mrb[20].mxu1 %vm1620_vm11, %v12502_v22 }
 0x2ef   : > { %8549 = vmatprep.mubr.msk.bf16.mxu1 %vm1620_vm11, %v12503_v15  ;;  %8578 = vmatpush3.bf16.msra.mxu1 %v9466_v49 }
 0x2f0   : > { %8579 = vmatprep.subr.bf16.mxu1 %v9467_v3 }
 0x2f3   : > { %8580 = vmatpush3.bf16.msra.mxu1 %v9467_v3 }
 0x2f6   : > { %8550 = vmatmul.mubr.msk.bf16.gmra.mrb[24].mxu1 %vm1620_vm11, %v12504_v32 }
 0x2f7   : > { %8553 = vmatprep.mubr.msk.bf16.mxu1 %vm1620_vm11, %v12505_v25 }
 0x2fe   : > { %8554 = vmatmul.mubr.msk.bf16.gmra.mrb[28].mxu1 %vm1620_vm11, %v12506_v35 }
 0x2ff   : > { %8557 = vmatprep.mubr.msk.bf16.mxu1 %vm1620_vm11, %v12507_v60 }
 0x306   : > { %8558 = vmatmul.mubr.msk.bf16.gmra.mrb[0].mxu1 %vm1620_vm11, %v10805_v34 }
 0x307   : > { %8561 = vmatprep.mubr.msk.bf16.mxu1 %vm1620_vm11, %v12508_v28 }
 0x30e   : > { %8562 = vmatmul.mubr.msk.bf16.gmra.mrb[4].mxu1 %vm1620_vm11, %v10862_v54 }
 0x30f   : > { %8565 = vmatprep.mubr.msk.bf16.mxu1 %vm1620_vm11, %v10879_v43 }
 0x316   : > { %8566 = vmatmul.mubr.msk.bf16.gmra.mrb[8].mxu1 %vm1620_vm11, %v10908_v30 }
 0x317   : > { %8569 = vmatprep.mubr.msk.bf16.mxu1 %vm1620_vm11, %v10916_v6 }
 0x31e   : > { %8570 = vmatmul.mubr.msk.bf16.gmra.mrb[12].mxu1 %vm1620_vm11, %v10914_v20 }
 0x31f   : > { %8581 = vmatprep.mubr.msk.bf16.mxu1 %vm1620_vm11, %v12500_v55 }
 0x326   : > { %8582 = vmatmul.mubr.msk.bf16.vlgmr.msra.gmra.mrb[16].mxu1 %vm1620_vm11, %v12501_v46 }
 0x327   : > { %8585 = vmatprep.mubr.msk.bf16.mxu1 %vm1620_vm11, %v12502_v22 }
 0x32e   : > { %8586 = vmatmul.mubr.msk.bf16.gmra.mrb[20].mxu1 %vm1620_vm11, %v12503_v15 }
 0x32f   : > { %8589 = vmatprep.mubr.msk.bf16.mxu1 %vm1620_vm11, %v12504_v32 }
 0x336   : > { %8590 = vmatmul.mubr.msk.bf16.gmra.mrb[24].mxu1 %vm1620_vm11, %v12505_v25 }
 0x337   : > { %8593 = vmatprep.mubr.msk.bf16.mxu1 %vm1620_vm11, %v12506_v35 }
 0x33e   : > { %8594 = vmatmul.mubr.msk.bf16.gmra.mrb[28].mxu1 %vm1620_vm11, %v12507_v60 }
 0x33f   : > { %8597 = vmatprep.mubr.msk.bf16.mxu1 %vm1620_vm11, %v10805_v34  ;;  %v9468_v34 = vld [vmem:[%s12291_s5 + $0x60] sm:$0xff]  }
 0x340   : > { %8613 = vmatprep.subr.bf16.mxu0 %v9468_v34 }
 0x341   : > { %8614 = vmatpush3.bf16.msra.mxu0 %v9468_v34 }
 0x346   : > { %8598 = vmatmul.mubr.msk.bf16.gmra.mrb[0].mxu1 %vm1620_vm11, %v12508_v28 }
 0x347   : > { %8601 = vmatprep.mubr.msk.bf16.mxu1 %vm1620_vm11, %v10862_v54  ;;  %v9469_v54 = vld [vmem:[%s12291_s5 + $0x68] sm:$0xff]  }
 0x348   : > { %8615 = vmatprep.subr.bf16.mxu0 %v9469_v54 }
 0x349   : > { %8616 = vmatpush3.bf16.msra.mxu0 %v9469_v54 }
 0x34e   : > { %8602 = vmatmul.mubr.msk.bf16.gmra.mrb[4].mxu1 %vm1620_vm11, %v10879_v43  ;;  %v9470_v43 = vld [vmem:[%s12291_s5 + $0x70] sm:$0xff]  }
 0x34f   : > { %8605 = vmatprep.mubr.msk.bf16.mxu1 %vm1620_vm11, %v10908_v30  ;;  %8617 = vmatprep.subr.bf16.mxu0 %v9470_v43  ;;  %v9471_v30 = vld [vmem:[%s12291_s5 + $0x78] sm:$0xff]  }
 0x350   : > { %8618 = vmatpush3.bf16.msra.mxu0 %v9470_v43 }
 0x351   : > { %8619 = vmatprep.subr.bf16.mxu0 %v9471_v30 }
 0x354   : > { %8620 = vmatpush3.bf16.msra.mxu0 %v9471_v30 }
 0x355   : > { %8629 = vmatprep.subr.bf16.mxu0 %v11309_v31 }
 0x356   : > { %8606 = vmatmul.mubr.msk.bf16.gmra.mrb[8].mxu1 %vm1620_vm11, %v10916_v6  ;;  %v11299_v6 = vsel %vm5206_vm8, 65537, %v12458_v50 }
 0x357   : > { %8609 = vmatprep.mubr.msk.bf16.mxu1 %vm1620_vm11, %v10914_v20  ;;  %v12510_v20 = vld [vmem:[#allocation9_spill] sm:$0xff] }
 0x358   : > { %v4283_v8 = vand.u32 7, %v12510_v20 }
 0x35a   : > { %vm4377_vm3 = vcmp.eq.s32.totalorder %v4283_v8, 7  ;;  %vm11396_vm12 = vcmp.eq.s32.totalorder %v4283_v8, 0 }
 0x35b   : > { %vm5207_vm9 = vmpackc.low %vm4377_vm3, %vm4377_vm3  ;;  %vm4057_vm3 = vcmask 1046528  }
 0x35c   : > { %v11302_v56 = vsel %vm5207_vm9, 65537, %v12458_v50  ;;  %vm11390_vm9 = vcmp.eq.s32.totalorder %v4276_v47, 0  ;;  %vm4442_vm13 = vmpackc.low %vm11396_vm12, %vm11396_vm12  ;;  %vm11521_vm12 = vcmp.eq.s32.totalorder %v4311_v33, 0 }
 0x35d   : > { %v7535_v59 = vcombine.low %v11299_v6, %v11302_v56  ;;  %vm4441_vm15 = vmpackc.low %vm11390_vm9, %vm11390_vm9  ;;  %vm11511_vm9 = vcmp.eq.s32.totalorder %v4304_v24, 0  ;;  %v9475_v6 = vld [vmem:[%s12291_s5 + $0x18] sm:$0xff]  }
 0x35e   : > { %8610 = vmatmul.mubr.bf16.gmra.mrb[12].mxu1 %v12458_v50 }
 0x3f9   : > { %v8583_v11 = vpop.f32.mrb[16].mxu1 }
 0x3fa   : > { %v8981_v41 = vadd.f32 %v8583_v11, %v11028_v58  ;;  %v3796_v1 = vpop.f32.mrb[17].mxu1 }
 0x3fb   : > { %v8982_v9 = vadd.f32 %v3796_v1, %v11030_v18  ;;  %v8584_v55 = vpop.f32.mrb[18].mxu1 }
 0x3fc   : > { %v3963_v57 = vadd.f32 %v8981_v41, %v11343_v26  ;;  %v8983_v51 = vadd.f32 %v8584_v55, %v11032_v48  ;;  %v3799_v46 = vpop.f32.mrb[19].mxu1 }
 0x3fd   : > { %v3961_v22 = vadd.f32 %v8982_v9, %v11343_v26  ;;  %v8984_v42 = vadd.f32 %v3799_v46, %v11034_v52 }
 0x3fe   : > { %v3995_v15 = vmax.f32 %v3963_v57, 0.0  ;;  %v3964_v32 = vadd.f32 %v8983_v51, %v11343_v26 }
 0x3ff   : > { %v3993_v25 = vmax.f32 %v3961_v22, 0.0  ;;  %v3962_v35 = vadd.f32 %v8984_v42, %v11343_v26 }
 0x400   : > { %v3996_v58 = vmax.f32 %v3964_v32, 0.0  ;;  %v4061_v28 = vrot.slane %v3995_v15, 1 }
 0x401   : > { %v3994_v60 = vmax.f32 %v3962_v35, 0.0  ;;  %v8587_v18 = vpop.f32.mrb[20].mxu1  ;;  %v4058_v3 = vrot.slane %v3993_v25, 1 }
 0x402   : > { %v4063_v13 = vrot.slane %v3996_v58, 1  ;;  %v8985_v49 = vadd.f32 %v8587_v18, %v11040_v40  ;;  %v3812_v48 = vpop.f32.mrb[21].mxu1 }
 0x403   : > { %v4059_v34 = vrot.slane %v3994_v60, 1  ;;  %v8986_v54 = vadd.f32 %v3812_v48, %v11042_v23  ;;  %v8588_v52 = vpop.f32.mrb[22].mxu1 }
 0x404   : > { %v4064_v43 = vsel %vm4057_vm3, %v4061_v28, %v4063_v13  ;;  %v3967_v30 = vadd.f32 %v8985_v49, %v11343_v26  ;;  %v8987_v11 = vadd.f32 %v8588_v52, %v11044_v21  ;;  %v3815_v41 = vpop.f32.mrb[23].mxu1 }
 0x405   : > { %v4156_v1 = vmax.f32 %v3995_v15, %v4064_v43  ;;  %v4060_v9 = vsel %vm4057_vm3, %v4058_v3, %v4059_v34  ;;  %v4062_v55 = vsel %vm4057_vm3, %v4059_v34, %v4061_v28  ;;  %v3965_v40 = vadd.f32 %v8986_v54, %v11343_v26 }
 0x406   : > { %v4154_v57 = vmax.f32 %v3993_v25, %v4060_v9  ;;  %v4155_v51 = vmax.f32 %v3994_v60, %v4062_v55  ;;  %v3999_v46 = vmax.f32 %v3967_v30, 0.0  ;;  %v3968_v23 = vadd.f32 %v8987_v11, %v11343_v26  ;;  %v12515_v60 = vld [vmem:[#allocation12_spill] sm:$0xff] }
 0x407   : > { %v3997_v22 = vmax.f32 %v3965_v40, 0.0  ;;  %v8988_v42 = vadd.f32 %v3815_v41, %v11046_v5  ;;  %v4297_v3 = vand.u32 7, %v12515_v60 }
 0x408   : > { %v4186_v32 = vmax.f32 %v4154_v57, %v4156_v1  ;;  %v4000_v35 = vmax.f32 %v3968_v23, 0.0  ;;  %v4069_v49 = vrot.slane %v3999_v46, 1 }
 0x409   : > { %v4065_v18 = vrot.slane %v3997_v22, 1  ;;  %v3966_v21 = vadd.f32 %v8988_v42, %v11343_v26  ;;  %v8591_v15 = vpop.f32.mrb[24].mxu1  ;;  %vm11376_vm8 = vcmp.eq.s32.totalorder %v4297_v3, 7  ;;  %vm11449_vm2 = vcmp.eq.s32.totalorder %v4297_v3, 0 }
 0x40a   : > { %4218 = vst.msk [vmem:[#allocation2] sm:$0xff] %vm1620_vm11, %v4186_v32  ;;  %v4071_v28 = vrot.slane %v4000_v35, 1  ;;  %v8989_v48 = vadd.f32 %v8591_v15, %v11052_v53  ;;  %v3828_v25 = vpop.f32.mrb[25].mxu1  ;;  %vm5209_vm0 = vmpackc.low %vm11376_vm8, %vm11376_vm8 }
 0x40b   : > { %v4066_v34 = vsel %vm4057_vm3, %v4063_v13, %v4065_v18  ;;  %v3998_v54 = vmax.f32 %v3966_v21, 0.0  ;;  %v8990_v5 = vadd.f32 %v3828_v25, %v11054_v7  ;;  %v8592_v52 = vpop.f32.mrb[26].mxu1  ;;  %v4449_v13 = vsel %vm4441_vm15, 65537, %v12458_v50  ;;  %vm4444_vm5 = vmpackc.low %vm11449_vm2, %vm11449_vm2 }
 0x40c   : > { %v4072_v43 = vsel %vm4057_vm3, %v4069_v49, %v4071_v28  ;;  %v4157_v30 = vmax.f32 %v3996_v58, %v4066_v34  ;;  %v3971_v11 = vadd.f32 %v8989_v48, %v11343_v26  ;;  %v8991_v41 = vadd.f32 %v8592_v52, %v11056_v4  ;;  %v3831_v1 = vpop.f32.mrb[27].mxu1 }
 0x40d   : > { %v4160_v9 = vmax.f32 %v3999_v46, %v4072_v43  ;;  %v4067_v55 = vrot.slane %v3998_v54, 1  ;;  %v3969_v53 = vadd.f32 %v8990_v5, %v11343_v26  ;;  %v8992_v40 = vadd.f32 %v3831_v1, %v11058_v17 }
 0x40e   : > { %v4187_v7 = vmax.f32 %v4155_v51, %v4157_v30  ;;  %v4003_v57 = vmax.f32 %v3971_v11, 0.0  ;;  %v11381_v58 = vadd.f32 %v8991_v41, %v11343_v26  ;;  %v12522_v41 = vld [vmem:[#allocation8_spill] sm:$0xff] }
 0x40f   : > { %v4068_v4 = vsel %vm4057_vm3, %v4065_v18, %v4067_v55  ;;  %v4070_v46 = vsel %vm4057_vm3, %v4067_v55, %v4069_v49  ;;  %v4001_v23 = vmax.f32 %v3969_v53, 0.0  ;;  %v3970_v42 = vadd.f32 %v8992_v40, %v11343_v26 }
 0x410   : > { %v4158_v32 = vmax.f32 %v3997_v22, %v4068_v4  ;;  %v4159_v17 = vmax.f32 %v3998_v54, %v4070_v46  ;;  %4219 = vst.msk [vmem:[#allocation2 + $0x8] sm:$0xff] %vm1620_vm11, %v4187_v7  ;;  %v4004_v21 = vmax.f32 %v11381_v58, 0.0  ;;  %v4077_v15 = vrot.slane %v4003_v57, 1 }
 0x411   : > { %v4073_v48 = vrot.slane %v4001_v23, 1  ;;  %v4002_v18 = vmax.f32 %v3970_v42, 0.0  ;;  %v8595_v25 = vpop.f32.mrb[28].mxu1 }
 0x412   : > { %v4190_v22 = vmax.f32 %v4158_v32, %v4160_v9  ;;  %v4079_v34 = vrot.slane %v4004_v21, 1  ;;  %v3844_v54 = vpop.f32.mrb[29].mxu1  ;;  %v8993_v47 = vadd.f32 %v8595_v25, %v11064_v62 }
 0x413   : > { %v4074_v5 = vsel %vm4057_vm3, %v4071_v28, %v4073_v48  ;;  %v4075_v61 = vrot.slane %v4002_v18, 1  ;;  %v8994_v52 = vadd.f32 %v3844_v54, %v11066_v39  ;;  %v8596_v43 = vpop.f32.mrb[30].mxu1  ;;  %v4290_v28 = vand.u32 7, %v12522_v41 }
 0x414   : > { %4223 = vst.msk [vmem:[#allocation2 + $0x20] sm:$0xff] %vm1620_vm11, %v4190_v22  ;;  %v4080_v20 = vsel %vm4057_vm3, %v4077_v15, %v4079_v34  ;;  %v4161_v8 = vmax.f32 %v4000_v35, %v4074_v5  ;;  %v8995_v30 = vadd.f32 %v8596_v43, %v11068_v45  ;;  %v3847_v11 = vpop.f32.mrb[31].mxu1  ;;  %v3975_v9 = vadd.f32 %v8993_v47, %v11343_v26 }
 0x415   : > { %v4164_v1 = vmax.f32 %v4003_v57, %v4080_v20  ;;  %v4076_v62 = vsel %vm4057_vm3, %v4073_v48, %v4075_v61  ;;  %v4078_v39 = vsel %vm4057_vm3, %v4075_v61, %v4077_v15  ;;  %v3973_v35 = vadd.f32 %v8994_v52, %v11343_v26 }
 0x416   : > { %v4162_v55 = vmax.f32 %v4001_v23, %v4076_v62  ;;  %v4163_v53 = vmax.f32 %v4002_v18, %v4078_v39  ;;  %v4191_v40 = vmax.f32 %v4159_v17, %v4161_v8  ;;  %v11426_v45 = vsel %vm5209_vm0, 65537, %v12458_v50  ;;  %vm4445_vm0 = vmpackc.low %vm11511_vm9, %vm11511_vm9 }
 0x417   : > { %v4007_v7 = vmax.f32 %v3975_v9, 0.0  ;;  %v3976_v57 = vadd.f32 %v8995_v30, %v11343_v26  ;;  %v8996_v58 = vadd.f32 %v3847_v11, %v11070_v37  ;;  %v4005_v46 = vmax.f32 %v3973_v35, 0.0 }
 0x418   : > { %v4194_v4 = vmax.f32 %v4162_v55, %v4164_v1  ;;  %4224 = vst.msk [vmem:[#allocation2 + $0x28] sm:$0xff] %vm1620_vm11, %v4191_v40  ;;  %v4450_v17 = vsel %vm4442_vm13, 65537, %v12458_v50  ;;  %vm11443_vm1 = vcmp.eq.s32.totalorder %v4290_v28, 0  ;;  %vm11552_vm15 = vcmp.eq.s32.totalorder %v4290_v28, 7  ;;  %vm4446_vm13 = vmpackc.low %vm11521_vm12, %vm11521_vm12 }
 0x419   : > { %v4008_v23 = vmax.f32 %v3976_v57, 0.0  ;;  %v3974_v42 = vadd.f32 %v8996_v58, %v11343_v26  ;;  %v8599_v32 = vpop.f32.mrb[0].mxu1  ;;  %v4081_v37 = vrot.slane %v4005_v46, 1  ;;  %v4085_v25 = vrot.slane %v4007_v7, 1  ;;  %vm4443_vm7 = vmpackc.low %vm11443_vm1, %vm11443_vm1 }
 0x41a   : > { %4228 = vst.msk [vmem:[#allocation2 + $0x40] sm:$0xff] %vm1620_vm11, %v4194_v4  ;;  %v3979_v15 = vadd.f32 %v8599_v32, %v11343_v26  ;;  %v3860_v48 = vpop.f32.mrb[1].mxu1  ;;  %v7443_v20 = vcombine.low %v4449_v13, %v4450_v17  ;;  %v4257_v4 = vld [vmem:[#allocation2] ss:$2 sm:$0xff]  ;;  %vm5208_vm2 = vmpackc.low %vm11552_vm15, %vm11552_vm15  ;;  %vm11640_vm9 = vcmp.ne.s16.totalorder %v7535_v59, 0 }
 0x41b   : > { %v4087_v49 = vrot.slane %v4008_v23, 1  ;;  %v4006_v22 = vmax.f32 %v3974_v42, 0.0  ;;  %v3977_v54 = vadd.f32 %v11343_v26, %v3860_v48  ;;  %v8600_v5 = vpop.f32.mrb[2].mxu1  ;;  %v4082_v61 = vsel %vm4057_vm3, %v4079_v34, %v4081_v37 }
 0x41c   : > { %v4011_v47 = vmax.f32 %v3979_v15, 0.0  ;;  %v11456_v52 = vadd.f32 %v8600_v5, %v11343_v26  ;;  %v3863_v43 = vpop.f32.mrb[3].mxu1  ;;  %v4165_v8 = vmax.f32 %v4004_v21, %v4082_v61  ;;  %vm11491_vm8 = vcmp.ne.s16.totalorder %v7443_v20, 0 }
 0x41d   : > { %v4088_v60 = vsel %vm4057_vm3, %v4085_v25, %v4087_v49  ;;  %v4083_v3 = vrot.slane %v4006_v22, 1  ;;  %v4009_v30 = vmax.f32 %v3977_v54, 0.0  ;;  %v3978_v34 = vadd.f32 %v11343_v26, %v3863_v43  ;;  %v9559_v54 = vld [vmem:[%s12293_s7 + $0xb8] sm:$0xff]  }
 0x41e   : > { %v4168_v11 = vmax.f32 %v4007_v7, %v4088_v60  ;;  %v4093_v1 = vrot.slane %v4011_v47, 1  ;;  %v4012_v62 = vmax.f32 %v11456_v52, 0.0  ;;  %v4195_v21 = vmax.f32 %v4163_v53, %v4165_v8 }
 0x41f   : > { %v4084_v39 = vsel %vm4057_vm3, %v4081_v37, %v4083_v3  ;;  %v4086_v9 = vsel %vm4057_vm3, %v4083_v3, %v4085_v25  ;;  %v4089_v55 = vrot.slane %v4009_v30, 1  ;;  %v4259_v40 = vld [vmem:[#allocation2 + $0x20] ss:$2 sm:$0xff]  ;;  %v4010_v7 = vmax.f32 %v3978_v34, 0.0 }
 0x420   : > { %v4166_v35 = vmax.f32 %v4005_v46, %v4084_v39  ;;  %v4167_v57 = vmax.f32 %v4006_v22, %v4086_v9  ;;  %v4095_v58 = vrot.slane %v4012_v62, 1  ;;  %4229 = vst.msk [vmem:[#allocation2 + $0x48] sm:$0xff] %vm1620_vm11, %v4195_v21  ;;  %v11471_v13 = vpack.c.bf16 %v4259_v40, %v4257_v4 }
 0x421   : > { %v4090_v42 = vsel %vm4057_vm3, %v4087_v49, %v4089_v55  ;;  %v8603_v32 = vpop.f32.mrb[4].mxu1  ;;  %v11479_v53 = vsel %vm4443_vm7, 65537, %v12458_v50  ;;  %v11487_v46 = vsel %vm4444_vm5, 65537, %v12458_v50  ;;  %v4091_v25 = vrot.slane %v4010_v7, 1 }
 0x422   : > { %v4198_v17 = vmax.f32 %v4166_v35, %v4168_v11  ;;  %v4096_v37 = vsel %vm4057_vm3, %v4093_v1, %v4095_v58  ;;  %v3876_v15 = vpop.f32.mrb[5].mxu1  ;;  %v4169_v49 = vmax.f32 %v4008_v23, %v4090_v42  ;;  %v3983_v18 = vadd.f32 %v8603_v32, %v11343_v26 }
 0x423   : > { %v4172_v48 = vmax.f32 %v4011_v47, %v4096_v37  ;;  %v8604_v22 = vpop.f32.mrb[6].mxu1  ;;  %v3981_v51 = vadd.f32 %v11343_v26, %v3876_v15  ;;  %v4390_v52 = vshrl.u32 %v11471_v13, 16  ;;  %v4393_v47 = vshll.u32 %v11471_v13, 16 }
 0x424   : > { %4233 = vst.msk [vmem:[#allocation2 + $0x60] sm:$0xff] %vm1620_vm11, %v4198_v17  ;;  %v11498_v5 = vadd.f32 %v8604_v22, %v11343_v26  ;;  %v3879_v61 = vpop.f32.mrb[7].mxu1  ;;  %v4092_v23 = vsel %vm4057_vm3, %v4089_v55, %v4091_v25  ;;  %v4094_v43 = vsel %vm4057_vm3, %v4091_v25, %v4093_v1  ;;  %v4199_v20 = vmax.f32 %v4167_v57, %v4169_v49 }
 0x425   : > { %v4015_v60 = vmax.f32 %v3983_v18, 0.0  ;;  %v4170_v3 = vmax.f32 %v4009_v30, %v4092_v23  ;;  %v4171_v8 = vmax.f32 %v4010_v7, %v4094_v43  ;;  %v4013_v11 = vmax.f32 %v3981_v51, 0.0 }
 0x426   : > { %v4016_v34 = vmax.f32 %v11498_v5, 0.0  ;;  %4234 = vst.msk [vmem:[#allocation2 + $0x68] sm:$0xff] %vm1620_vm11, %v4199_v20  ;;  %v3982_v39 = vadd.f32 %v11343_v26, %v3879_v61  ;;  %v11507_v9 = vrot.slane %v4390_v52, 7  ;;  %v5174_v21 = vrot.slane %v4393_v47, 1 }
 0x427   : > { %v4202_v1 = vmax.f32 %v4170_v3, %v4172_v48  ;;  %v4097_v40 = vrot.slane %v4013_v11, 1  ;;  %v4101_v30 = vrot.slane %v4015_v60, 1  ;;  %vm11617_vm7 = vcmp.eq.s32.totalorder %v4318_v10, 0 }
 0x428   : > { %v4103_v35 = vrot.slane %v4016_v34, 1  ;;  %v4014_v57 = vmax.f32 %v3982_v39, 0.0  ;;  %v4395_v4 = vor.u32 %v4393_v47, %v11507_v9  ;;  %v11525_v24 = vor.u32 %v5174_v21, %v4390_v52  ;;  %v4261_v39 = vld [vmem:[#allocation2 + $0x40] ss:$2 sm:$0xff]  ;;  %vm4447_vm12 = vmpackc.low %vm11617_vm7, %vm11617_vm7 }
 0x429   : > { %v8607_v7 = vpop.f32.mrb[8].mxu1  ;;  %4238 = vst.msk [vmem:[#allocation2 + $0x80] sm:$0xff] %vm1620_vm11, %v4202_v1  ;;  %v4098_v42 = vsel %vm4057_vm3, %v4095_v58, %v4097_v40  ;;  %vm11629_vm5 = vcmp.eq.s32.totalorder %v4325_v27, 0  ;;  %vm11693_vm7 = vcmp.ne.s16.totalorder %v7537_v0, 0 }
 0x42a   : > { %v3987_v32 = vadd.f32 %v8607_v7, %v11343_v26  ;;  %v3892_v17 = vpop.f32.mrb[9].mxu1  ;;  %v4104_v37 = vsel %vm4057_vm3, %v4101_v30, %v4103_v35  ;;  %v4099_v15 = vrot.slane %v4014_v57, 1  ;;  %v4173_v48 = vmax.f32 %v4012_v62, %v4098_v42 }
 0x42b   : > { %v3985_v25 = vadd.f32 %v11343_v26, %v3892_v17  ;;  %v8608_v49 = vpop.f32.mrb[10].mxu1  ;;  %v4176_v18 = vmax.f32 %v4015_v60, %v4104_v37  ;;  %v4424_v51 = vsel %vm10358_vm6, 0, %v4395_v4  ;;  %v7444_v60 = vcombine.low %v11479_v53, %v11487_v46 }
 0x42c   : > { %v4019_v58 = vmax.f32 %v3987_v32, 0.0  ;;  %v11532_v63 = vadd.f32 %v8608_v49, %v11343_v26  ;;  %v3895_v33 = vpop.f32.mrb[11].mxu1  ;;  %v4100_v5 = vsel %vm4057_vm3, %v4097_v40, %v4099_v15  ;;  %v4102_v61 = vsel %vm4057_vm3, %v4099_v15, %v4101_v30 }
 0x42d   : > { %v4203_v52 = vmax.f32 %v4171_v8, %v4173_v48  ;;  %v4017_v47 = vmax.f32 %v3985_v25, 0.0  ;;  %v4174_v23 = vmax.f32 %v4013_v11, %v4100_v5  ;;  %v4175_v62 = vmax.f32 %v4014_v57, %v4102_v61  ;;  %v4263_v20 = vld [vmem:[#allocation2 + $0x60] ss:$2 sm:$0xff] }
 0x42e   : > { %v11538_v43 = vsel %vm11491_vm8, 0, %v4424_v51  ;;  %v4020_v8 = vmax.f32 %v11532_v63, 0.0  ;;  %v3986_v11 = vadd.f32 %v11343_v26, %v3895_v33  ;;  %v11559_v46 = vpack.c.bf16 %v4263_v20, %v4261_v39 }
 0x42f   : > { %4239 = vst.msk [vmem:[#allocation2 + $0x88] sm:$0xff] %vm1620_vm11, %v4203_v52  ;;  %v4105_v3 = vrot.slane %v4017_v47, 1  ;;  %8621 = vmatprep.mubr.msk.bf16.mxu0 %vm1620_vm11, %v11538_v43  ;;  %v4206_v53 = vmax.f32 %v4174_v23, %v4176_v18  ;;  %v4109_v1 = vrot.slane %v4019_v58, 1  ;;  %vm11564_vm1 = vcmp.ne.s16.totalorder %v7444_v60, 0 }
 0x430   : > { %v4111_v30 = vrot.slane %v4020_v8, 1  ;;  %v4018_v57 = vmax.f32 %v3986_v11, 0.0  ;;  %v11577_v32 = vsel %vm4446_vm13, 65537, %v12458_v50  ;;  %v4397_v15 = vshrl.u32 %v11559_v46, 16 }
 0x431   : > { %v4106_v40 = vsel %vm4057_vm3, %v4103_v35, %v4105_v3  ;;  %v8611_v7 = vpop.f32.mrb[12].mxu1  ;;  %4243 = vst.msk [vmem:[#allocation2 + $0xa0] sm:$0xff] %vm1620_vm11, %v4206_v53  ;;  %v11574_v35 = vsel %vm4445_vm0, 65537, %v12458_v50  ;;  %v4400_v20 = vshll.u32 %v11559_v46, 16  ;;  %vm4448_vm0 = vmpackc.low %vm11629_vm5, %vm11629_vm5 }
 0x432   : > { %v4177_v41 = vmax.f32 %v4016_v34, %v4106_v40  ;;  %v3991_v28 = vadd.f32 %v8611_v7, %v11343_v26  ;;  %v3908_v4 = vpop.f32.mrb[13].mxu1  ;;  %v4112_v34 = vsel %vm4057_vm3, %v4109_v1, %v4111_v30  ;;  %v4107_v17 = vrot.slane %v4018_v57, 1 }
 0x433   : > { %v3989_v14 = vadd.f32 %v11343_v26, %v3908_v4  ;;  %v8612_v37 = vpop.f32.mrb[14].mxu1  ;;  %v4180_v48 = vmax.f32 %v4019_v58, %v4112_v34  ;;  %v5176_v7 = vrot.slane %v4400_v20, 1 }
 0x434   : > { %v4207_v25 = vmax.f32 %v4175_v62, %v4177_v41  ;;  %v4023_v49 = vmax.f32 %v3991_v28, 0.0  ;;  %v3992_v18 = vadd.f32 %v8612_v37, %v11343_v26  ;;  %v3911_v55 = vpop.f32.mrb[15].mxu1  ;;  %v4108_v51 = vsel %vm4057_vm3, %v4105_v3, %v4107_v17 }
 0x435   : > { %v4110_v63 = vsel %vm4057_vm3, %v4107_v17, %v4109_v1  ;;  %v4021_v33 = vmax.f32 %v3989_v14, 0.0  ;;  %v3990_v5 = vadd.f32 %v11343_v26, %v3911_v55  ;;  %v4178_v61 = vmax.f32 %v4017_v47, %v4108_v51 }
 0x436   : > { %v4179_v52 = vmax.f32 %v4018_v57, %v4110_v63  ;;  %4244 = vst.msk [vmem:[#allocation2 + $0xa8] sm:$0xff] %vm1620_vm11, %v4207_v25  ;;  %v4024_v23 = vmax.f32 %v3992_v18, 0.0  ;;  %v4117_v58 = vrot.slane %v4023_v49, 1  ;;  %v4399_v3 = vrot.slane %v4397_v15, 7 }
 0x437   : > { %v4113_v62 = vrot.slane %v4021_v33, 1  ;;  %v4022_v60 = vmax.f32 %v3990_v5, 0.0  ;;  %v4210_v11 = vmax.f32 %v4178_v61, %v4180_v48  ;;  %v5216_v1 = vsel %vm5208_vm2, 65537, %v12458_v50  ;;  %v9473_v48 = vld [vmem:[%s12291_s5 + $0x8] sm:$0xff]   ;;  %v9474_v5 = vld [vmem:[%s12291_s5 + $0x10] sm:$0xff]  }
 0x438   : > { %v4119_v39 = vrot.slane %v4024_v23, 1  ;;  %v4402_v47 = vor.u32 %v4400_v20, %v4399_v3  ;;  %v4456_v20 = vsel %vm4448_vm0, 65537, %v12458_v50  ;;  %vm4481_vm2 = vcmask 1043456   ;;  %vm7614_vm0 = vmneg %vm11564_vm1 }
 0x439   : > { %v4114_v53 = vsel %vm4057_vm3, %v4111_v30, %v4113_v62  ;;  %v4115_v26 = vrot.slane %v4022_v60, 1  ;;  %4248 = vst.msk [vmem:[#allocation2 + $0xc0] sm:$0xff] %vm1620_vm11, %v4210_v11 }
 0x43a   : > { %v4120_v40 = vsel %vm4057_vm3, %v4117_v58, %v4119_v39  ;;  %v4153_v21 = vsel %vm4057_vm3, %v4119_v39, 0.0  ;;  %v4181_v57 = vmax.f32 %v4020_v8, %v4114_v53  ;;  %v4403_v37 = vsel %vm1224_vm14, %v11507_v9, %v4402_v47  ;;  %v4265_v9 = vld [vmem:[#allocation2 + $0x80] ss:$2 sm:$0xff] }
 0x43b   : > { %v4184_v41 = vmax.f32 %v4023_v49, %v4120_v40  ;;  %v4185_v28 = vmax.f32 %v4024_v23, %v4153_v21  ;;  %v4116_v4 = vsel %vm4057_vm3, %v4113_v62, %v4115_v26  ;;  %v4118_v34 = vsel %vm4057_vm3, %v4115_v26, %v4117_v58 }
 0x43c   : > { %v4182_v17 = vmax.f32 %v4021_v33, %v4116_v4  ;;  %v4183_v30 = vmax.f32 %v4022_v60, %v4118_v34  ;;  %v4211_v14 = vmax.f32 %v4179_v52, %v4181_v57  ;;  %v11605_v8 = vsel %vm11564_vm1, 0, %v4403_v37  ;;  %v9573_v4 = vld [vmem:[%s12293_s7 + $0x228] sm:$0xff]  }
 0x43d   : > { %v4267_v25 = vld [vmem:[#allocation2 + $0xa0] ss:$2 sm:$0xff]  ;;  %v5177_v49 = vsel %vm2954_vm10, %v11525_v24, %v5176_v7  ;;  %8622 = vmatmul.mubr.msk.bf16.vlgmr.msra.gmra.mrb[48].mxu0 %vm1620_vm11, %v11605_v8  ;;  %v5178_v33 = vor.u32 %v5176_v7, %v4397_v15  ;;  %v7536_v24 = vcombine.low %v5216_v1, %v11426_v45  ;;  %v7445_v45 = vcombine.low %v11574_v35, %v11577_v32  ;;  %v9571_v35 = vld [vmem:[%s12293_s7 + $0x218] sm:$0xff]  }
 0x43e   : > { %v4214_v18 = vmax.f32 %v4182_v17, %v4184_v41  ;;  %v4215_v55 = vmax.f32 %v4183_v30, %v4185_v28  ;;  %4249 = vst.msk [vmem:[#allocation2 + $0xc8] sm:$0xff] %vm1620_vm11, %v4211_v14  ;;  %v11612_v51 = vpack.c.bf16 %v4267_v25, %v4265_v9  ;;  %8630 = vmatpush3.bf16.msra.mxu0 %v11309_v31  ;;  %v11659_v56 = vsel %vm11640_vm9, 0, %v5177_v49  ;;  %v9480_v31 = vld [vmem:[%s12291_s5 + $0x20] sm:$0xff]   ;;  %v9565_v15 = vld [vmem:[%s12293_s7 + $0x168] sm:$0xff]  }
 0x43f   : > { %8631 = vmatprep.subr.bf16.mxu0 %v9473_v48  ;;  %vm11650_vm15 = vcmp.ne.s16.totalorder %v7536_v24, 0  ;;  %vm11661_vm13 = vcmp.ne.s16.totalorder %v7445_v45, 0  ;;  %v4455_v23 = vsel %vm4447_vm12, 65537, %v12458_v50  ;;  %v5246_v39 = vrot.slane %v11659_v56, 4  ;;  %v9476_v50 = vld [vmem:[%s12291_s5 + $0xc0] sm:$0xff]   ;;  %v9479_v24 = vld [vmem:[%s12291_s5 + $0xd8] sm:$0xff]  }
 0x440   : > { %4253 = vst.msk [vmem:[#allocation2 + $0xe0] sm:$0xff] %vm1620_vm11, %v4214_v18  ;;  %4254 = vst.msk [vmem:[#allocation2 + $0xe8] sm:$0xff] %vm1620_vm11, %v4215_v55  ;;  %v4405_v38 = vshrl.u32 %v11612_v51, 16  ;;  %v4408_v10 = vshll.u32 %v11612_v51, 16  ;;  %vm11704_vm12 = vcmp.ne.s16.totalorder %v7538_v29, 0  ;;  %v4482_v34 = vrot.slane %v11538_v43, 4 }
 0x441   : > { %v4483_v49 = vrot.slane %v11605_v8, 4  ;;  %v9477_v55 = vld [vmem:[%s12291_s5 + $0xc8] sm:$0xff]   ;;  %v4824_v45 = vrot.slane %v11471_v13, 4  ;;  %v9572_v41 = vld [vmem:[%s12293_s7 + $0x220] sm:$0xff]  }
 0x442   : > { %v4407_v19 = vrot.slane %v4405_v38, 7  ;;  %v5179_v27 = vrot.slane %v4408_v10, 1  ;;  %8632 = vmatpush3.bf16.msra.mxu0 %v9473_v48  ;;  %v4491_v43 = vsel %vm4481_vm2, 0, %v4482_v34 }
 0x443   : > { %8633 = vmatprep.subr.bf16.mxu0 %v9474_v5  ;;  %v4484_v9 = vsel %vm4481_vm2, %v4482_v34, %v4483_v49  ;;  %v9496_v34 = vld [vmem:[%s12291_s5 + $0xa0] sm:$0xff]  }
 0x444   : > { %v4410_v59 = vor.u32 %v4408_v10, %v4407_v19  ;;  %v5180_v61 = vsel %vm2954_vm10, %v5178_v33, %v5179_v27  ;;  %v5181_v52 = vor.u32 %v5179_v27, %v4405_v38  ;;  %v9478_v33 = vld [vmem:[%s12291_s5 + $0xd0] sm:$0xff]   ;;  %v9481_v38 = vld [vmem:[%s12291_s5 + $0x28] sm:$0xff]  }
 0x445   : > { %v11670_v58 = vsel %vm11650_vm15, 0, %v5180_v61  ;;  %v4269_v60 = vld [vmem:[#allocation2 + $0xc0] ss:$2 sm:$0xff]  ;;  %v9482_v10 = vld [vmem:[%s12291_s5 + $0x30] sm:$0xff]   ;;  %v4825_v61 = vrot.slane %v11559_v46, 4 }
 0x446   : > { %v4411_v62 = vsel %vm1224_vm14, %v4399_v3, %v4410_v59  ;;  %8634 = vmatpush3.bf16.msra.mxu0 %v9474_v5  ;;  %v5247_v53 = vrot.slane %v11670_v58, 4  ;;  %v7446_v3 = vcombine.low %v4455_v23, %v4456_v20  ;;  %v9484_v59 = vld [vmem:[%s12291_s5 + $0x80] sm:$0xff]   ;;  %v9485_v23 = vld [vmem:[%s12291_s5 + $0x88] sm:$0xff]  }
 0x447   : > { %v4271_v11 = vld [vmem:[#allocation2 + $0xe0] ss:$2 sm:$0xff]  ;;  %v4475_v26 = vsel %vm11661_vm13, 0, %v4411_v62  ;;  %8635 = vmatprep.subr.bf16.mxu0 %v9475_v6  ;;  %v4826_v20 = vsel %vm4481_vm2, %v4824_v45, %v4825_v61 }
 0x448   : > { %v11677_v47 = vpack.c.bf16 %v4271_v11, %v4269_v60  ;;  %8625 = vmatprep.mubr.msk.bf16.mxu0 %vm1620_vm11, %v4475_v26  ;;  %v11686_v1 = vsel %vm4481_vm2, %v5246_v39, %v5247_v53  ;;  %vm11697_vm5 = vcmp.ne.s16.totalorder %v7446_v3, 0  ;;  %v4485_v18 = vrot.slane %v4475_v26, 4  ;;  %v9486_v60 = vld [vmem:[%s12291_s5 + $0x90] sm:$0xff]   ;;  %v9489_v3 = vld [vmem:[%s12291_s5 + $0xe8] sm:$0xff]  }
 0x44a   : > { %v4413_v40 = vshrl.u32 %v11677_v47, 16  ;;  %v4416_v21 = vshll.u32 %v11677_v47, 16  ;;  %8636 = vmatpush3.bf16.msra.mxu0 %v9475_v6  ;;  %v4486_v63 = vsel %vm4481_vm2, %v4483_v49, %v4485_v18  ;;  %v4832_v6 = vsel %vm4481_vm2, 0, %v4824_v45  ;;  %v7587_v49 = vld [vmem:[%s12292_s6] ss:$0 sm:$0xff] }
 0x44b   : > { %8645 = vmatprep.subr.bf16.mxu0 %v9476_v50  ;;  %v4829_v11 = vrot.slane %v11677_v47, 4 }
 0x44c   : > { %v4415_v57 = vrot.slane %v4413_v40, 7  ;;  %v5182_v7 = vrot.slane %v4416_v21, 1 }
 0x44e   : > { %v4418_v17 = vor.u32 %v4416_v21, %v4415_v57  ;;  %v5183_v12 = vsel %vm2954_vm10, %v5181_v52, %v5182_v7  ;;  %v5184_v36 = vor.u32 %v5182_v7, %v4413_v40  ;;  %v4827_v52 = vrot.slane %v11612_v51, 4  ;;  %v9491_v40 = vld [vmem:[%s12291_s5 + $0xf8] sm:$0xff]  }
 0x44f   : > { %v11712_v0 = vsel %vm11693_vm7, 0, %v5183_v12  ;;  %v9495_v21 = vld [vmem:[%s12291_s5 + $0x58] sm:$0xff]   ;;  %v5065_v57 = vsel %vm4481_vm2, %v4829_v11, 0  ;;  %v5254_v7 = vsel %vm4481_vm2, 0, %v5246_v39  ;;  %v9498_v39 = vld [vmem:[%s12291_s5 + $0xb0] sm:$0xff]  }
 0x450   : > { %v4419_v30 = vsel %vm1224_vm14, %v4407_v19, %v4418_v17  ;;  %v5249_v14 = vrot.slane %v11712_v0, 4  ;;  %v5189_v2 = vsel %vm10899_vm4, %v5184_v36, 0  ;;  %v9483_v19 = vld [vmem:[%s12291_s5 + $0x38] sm:$0xff]   ;;  %v4828_v62 = vsel %vm4481_vm2, %v4825_v61, %v4827_v52  ;;  %v9497_v17 = vld [vmem:[%s12291_s5 + $0xa8] sm:$0xff]   ;;  %v9500_v36 = vld [vmem:[%s12291_s5 + $0x100] sm:$0xff]  }
 0x451   : > { %v4476_v44 = vsel %vm11697_vm5, 0, %v4419_v30  ;;  %v11722_v29 = vsel %vm11704_vm12, 0, %v5189_v2  ;;  %v4830_v26 = vsel %vm4481_vm2, %v4827_v52, %v4829_v11  ;;  %v9499_v12 = vld [vmem:[%s12291_s5 + $0xb8] sm:$0xff]   ;;  %v9501_v30 = vld [vmem:[%s12291_s5 + $0x108] sm:$0xff]  }
 0x452   : > { %8626 = vmatmul.mubr.msk.bf16.gmra.mrb[52].mxu0 %vm1620_vm11, %v4476_v44  ;;  %v11727_v37 = vsel %vm4481_vm2, %v5247_v53, %v5249_v14  ;;  %v5251_v48 = vrot.slane %v11722_v29, 4  ;;  %v4487_v8 = vrot.slane %v4476_v44, 4  ;;  %v9487_v53 = vld [vmem:[%s12291_s5 + $0x98] sm:$0xff]  }
 0x453   : > { %8637 = vmatprep.mubr.msk.bf16.mxu0 %vm1620_vm11, %v4491_v43  ;;  %v9507_v2 = vld [vmem:[%s12293_s7 + $0xd8] sm:$0xff]   ;;  %v9508_v43 = vld [vmem:[%s12293_s7 + $0xe0] sm:$0xff]  }
 0x454   : > { %v11734_v25 = vsel %vm4481_vm2, %v5249_v14, %v5251_v48  ;;  %v4488_v5 = vsel %vm4481_vm2, %v4485_v18, %v4487_v8  ;;  %v4711_v27 = vsel %vm4481_vm2, %v4487_v8, 0  ;;  %v9503_v14 = vld [vmem:[%s12291_s5 + $0x118] sm:$0xff]   ;;  %v5491_v44 = vsel %vm4481_vm2, %v5251_v48, 0 }
 0x455   : > { %v9511_v48 = vld [vmem:[%s12293_s7 + $0xf8] sm:$0xff]  }
 0x45a   : > { %8638 = vmatmul.mubr.msk.bf16.vlgmr.msra.gmra.mrb[48].mxu0 %vm1620_vm11, %v4484_v9 }
 0x45b   : > { %8646 = vmatpush3.bf16.msra.mxu0 %v9476_v50  ;;  %8641 = vmatprep.mubr.msk.bf16.mxu0 %vm1620_vm11, %v4486_v63  ;;  %v9488_v50 = vld [vmem:[%s12291_s5 + $0xe0] sm:$0xff]  }
 0x45c   : > { %8647 = vmatprep.subr.bf16.mxu0 %v9477_v55 }
 0x45f   : > { %8648 = vmatpush3.bf16.msra.mxu0 %v9477_v55 }
 0x460   : > { %8649 = vmatprep.subr.bf16.mxu0 %v9478_v33 }
 0x462   : > { %8642 = vmatmul.mubr.msk.bf16.gmra.mrb[52].mxu0 %vm1620_vm11, %v4488_v5 }
 0x463   : > { %8650 = vmatpush3.bf16.msra.mxu0 %v9478_v33  ;;  %8653 = vmatprep.mubr.msk.bf16.mxu0 %vm1620_vm11, %v4484_v9 }
 0x464   : > { %8651 = vmatprep.subr.bf16.mxu0 %v9479_v24 }
 0x467   : > { %8652 = vmatpush3.bf16.msra.mxu0 %v9479_v24 }
 0x468   : > { %8661 = vmatprep.subr.bf16.mxu0 %v9480_v31 }
 0x46a   : > { %8654 = vmatmul.mubr.msk.bf16.vlgmr.msra.gmra.mrb[48].mxu0 %vm1620_vm11, %v4486_v63 }
 0x46b   : > { %8662 = vmatpush3.bf16.msra.mxu0 %v9480_v31  ;;  %8657 = vmatprep.mubr.msk.bf16.mxu0 %vm1620_vm11, %v4488_v5 }
 0x46c   : > { %8663 = vmatprep.subr.bf16.mxu0 %v9481_v38 }
 0x46f   : > { %8664 = vmatpush3.bf16.msra.mxu0 %v9481_v38 }
 0x470   : > { %8665 = vmatprep.subr.bf16.mxu0 %v9482_v10 }
 0x472   : > { %8658 = vmatmul.mubr.msk.bf16.gmra.mrb[52].mxu0 %vm1620_vm11, %v4711_v27 }
 0x473   : > { %8666 = vmatpush3.bf16.msra.mxu0 %v9482_v10  ;;  %8669 = vmatprep.mubr.msk.bf16.mxu0 %vm1620_vm11, %v4832_v6 }
 0x474   : > { %8667 = vmatprep.subr.bf16.mxu0 %v9483_v19 }
 0x477   : > { %8668 = vmatpush3.bf16.msra.mxu0 %v9483_v19 }
 0x478   : > { %8677 = vmatprep.subr.bf16.mxu0 %v9484_v59 }
 0x47a   : > { %8670 = vmatmul.mubr.msk.bf16.vlgmr.msra.gmra.mrb[48].mxu0 %vm1620_vm11, %v4826_v20 }
 0x47b   : > { %8678 = vmatpush3.bf16.msra.mxu0 %v9484_v59  ;;  %8673 = vmatprep.mubr.msk.bf16.mxu0 %vm1620_vm11, %v4828_v62 }
 0x47c   : > { %8679 = vmatprep.subr.bf16.mxu0 %v9485_v23 }
 0x47f   : > { %8680 = vmatpush3.bf16.msra.mxu0 %v9485_v23 }
 0x480   : > { %8681 = vmatprep.subr.bf16.mxu0 %v9486_v60 }
 0x482   : > { %8674 = vmatmul.mubr.msk.bf16.gmra.mrb[52].mxu0 %vm1620_vm11, %v4830_v26 }
 0x483   : > { %8682 = vmatpush3.bf16.msra.mxu0 %v9486_v60  ;;  %8685 = vmatprep.mubr.msk.bf16.mxu0 %vm1620_vm11, %v11471_v13  ;;  %v9490_v13 = vld [vmem:[%s12291_s5 + $0xf0] sm:$0xff]  }
 0x484   : > { %8683 = vmatprep.subr.bf16.mxu0 %v9487_v53 }
 0x487   : > { %8684 = vmatpush3.bf16.msra.mxu0 %v9487_v53 }
 0x488   : > { %8693 = vmatprep.subr.bf16.mxu0 %v9488_v50 }
 0x48a   : > { %8686 = vmatmul.mubr.msk.bf16.vlgmr.msra.gmra.mrb[48].mxu0 %vm1620_vm11, %v11559_v46  ;;  %v9492_v46 = vld [vmem:[%s12291_s5 + $0x40] sm:$0xff]  }
 0x48b   : > { %8694 = vmatpush3.bf16.msra.mxu0 %v9488_v50  ;;  %8689 = vmatprep.mubr.msk.bf16.mxu0 %vm1620_vm11, %v11612_v51  ;;  %v9493_v51 = vld [vmem:[%s12291_s5 + $0x48] sm:$0xff]  }
 0x48c   : > { %8695 = vmatprep.subr.bf16.mxu0 %v9489_v3 }
 0x48f   : > { %8696 = vmatpush3.bf16.msra.mxu0 %v9489_v3 }
 0x490   : > { %8697 = vmatprep.subr.bf16.mxu0 %v9490_v13 }
 0x492   : > { %8690 = vmatmul.mubr.msk.bf16.gmra.mrb[52].mxu0 %vm1620_vm11, %v11677_v47  ;;  %v9494_v47 = vld [vmem:[%s12291_s5 + $0x50] sm:$0xff]  }
 0x493   : > { %8698 = vmatpush3.bf16.msra.mxu0 %v9490_v13  ;;  %8701 = vmatprep.mubr.msk.bf16.mxu0 %vm1620_vm11, %v4826_v20 }
 0x494   : > { %8699 = vmatprep.subr.bf16.mxu0 %v9491_v40 }
 0x497   : > { %8700 = vmatpush3.bf16.msra.mxu0 %v9491_v40 }
 0x498   : > { %8709 = vmatprep.subr.bf16.mxu0 %v9492_v46 }
 0x49a   : > { %8702 = vmatmul.mubr.msk.bf16.vlgmr.msra.gmra.mrb[48].mxu0 %vm1620_vm11, %v4828_v62 }
 0x49b   : > { %8710 = vmatpush3.bf16.msra.mxu0 %v9492_v46  ;;  %8705 = vmatprep.mubr.msk.bf16.mxu0 %vm1620_vm11, %v4830_v26 }
 0x49c   : > { %8711 = vmatprep.subr.bf16.mxu0 %v9493_v51 }
 0x49f   : > { %8712 = vmatpush3.bf16.msra.mxu0 %v9493_v51 }
 0x4a0   : > { %8713 = vmatprep.subr.bf16.mxu0 %v9494_v47 }
 0x4a2   : > { %8706 = vmatmul.mubr.msk.bf16.gmra.mrb[52].mxu0 %vm1620_vm11, %v5065_v57 }
 0x4a3   : > { %8714 = vmatpush3.bf16.msra.mxu0 %v9494_v47  ;;  %8717 = vmatprep.mubr.msk.bf16.mxu0 %vm1620_vm11, %v5254_v7 }
 0x4a4   : > { %8715 = vmatprep.subr.bf16.mxu0 %v9495_v21 }
 0x4a7   : > { %8716 = vmatpush3.bf16.msra.mxu0 %v9495_v21 }
 0x4a8   : > { %8725 = vmatprep.subr.bf16.mxu0 %v9496_v34 }
 0x4aa   : > { %8718 = vmatmul.mubr.msk.bf16.vlgmr.msra.gmra.mrb[48].mxu0 %vm1620_vm11, %v11686_v1 }
 0x4ab   : > { %8726 = vmatpush3.bf16.msra.mxu0 %v9496_v34  ;;  %8721 = vmatprep.mubr.msk.bf16.mxu0 %vm1620_vm11, %v11727_v37 }
 0x4ac   : > { %8727 = vmatprep.subr.bf16.mxu0 %v9497_v17 }
 0x4af   : > { %8728 = vmatpush3.bf16.msra.mxu0 %v9497_v17 }
 0x4b0   : > { %8729 = vmatprep.subr.bf16.mxu0 %v9498_v39 }
 0x4b2   : > { %8722 = vmatmul.mubr.msk.bf16.gmra.mrb[52].mxu0 %vm1620_vm11, %v11734_v25 }
 0x4b3   : > { %8730 = vmatpush3.bf16.msra.mxu0 %v9498_v39  ;;  %8733 = vmatprep.mubr.msk.bf16.mxu0 %vm1620_vm11, %v11659_v56  ;;  %v9502_v56 = vld [vmem:[%s12291_s5 + $0x110] sm:$0xff]  }
 0x4b4   : > { %8731 = vmatprep.subr.bf16.mxu0 %v9499_v12 }
 0x4b7   : > { %8732 = vmatpush3.bf16.msra.mxu0 %v9499_v12 }
 0x4b8   : > { %8741 = vmatprep.subr.bf16.mxu0 %v9500_v36 }
 0x4ba   : > { %8734 = vmatmul.mubr.msk.bf16.vlgmr.msra.gmra.mrb[48].mxu0 %vm1620_vm11, %v11670_v58  ;;  %v9504_v58 = vld [vmem:[%s12293_s7 + $0xc0] sm:$0xff]  }
 0x4bb   : > { %8742 = vmatpush3.bf16.msra.mxu0 %v9500_v36  ;;  %8737 = vmatprep.mubr.msk.bf16.mxu0 %vm1620_vm11, %v11712_v0  ;;  %v9505_v0 = vld [vmem:[%s12293_s7 + $0xc8] sm:$0xff]  }
 0x4bc   : > { %8743 = vmatprep.subr.bf16.mxu0 %v9501_v30 }
 0x4bf   : > { %8744 = vmatpush3.bf16.msra.mxu0 %v9501_v30 }
 0x4c0   : > { %8745 = vmatprep.subr.bf16.mxu0 %v9502_v56 }
 0x4c2   : > { %8738 = vmatmul.mubr.msk.bf16.gmra.mrb[52].mxu0 %vm1620_vm11, %v11722_v29  ;;  %v9510_v29 = vld [vmem:[%s12293_s7 + $0xf0] sm:$0xff]  }
 0x4c3   : > { %8746 = vmatpush3.bf16.msra.mxu0 %v9502_v56  ;;  %8749 = vmatprep.mubr.msk.bf16.mxu0 %vm1620_vm11, %v11686_v1  ;;  %v9506_v1 = vld [vmem:[%s12293_s7 + $0xd0] sm:$0xff]   ;;  %v9513_v56 = vld [vmem:[%s12293_s7 + $0x8] sm:$0xff]  }
 0x4c4   : > { %8747 = vmatprep.subr.bf16.mxu0 %v9503_v14 }
 0x4c7   : > { %8748 = vmatpush3.bf16.msra.mxu0 %v9503_v14 }
 0x4c8   : > { %8757 = vmatprep.subr.bf16.mxu0 %v9504_v58 }
 0x4ca   : > { %8750 = vmatmul.mubr.msk.bf16.vlgmr.msra.gmra.mrb[48].mxu0 %vm1620_vm11, %v11727_v37  ;;  %v9509_v37 = vld [vmem:[%s12293_s7 + $0xe8] sm:$0xff]  }
 0x4cb   : > { %8753 = vmatprep.mubr.msk.bf16.mxu0 %vm1620_vm11, %v11734_v25  ;;  %8758 = vmatpush3.bf16.msra.mxu0 %v9504_v58  ;;  %v9512_v25 = vld [vmem:[%s12293_s7] sm:$0xff]  }
 0x4cc   : > { %8759 = vmatprep.subr.bf16.mxu0 %v9505_v0 }
 0x4cf   : > { %8760 = vmatpush3.bf16.msra.mxu0 %v9505_v0 }
 0x4d0   : > { %8761 = vmatprep.subr.bf16.mxu0 %v9506_v1 }
 0x4d2   : > { %8754 = vmatmul.mubr.msk.bf16.gmra.mrb[52].mxu0 %vm1620_vm11, %v5491_v44  ;;  %vm7612_vm11 = vmneg %vm11491_vm8 }
 0x4d3   : > { %8762 = vmatpush3.bf16.msra.mxu0 %v9506_v1 }
 0x4d4   : > { %8763 = vmatprep.subr.bf16.mxu0 %v9507_v2 }
 0x4d7   : > { %8764 = vmatpush3.bf16.msra.mxu0 %v9507_v2 }
 0x4d8   : > { %8765 = vmatprep.subr.bf16.mxu0 %v9508_v43 }
 0x4db   : > { %8766 = vmatpush3.bf16.msra.mxu0 %v9508_v43 }
 0x4dc   : > { %8767 = vmatprep.subr.bf16.mxu0 %v9509_v37 }
 0x4df   : > { %8768 = vmatpush3.bf16.msra.mxu0 %v9509_v37 }
 0x4e0   : > { %8769 = vmatprep.subr.bf16.mxu0 %v9510_v29 }
 0x4e3   : > { %8770 = vmatpush3.bf16.msra.mxu0 %v9510_v29 }
 0x4e4   : > { %8771 = vmatprep.subr.bf16.mxu0 %v9511_v48 }
 0x4e7   : > { %8772 = vmatpush3.bf16.msra.mxu0 %v9511_v48  ;;  %v9514_v48 = vld [vmem:[%s12293_s7 + $0x10] sm:$0xff]  }
 0x4e8   : > { %8781 = vmatprep.subr.bf16.mxu0 %v9512_v25 }
 0x59d   : > { %v8751_v18 = vpop.f32.mrb[48].mxu0 }
 0x59e   : > { %v5608_v55 = vadd.f32 %v8751_v18, %v7587_v49  ;;  %v5561_v9 = vpop.f32.mrb[49].mxu0 }
 0x59f   : > { %v5606_v63 = vadd.f32 %v7587_v49, %v5561_v9  ;;  %v8752_v33 = vpop.f32.mrb[50].mxu0 }
 0x5a0   : > { %v5609_v8 = vadd.f32 %v8752_v33, %v7587_v49  ;;  %v5564_v24 = vpop.f32.mrb[51].mxu0  ;;  %v5616_v31 = vmax.f32 %v5608_v55, 0.0 }
 0x5a1   : > { %v5607_v5 = vadd.f32 %v7587_v49, %v5564_v24  ;;  %v5614_v10 = vmax.f32 %v5606_v63, 0.0 }
 0x5a2   : > { %v5617_v38 = vmax.f32 %v5609_v8, 0.0 }
 0x5a3   : > { %v5615_v45 = vmax.f32 %v5607_v5, 0.0  ;;  %v9515_v5 = vld [vmem:[%s12293_s7 + $0x18] sm:$0xff]  }
 0x5a4   : > { %v11912_v19 = vpack.c.bf16 %v5617_v38, %v5616_v31 }
 0x5a5   : > { %v11914_v27 = vpack.c.bf16 %v5615_v45, %v5614_v10  ;;  %v8755_v6 = vpop.f32.mrb[52].mxu0 }
 0x5a6   : > { %v5635_v59 = vshrl.u32 %v11912_v19, 16  ;;  %v5638_v61 = vshll.u32 %v11912_v19, 16  ;;  %v5612_v52 = vadd.f32 %v8755_v6, %v7587_v49  ;;  %v5577_v23 = vpop.f32.mrb[53].mxu0 }
 0x5a7   : > { %v5610_v20 = vadd.f32 %v7587_v49, %v5577_v23  ;;  %v8756_v62 = vpop.f32.mrb[54].mxu0  ;;  %v5628_v60 = vshrl.u32 %v11914_v27, 16  ;;  %v5631_v11 = vshll.u32 %v11914_v27, 16  ;;  %v9516_v23 = vld [vmem:[%s12293_s7 + $0x20] sm:$0xff]  }
 0x5a8   : > { %v5637_v53 = vrot.slane %v5635_v59, 7  ;;  %v6520_v26 = vrot.slane %v5638_v61, 1  ;;  %v5613_v50 = vadd.f32 %v8756_v62, %v7587_v49  ;;  %v5580_v3 = vpop.f32.mrb[55].mxu0  ;;  %v5620_v47 = vmax.f32 %v5612_v52, 0.0  ;;  %v9517_v62 = vld [vmem:[%s12293_s7 + $0x28] sm:$0xff]  }
 0x5a9   : > { %v5611_v13 = vadd.f32 %v7587_v49, %v5580_v3  ;;  %v5630_v40 = vrot.slane %v5628_v60, 7  ;;  %v6518_v46 = vrot.slane %v5631_v11, 1  ;;  %v5618_v7 = vmax.f32 %v5610_v20, 0.0 }
 0x5aa   : > { %v6522_v51 = vor.u32 %v6520_v26, %v5635_v59  ;;  %v5621_v21 = vmax.f32 %v5613_v50, 0.0  ;;  %v5640_v57 = vor.u32 %v5638_v61, %v5637_v53  ;;  %v9520_v50 = vld [vmem:[%s12293_s7 + $0x180] sm:$0xff]  }
 0x5ab   : > { %v5619_v34 = vmax.f32 %v5611_v13, 0.0  ;;  %v5633_v17 = vor.u32 %v5631_v11, %v5630_v40  ;;  %v6519_v39 = vor.u32 %v6518_v46, %v5628_v60  ;;  %v9518_v60 = vld [vmem:[%s12293_s7 + $0x30] sm:$0xff]   ;;  %v9519_v11 = vld [vmem:[%s12293_s7 + $0x38] sm:$0xff]  }
 0x5ac   : > { %v11922_v12 = vpack.c.bf16 %v5621_v21, %v5620_v47  ;;  %v5641_v0 = vsel %vm1224_vm14, %v5630_v40, %v5640_v57  ;;  %v9521_v40 = vld [vmem:[%s12293_s7 + $0x188] sm:$0xff]   ;;  %v9523_v21 = vld [vmem:[%s12293_s7 + $0x198] sm:$0xff]   ;;  %v9524_v57 = vld [vmem:[%s12293_s7 + $0x1a0] sm:$0xff]  }
 0x5ad   : > { %v11926_v36 = vpack.c.bf16 %v5619_v34, %v5618_v7  ;;  %v5662_v30 = vsel %vm10358_vm6, 0, %v5633_v17  ;;  %v11934_v14 = vsel %vm2954_vm10, %v6519_v39, %v6520_v26  ;;  %vm7616_vm6 = vmneg %vm11661_vm13  ;;  %v9525_v7 = vld [vmem:[%s12293_s7 + $0x1a8] sm:$0xff]   ;;  %v9526_v34 = vld [vmem:[%s12293_s7 + $0x1b0] sm:$0xff]  }
 0x5ae   : > { %v5651_v58 = vshrl.u32 %v11922_v12, 16  ;;  %8773 = vmatprep.mubr.msk.bf16.mxu0 %vm7612_vm11, %v5662_v30  ;;  %v5654_v1 = vshll.u32 %v11922_v12, 16  ;;  %v6534_v18 = vsel %vm11640_vm9, 0, %v11934_v14  ;;  %v5663_v9 = vsel %vm11491_vm8, 0, %v5662_v30  ;;  %vm7618_vm11 = vmneg %vm11697_vm5  ;;  %v9527_v17 = vld [vmem:[%s12293_s7 + $0x1b8] sm:$0xff]   ;;  %v9528_v39 = vld [vmem:[%s12293_s7 + $0x40] sm:$0xff]  }
 0x5af   : > { %v5643_v2 = vshrl.u32 %v11926_v36, 16  ;;  %8774 = vmatmul.mubr.msk.bf16.vlgmr.msra.gmra.mrb[56].mxu0 %vm7614_vm0, %v5641_v0  ;;  %v5646_v22 = vshll.u32 %v11926_v36, 16  ;;  %vm11963_vm8 = vmneg %vm4481_vm2  ;;  %v11970_v31 = vrot.slane %v6534_v18, 4  ;;  %v5671_v45 = vrot.slane %v5663_v9, 4  ;;  %v9529_v30 = vld [vmem:[%s12293_s7 + $0x48] sm:$0xff]   ;;  %v9538_v9 = vld [vmem:[%s12293_s7 + $0x110] sm:$0xff]  }
 0x5b0   : > { %8782 = vmatpush3.bf16.msra.mxu0 %v9512_v25  ;;  %v5653_v44 = vrot.slane %v5651_v58, 7  ;;  %v6526_v43 = vrot.slane %v5654_v1, 1 }
 0x5b1   : > { %8783 = vmatprep.subr.bf16.mxu0 %v9513_v56  ;;  %v5645_v37 = vrot.slane %v5643_v2, 7  ;;  %v6523_v29 = vrot.slane %v5646_v22, 1 }
 0x5b2   : > { %v5656_v49 = vor.u32 %v5654_v1, %v5653_v44  ;;  %v11947_v55 = vor.u32 %v6526_v43, %v5651_v58  ;;  %v9531_v58 = vld [vmem:[%s12293_s7 + $0x58] sm:$0xff]   ;;  %v9532_v1 = vld [vmem:[%s12293_s7 + $0x60] sm:$0xff]  }
 0x5b3   : > { %v5648_v25 = vor.u32 %v5646_v22, %v5645_v37  ;;  %v11954_v63 = vsel %vm2954_vm10, %v6522_v51, %v6523_v29  ;;  %v6525_v33 = vor.u32 %v6523_v29, %v5643_v2  ;;  %v9522_v51 = vld [vmem:[%s12293_s7 + $0x190] sm:$0xff]   ;;  %v9533_v2 = vld [vmem:[%s12293_s7 + $0x68] sm:$0xff]   ;;  %v9535_v44 = vld [vmem:[%s12293_s7 + $0x78] sm:$0xff]   ;;  %v6091_v29 = vrot.slane %v11926_v36, 4 }
 0x5b4   : > { %8784 = vmatpush3.bf16.msra.mxu0 %v9513_v56  ;;  %v6535_v8 = vsel %vm11650_vm15, 0, %v11954_v63  ;;  %v5657_v6 = vsel %vm1224_vm14, %v5645_v37, %v5656_v49  ;;  %v9530_v56 = vld [vmem:[%s12293_s7 + $0x50] sm:$0xff]   ;;  %v6089_v37 = vrot.slane %v11912_v19, 4 }
 0x5b5   : > { %v5649_v24 = vsel %vm1224_vm14, %v5637_v53, %v5648_v25  ;;  %8785 = vmatprep.subr.bf16.mxu0 %v9514_v48  ;;  %v6543_v38 = vrot.slane %v6535_v8, 4  ;;  %v11973_v10 = vsel %vm2954_vm10, %v6525_v33, %v6526_v43  ;;  %v5664_v53 = vsel %vm11564_vm1, 0, %v5641_v0  ;;  %v9534_v22 = vld [vmem:[%s12293_s7 + $0x70] sm:$0xff]   ;;  %v9536_v43 = vld [vmem:[%s12293_s7 + $0x100] sm:$0xff]   ;;  %v9539_v33 = vld [vmem:[%s12293_s7 + $0x118] sm:$0xff]  }
 0x5b6   : > { %8777 = vmatprep.mubr.msk.bf16.mxu0 %vm7616_vm6, %v5649_v24  ;;  %v6536_v59 = vsel %vm11693_vm7, 0, %v11973_v10  ;;  %v5665_v26 = vsel %vm11661_vm13, 0, %v5649_v24  ;;  %v5672_v3 = vrot.slane %v5664_v53, 4  ;;  %v5666_v32 = vsel %vm11697_vm5, 0, %v5657_v6  ;;  %v9540_v24 = vld [vmem:[%s12293_s7 + $0x120] sm:$0xff]   ;;  %v9554_v53 = vld [vmem:[%s12293_s7 + $0x90] sm:$0xff]   ;;  %vm7780_vm14 = vmneg %vm11640_vm9 }
 0x5b7   : > { %8778 = vmatmul.mubr.msk.bf16.gmra.mrb[60].mxu0 %vm7618_vm11, %v5657_v6  ;;  %v11981_v61 = vsel %vm4481_vm2, %v11970_v31, %v6543_v38  ;;  %v11983_v52 = vrot.slane %v6536_v59, 4  ;;  %v5674_v13 = vrot.slane %v5665_v26, 4  ;;  %v5676_v47 = vrot.slane %v5666_v32, 4  ;;  %v9545_v6 = vld [vmem:[%s12293_s7 + $0x1c8] sm:$0xff]   ;;  %v9546_v59 = vld [vmem:[%s12293_s7 + $0x1d0] sm:$0xff]   ;;  %v9555_v26 = vld [vmem:[%s12293_s7 + $0x98] sm:$0xff]  }
 0x5b8   : > { %8786 = vmatpush3.bf16.msra.mxu0 %v9514_v48  ;;  %8797 = vmatprep.mubr.msk.bf16.mxu0 %vm11963_vm8, %v5671_v45  ;;  %v5673_v42 = vsel %vm4481_vm2, %v5671_v45, %v5672_v3  ;;  %v6088_v0 = vrot.slane %v11914_v27, 4  ;;  %v9537_v48 = vld [vmem:[%s12293_s7 + $0x108] sm:$0xff]   ;;  %v6092_v18 = vsel %vm4481_vm2, %v6089_v37, %v6091_v29  ;;  %v6093_v25 = vrot.slane %v11922_v12, 4  ;;  %v9544_v45 = vld [vmem:[%s12293_s7 + $0x1c0] sm:$0xff]   ;;  %vm7782_vm10 = vmneg %vm11650_vm15 }
 0x5b9   : > { %8787 = vmatprep.subr.bf16.mxu0 %v9515_v5  ;;  %v11992_v20 = vsel %vm4481_vm2, %v6543_v38, %v11983_v52  ;;  %v5675_v46 = vsel %vm4481_vm2, %v5672_v3, %v5674_v13  ;;  %v5677_v28 = vsel %vm4481_vm2, %v5674_v13, %v5676_v47  ;;  %v9542_v38 = vld [vmem:[%s12293_s7 + $0x130] sm:$0xff]   ;;  %v9557_v3 = vld [vmem:[%s12293_s7 + $0xa8] sm:$0xff]   ;;  %vm7786_vm1 = vmneg %vm11704_vm12 }
 0x5ba   : > { %v6090_v49 = vsel %vm4481_vm2, %v6088_v0, %v6089_v37  ;;  %v6094_v8 = vsel %vm4481_vm2, %v6091_v29, %v6093_v25  ;;  %v9558_v13 = vld [vmem:[%s12293_s7 + $0xb0] sm:$0xff]  }
 0x5bc   : > { %8788 = vmatpush3.bf16.msra.mxu0 %v9515_v5  ;;  %v9541_v5 = vld [vmem:[%s12293_s7 + $0x128] sm:$0xff]  }
 0x5bd   : > { %8789 = vmatprep.subr.bf16.mxu0 %v9516_v23 }
 0x5c0   : > { %8790 = vmatpush3.bf16.msra.mxu0 %v9516_v23  ;;  %v9547_v23 = vld [vmem:[%s12293_s7 + $0x1d8] sm:$0xff]  }
 0x5c1   : > { %8791 = vmatprep.subr.bf16.mxu0 %v9517_v62 }
 0x5c4   : > { %8792 = vmatpush3.bf16.msra.mxu0 %v9517_v62  ;;  %v9550_v62 = vld [vmem:[%s12293_s7 + $0x1f0] sm:$0xff]  }
 0x5c5   : > { %8793 = vmatprep.subr.bf16.mxu0 %v9518_v60 }
 0x5c8   : > { %8794 = vmatpush3.bf16.msra.mxu0 %v9518_v60  ;;  %v9552_v60 = vld [vmem:[%s12293_s7 + $0x80] sm:$0xff]  }
 0x5c9   : > { %8795 = vmatprep.subr.bf16.mxu0 %v9519_v11 }
 0x5cc   : > { %8796 = vmatpush3.bf16.msra.mxu0 %v9519_v11  ;;  %v9553_v11 = vld [vmem:[%s12293_s7 + $0x88] sm:$0xff]  }
 0x5cd   : > { %8805 = vmatprep.subr.bf16.mxu0 %v9520_v50 }
 0x5cf   : > { %8798 = vmatmul.mubr.bf16.vlgmr.msra.gmra.mrb[56].mxu0 %v5673_v42 }
 0x5d0   : > { %8801 = vmatprep.mubr.bf16.mxu0 %v5675_v46  ;;  %8806 = vmatpush3.bf16.msra.mxu0 %v9520_v50  ;;  %v9556_v50 = vld [vmem:[%s12293_s7 + $0xa0] sm:$0xff]  }
 0x5d1   : > { %8807 = vmatprep.subr.bf16.mxu0 %v9521_v40 }
 0x5d4   : > { %8808 = vmatpush3.bf16.msra.mxu0 %v9521_v40  ;;  %v6533_v40 = vsel %vm10899_vm4, %v11947_v55, 0  ;;  %v9563_v55 = vld [vmem:[%s12293_s7 + $0x158] sm:$0xff]   ;;  %vm7784_vm4 = vmneg %vm11693_vm7 }
 0x5d5   : > { %8809 = vmatprep.subr.bf16.mxu0 %v9522_v51  ;;  %v6537_v32 = vsel %vm11704_vm12, 0, %v6533_v40 }
 0x5d6   : > { %v6547_v16 = vrot.slane %v6537_v32, 4 }
 0x5d7   : > { %8802 = vmatmul.mubr.bf16.gmra.mrb[60].mxu0 %v5677_v28 }
 0x5d8   : > { %8810 = vmatpush3.bf16.msra.mxu0 %v9522_v51  ;;  %8821 = vmatprep.mubr.bf16.mxu0 %v5673_v42  ;;  %v9561_v42 = vld [vmem:[%s12293_s7 + $0x148] sm:$0xff]   ;;  %v6548_v51 = vsel %vm4481_vm2, %v11983_v52, %v6547_v16  ;;  %v9566_v52 = vld [vmem:[%s12293_s7 + $0x170] sm:$0xff]  }
 0x5d9   : > { %8811 = vmatprep.subr.bf16.mxu0 %v9523_v21 }
 0x5dc   : > { %8812 = vmatpush3.bf16.msra.mxu0 %v9523_v21  ;;  %v9568_v21 = vld [vmem:[%s12293_s7 + $0x200] sm:$0xff]  }
 0x5dd   : > { %8813 = vmatprep.subr.bf16.mxu0 %v9524_v57 }
 0x5e0   : > { %8814 = vmatpush3.bf16.msra.mxu0 %v9524_v57  ;;  %v9570_v57 = vld [vmem:[%s12293_s7 + $0x210] sm:$0xff]  }
 0x5e1   : > { %8815 = vmatprep.subr.bf16.mxu0 %v9525_v7 }
 0x5e4   : > { %8816 = vmatpush3.bf16.msra.mxu0 %v9525_v7 }
 0x5e5   : > { %8817 = vmatprep.subr.bf16.mxu0 %v9526_v34 }
 0x5e8   : > { %8818 = vmatpush3.bf16.msra.mxu0 %v9526_v34 }
 0x5e9   : > { %8819 = vmatprep.subr.bf16.mxu0 %v9527_v17 }
 0x5ec   : > { %8820 = vmatpush3.bf16.msra.mxu0 %v9527_v17 }
 0x5ed   : > { %8829 = vmatprep.subr.bf16.mxu0 %v9528_v39 }
 0x5ef   : > { %8822 = vmatmul.mubr.bf16.vlgmr.msra.gmra.mrb[56].mxu0 %v5675_v46  ;;  %v9562_v46 = vld [vmem:[%s12293_s7 + $0x150] sm:$0xff]  }
 0x5f0   : > { %8825 = vmatprep.mubr.bf16.mxu0 %v5677_v28  ;;  %8830 = vmatpush3.bf16.msra.mxu0 %v9528_v39  ;;  %v9569_v28 = vld [vmem:[%s12293_s7 + $0x208] sm:$0xff]  }
 0x5f1   : > { %8831 = vmatprep.subr.bf16.mxu0 %v9529_v30 }
 0x5f4   : > { %8832 = vmatpush3.bf16.msra.mxu0 %v9529_v30 }
 0x5f5   : > { %8833 = vmatprep.subr.bf16.mxu0 %v9530_v56 }
 0x5f7   : > { %8826 = vmatmul.mubr.msk.bf16.gmra.mrb[60].mxu0 %vm4481_vm2, %v5676_v47  ;;  %v9564_v47 = vld [vmem:[%s12293_s7 + $0x160] sm:$0xff]  }
 0x5f8   : > { %8834 = vmatpush3.bf16.msra.mxu0 %v9530_v56  ;;  %8845 = vmatprep.mubr.msk.bf16.mxu0 %vm11963_vm8, %v6088_v0 }
 0x5f9   : > { %8835 = vmatprep.subr.bf16.mxu0 %v9531_v58 }
 0x5fc   : > { %8836 = vmatpush3.bf16.msra.mxu0 %v9531_v58 }
 0x5fd   : > { %8837 = vmatprep.subr.bf16.mxu0 %v9532_v1 }
 0x600   : > { %8838 = vmatpush3.bf16.msra.mxu0 %v9532_v1 }
 0x601   : > { %8839 = vmatprep.subr.bf16.mxu0 %v9533_v2 }
 0x604   : > { %8840 = vmatpush3.bf16.msra.mxu0 %v9533_v2 }
 0x605   : > { %8841 = vmatprep.subr.bf16.mxu0 %v9534_v22 }
 0x608   : > { %8842 = vmatpush3.bf16.msra.mxu0 %v9534_v22 }
 0x609   : > { %8843 = vmatprep.subr.bf16.mxu0 %v9535_v44 }
 0x60c   : > { %8844 = vmatpush3.bf16.msra.mxu0 %v9535_v44 }
 0x60d   : > { %8853 = vmatprep.subr.bf16.mxu0 %v9536_v43 }
 0x60f   : > { %8846 = vmatmul.mubr.bf16.vlgmr.msra.gmra.mrb[56].mxu0 %v6090_v49 }
 0x610   : > { %8849 = vmatprep.mubr.bf16.mxu0 %v6092_v18  ;;  %8854 = vmatpush3.bf16.msra.mxu0 %v9536_v43 }
 0x611   : > { %8855 = vmatprep.subr.bf16.mxu0 %v9537_v48 }
 0x614   : > { %8856 = vmatpush3.bf16.msra.mxu0 %v9537_v48 }
 0x615   : > { %8857 = vmatprep.subr.bf16.mxu0 %v9538_v9 }
 0x617   : > { %8850 = vmatmul.mubr.bf16.gmra.mrb[60].mxu0 %v6094_v8 }
 0x618   : > { %8858 = vmatpush3.bf16.msra.mxu0 %v9538_v9  ;;  %8869 = vmatprep.mubr.bf16.mxu0 %v11914_v27  ;;  %v9543_v27 = vld [vmem:[%s12293_s7 + $0x138] sm:$0xff]  }
 0x619   : > { %8859 = vmatprep.subr.bf16.mxu0 %v9539_v33 }
 0x61c   : > { %8860 = vmatpush3.bf16.msra.mxu0 %v9539_v33 }
 0x61d   : > { %8861 = vmatprep.subr.bf16.mxu0 %v9540_v24 }
 0x620   : > { %8862 = vmatpush3.bf16.msra.mxu0 %v9540_v24 }
 0x621   : > { %8863 = vmatprep.subr.bf16.mxu0 %v9541_v5 }
 0x624   : > { %8864 = vmatpush3.bf16.msra.mxu0 %v9541_v5 }
 0x625   : > { %8865 = vmatprep.subr.bf16.mxu0 %v9542_v38 }
 0x628   : > { %8866 = vmatpush3.bf16.msra.mxu0 %v9542_v38 }
 0x629   : > { %8867 = vmatprep.subr.bf16.mxu0 %v9543_v27 }
 0x62c   : > { %8868 = vmatpush3.bf16.msra.mxu0 %v9543_v27 }
 0x62d   : > { %8877 = vmatprep.subr.bf16.mxu0 %v9544_v45 }
 0x62f   : > { %8870 = vmatmul.mubr.bf16.vlgmr.msra.gmra.mrb[56].mxu0 %v11912_v19  ;;  %v9548_v19 = vld [vmem:[%s12293_s7 + $0x1e0] sm:$0xff]  }
 0x630   : > { %8873 = vmatprep.mubr.bf16.mxu0 %v11926_v36  ;;  %8878 = vmatpush3.bf16.msra.mxu0 %v9544_v45  ;;  %v9549_v36 = vld [vmem:[%s12293_s7 + $0x1e8] sm:$0xff]  }
 0x631   : > { %8879 = vmatprep.subr.bf16.mxu0 %v9545_v6 }
 0x634   : > { %8880 = vmatpush3.bf16.msra.mxu0 %v9545_v6 }
 0x635   : > { %8881 = vmatprep.subr.bf16.mxu0 %v9546_v59 }
 0x637   : > { %8874 = vmatmul.mubr.bf16.gmra.mrb[60].mxu0 %v11922_v12  ;;  %v9551_v12 = vld [vmem:[%s12293_s7 + $0x1f8] sm:$0xff]  }
 0x638   : > { %8882 = vmatpush3.bf16.msra.mxu0 %v9546_v59  ;;  %8893 = vmatprep.mubr.bf16.mxu0 %v6090_v49 }
 0x639   : > { %8883 = vmatprep.subr.bf16.mxu0 %v9547_v23 }
 0x63c   : > { %8884 = vmatpush3.bf16.msra.mxu0 %v9547_v23 }
 0x63d   : > { %8885 = vmatprep.subr.bf16.mxu0 %v9548_v19 }
 0x640   : > { %8886 = vmatpush3.bf16.msra.mxu0 %v9548_v19 }
 0x641   : > { %8887 = vmatprep.subr.bf16.mxu0 %v9549_v36 }
 0x644   : > { %8888 = vmatpush3.bf16.msra.mxu0 %v9549_v36 }
 0x645   : > { %8889 = vmatprep.subr.bf16.mxu0 %v9550_v62 }
 0x648   : > { %8890 = vmatpush3.bf16.msra.mxu0 %v9550_v62 }
 0x649   : > { %8891 = vmatprep.subr.bf16.mxu0 %v9551_v12 }
 0x64c   : > { %8892 = vmatpush3.bf16.msra.mxu0 %v9551_v12 }
 0x64d   : > { %8901 = vmatprep.subr.bf16.mxu0 %v9552_v60 }
 0x64f   : > { %8894 = vmatmul.mubr.bf16.vlgmr.msra.gmra.mrb[56].mxu0 %v6092_v18 }
 0x650   : > { %8897 = vmatprep.mubr.bf16.mxu0 %v6094_v8  ;;  %8902 = vmatpush3.bf16.msra.mxu0 %v9552_v60 }
 0x651   : > { %8903 = vmatprep.subr.bf16.mxu0 %v9553_v11 }
 0x654   : > { %8904 = vmatpush3.bf16.msra.mxu0 %v9553_v11 }
 0x655   : > { %8905 = vmatprep.subr.bf16.mxu0 %v9554_v53 }
 0x657   : > { %8898 = vmatmul.mubr.msk.bf16.gmra.mrb[60].mxu0 %vm4481_vm2, %v6093_v25 }
 0x658   : > { %8906 = vmatpush3.bf16.msra.mxu0 %v9554_v53  ;;  %8917 = vmatprep.mubr.msk.bf16.mxu0 %vm11963_vm8, %v11970_v31  ;;  %v9560_v31 = vld [vmem:[%s12293_s7 + $0x140] sm:$0xff]  }
 0x659   : > { %8907 = vmatprep.subr.bf16.mxu0 %v9555_v26 }
 0x65c   : > { %8908 = vmatpush3.bf16.msra.mxu0 %v9555_v26 }
 0x65d   : > { %8909 = vmatprep.subr.bf16.mxu0 %v9556_v50 }
 0x660   : > { %8910 = vmatpush3.bf16.msra.mxu0 %v9556_v50 }
 0x661   : > { %8911 = vmatprep.subr.bf16.mxu0 %v9557_v3 }
 0x664   : > { %8912 = vmatpush3.bf16.msra.mxu0 %v9557_v3 }
 0x665   : > { %8913 = vmatprep.subr.bf16.mxu0 %v9558_v13 }
 0x668   : > { %8914 = vmatpush3.bf16.msra.mxu0 %v9558_v13 }
 0x669   : > { %8915 = vmatprep.subr.bf16.mxu0 %v9559_v54 }
 0x66c   : > { %8916 = vmatpush3.bf16.msra.mxu0 %v9559_v54 }
 0x66d   : > { %8925 = vmatprep.subr.bf16.mxu0 %v9560_v31 }
 0x66f   : > { %8918 = vmatmul.mubr.bf16.vlgmr.msra.gmra.mrb[56].mxu0 %v11981_v61 }
 0x670   : > { %8921 = vmatprep.mubr.bf16.mxu0 %v11992_v20  ;;  %8926 = vmatpush3.bf16.msra.mxu0 %v9560_v31 }
 0x671   : > { %8927 = vmatprep.subr.bf16.mxu0 %v9561_v42 }
 0x674   : > { %8928 = vmatpush3.bf16.msra.mxu0 %v9561_v42 }
 0x675   : > { %8929 = vmatprep.subr.bf16.mxu0 %v9562_v46 }
 0x677   : > { %8922 = vmatmul.mubr.bf16.gmra.mrb[60].mxu0 %v6548_v51 }
 0x678   : > { %8930 = vmatpush3.bf16.msra.mxu0 %v9562_v46  ;;  %8941 = vmatprep.mubr.msk.bf16.mxu0 %vm7780_vm14, %v11934_v14  ;;  %v9567_v14 = vld [vmem:[%s12293_s7 + $0x178] sm:$0xff]  }
 0x679   : > { %8931 = vmatprep.subr.bf16.mxu0 %v9563_v55 }
 0x67c   : > { %8932 = vmatpush3.bf16.msra.mxu0 %v9563_v55 }
 0x67d   : > { %8933 = vmatprep.subr.bf16.mxu0 %v9564_v47 }
 0x680   : > { %8934 = vmatpush3.bf16.msra.mxu0 %v9564_v47 }
 0x681   : > { %8935 = vmatprep.subr.bf16.mxu0 %v9565_v15 }
 0x684   : > { %8936 = vmatpush3.bf16.msra.mxu0 %v9565_v15 }
 0x685   : > { %8937 = vmatprep.subr.bf16.mxu0 %v9566_v52 }
 0x688   : > { %8938 = vmatpush3.bf16.msra.mxu0 %v9566_v52 }
 0x689   : > { %8939 = vmatprep.subr.bf16.mxu0 %v9567_v14 }
 0x68c   : > { %8940 = vmatpush3.bf16.msra.mxu0 %v9567_v14 }
 0x68d   : > { %8949 = vmatprep.subr.bf16.mxu0 %v9568_v21 }
 0x68f   : > { %8942 = vmatmul.mubr.msk.bf16.vlgmr.msra.gmra.mrb[56].mxu0 %vm7782_vm10, %v11954_v63  ;;  %v9574_v63 = vld [vmem:[%s12293_s7 + $0x230] sm:$0xff]  }
 0x690   : > { %8945 = vmatprep.mubr.msk.bf16.mxu0 %vm7784_vm4, %v11973_v10  ;;  %8950 = vmatpush3.bf16.msra.mxu0 %v9568_v21  ;;  %v9575_v10 = vld [vmem:[%s12293_s7 + $0x238] sm:$0xff]  }
 0x691   : > { %8951 = vmatprep.subr.bf16.mxu0 %v9569_v28 }
 0x694   : > { %8952 = vmatpush3.bf16.msra.mxu0 %v9569_v28 }
 0x695   : > { %8953 = vmatprep.subr.bf16.mxu0 %v9570_v57 }
 0x697   : > { %8946 = vmatmul.mubr.msk.bf16.gmra.mrb[60].mxu0 %vm7786_vm1, %v6533_v40 }
 0x698   : > { %8954 = vmatpush3.bf16.msra.mxu0 %v9570_v57  ;;  %8965 = vmatprep.mubr.bf16.mxu0 %v11981_v61  ;;  %v7813_v61 = vld [vmem:[%s12294_s8] ss:$0 sm:$0xff] }
 0x699   : > { %8955 = vmatprep.subr.bf16.mxu0 %v9571_v35 }
 0x69c   : > { %8956 = vmatpush3.bf16.msra.mxu0 %v9571_v35 }
 0x69d   : > { %8957 = vmatprep.subr.bf16.mxu0 %v9572_v41 }
 0x6a0   : > { %8958 = vmatpush3.bf16.msra.mxu0 %v9572_v41 }
 0x6a1   : > { %8959 = vmatprep.subr.bf16.mxu0 %v9573_v4 }
 0x6a4   : > { %8960 = vmatpush3.bf16.msra.mxu0 %v9573_v4 }
 0x6a5   : > { %8961 = vmatprep.subr.bf16.mxu0 %v9574_v63 }
 0x6a8   : > { %8962 = vmatpush3.bf16.msra.mxu0 %v9574_v63 }
 0x6a9   : > { %8963 = vmatprep.subr.bf16.mxu0 %v9575_v10 }
 0x6ac   : > { %8964 = vmatpush3.bf16.msra.mxu0 %v9575_v10 }
 0x6af   : > { %8966 = vmatmul.mubr.bf16.vlgmr.msra.gmra.mrb[56].mxu0 %v11992_v20 }
 0x6b0   : > { %8969 = vmatprep.mubr.bf16.mxu0 %v6548_v51 }
 0x6b7   : > { %8970 = vmatmul.mubr.msk.bf16.gmra.mrb[60].mxu0 %vm4481_vm2, %v6547_v16 }
 0x782   : > { %v8967_v7 = vpop.f32.mrb[56].mxu0 }
 0x783   : > { %v6980_v34 = vadd.f32 %v8967_v7, %v7813_v61  ;;  %v6933_v17 = vpop.f32.mrb[57].mxu0 }
 0x784   : > { %v6978_v39 = vadd.f32 %v7813_v61, %v6933_v17  ;;  %v8968_v30 = vpop.f32.mrb[58].mxu0 }
 0x785   : > { %v6988_v56 = vmax.f32 %v6980_v34, 0.0  ;;  %v6981_v58 = vadd.f32 %v8968_v30, %v7813_v61  ;;  %v6936_v0 = vpop.f32.mrb[59].mxu0 }
 0x786   : > { %v6986_v1 = vmax.f32 %v6978_v39, 0.0  ;;  %v6979_v2 = vadd.f32 %v7813_v61, %v6936_v0 }
 0x787   : > { %v6989_v22 = vmax.f32 %v6981_v58, 0.0  ;;  %v7005_v20 = vrot.slane %v6988_v56, 1 }
 0x788   : > { %v6987_v44 = vmax.f32 %v6979_v2, 0.0  ;;  %v7002_v37 = vrot.slane %v6986_v1, 1 }
 0x789   : > { %v7007_v43 = vrot.slane %v6989_v22, 1 }
 0x78a   : > { %v7003_v29 = vrot.slane %v6987_v44, 1  ;;  %v8971_v48 = vpop.f32.mrb[60].mxu0 }
 0x78b   : > { %v7008_v49 = vsel %vm4057_vm3, %v7005_v20, %v7007_v43  ;;  %v6984_v18 = vadd.f32 %v8971_v48, %v7813_v61  ;;  %v6949_v9 = vpop.f32.mrb[61].mxu0 }
 0x78c   : > { %v7004_v25 = vsel %vm4057_vm3, %v7002_v37, %v7003_v29  ;;  %v7006_v33 = vsel %vm4057_vm3, %v7003_v29, %v7005_v20  ;;  %v7028_v8 = vmax.f32 %v6988_v56, %v7008_v49  ;;  %v6982_v24 = vadd.f32 %v7813_v61, %v6949_v9  ;;  %v8972_v5 = vpop.f32.mrb[62].mxu0 }
 0x78d   : > { %v7026_v38 = vmax.f32 %v6986_v1, %v7004_v25  ;;  %v7027_v27 = vmax.f32 %v6987_v44, %v7006_v33  ;;  %v6992_v45 = vmax.f32 %v6984_v18, 0.0  ;;  %v6985_v6 = vadd.f32 %v8972_v5, %v7813_v61  ;;  %v6952_v59 = vpop.f32.mrb[63].mxu0 }
 0x78e   : > { %v6990_v23 = vmax.f32 %v6982_v24, 0.0  ;;  %v6983_v19 = vadd.f32 %v7813_v61, %v6952_v59 }
 0x78f   : > { %v7034_v36 = vmax.f32 %v7026_v38, %v7027_v27  ;;  %v6993_v62 = vmax.f32 %v6985_v6, 0.0  ;;  %v7013_v11 = vrot.slane %v6992_v45, 1 }
 0x790   : > { %v7009_v12 = vrot.slane %v6990_v23, 1  ;;  %v6991_v60 = vmax.f32 %v6983_v19, 0.0 }
 0x791   : > { %7042 = vst [vmem:[#allocation3] sm:$0xff] %v7034_v36  ;;  %v7015_v53 = vrot.slane %v6993_v62, 1 }
 0x792   : > { %v7010_v26 = vsel %vm4057_vm3, %v7007_v43, %v7009_v12  ;;  %v7011_v50 = vrot.slane %v6991_v60, 1 }
 0x793   : > { %v7029_v3 = vmax.f32 %v6989_v22, %v7010_v26  ;;  %v7016_v13 = vsel %vm4057_vm3, %v7013_v11, %v7015_v53  ;;  %v7025_v54 = vsel %vm4057_vm3, %v7015_v53, 0.0 }
 0x794   : > { %v7032_v31 = vmax.f32 %v6992_v45, %v7016_v13  ;;  %v7033_v40 = vmax.f32 %v6993_v62, %v7025_v54  ;;  %v7012_v42 = vsel %vm4057_vm3, %v7009_v12, %v7011_v50  ;;  %v7014_v32 = vsel %vm4057_vm3, %v7011_v50, %v7013_v11 }
 0x795   : > { %v7036_v46 = vmax.f32 %v7028_v8, %v7029_v3  ;;  %v7030_v16 = vmax.f32 %v6990_v23, %v7012_v42  ;;  %v7031_v55 = vmax.f32 %v6991_v60, %v7014_v32 }
 0x796   : > { %v7040_v51 = vmax.f32 %v7032_v31, %v7033_v40 }
 0x797   : > { %7045 = vst [vmem:[#allocation3 + $0x10] sm:$0xff] %v7036_v46  ;;  %v7038_v47 = vmax.f32 %v7030_v16, %v7031_v55 }
 0x798   : > { %7051 = vst [vmem:[#allocation3 + $0x30] sm:$0xff] %v7040_v51  ;;  %v7053_v15 = vld [vmem:[#allocation3] ss:$2 sm:$0xf] }
 0x799   : > { %7048 = vst [vmem:[#allocation3 + $0x20] sm:$0xff] %v7038_v47  ;;  %7060 = vst [vmem:[%s325_s28] sm:$0xf] %v7053_v15 }
 0x79e   : > { %v7055_v52 = vld [vmem:[#allocation3 + $0x10] ss:$2 sm:$0xf] }
 0x79f   : > { %v7059_v14 = vld [vmem:[#allocation3 + $0x30] ss:$2 sm:$0xf]  ;;  %7061 = vst [vmem:[%s325_s28 + $0x4] sm:$0xf] %v7055_v52 }
 0x7a0   : > { %v7057_v21 = vld [vmem:[#allocation3 + $0x20] ss:$2 sm:$0xf]  ;;  %7063 = vst [vmem:[%s325_s28 + $0xc] sm:$0xf] %v7059_v14 }
 0x7a1   : > { %7062 = vst [vmem:[%s325_s28 + $0x8] sm:$0xf] %v7057_v21 }
 0x7a2   : > { %9589 = shalt.err (!%p9586_p3)
}
 0x7a3   : > { %s9590_s26 = scalar_lea.hbm %s12239_s22, 256  ;;  %s9594_s29 = scalar_lea.hbm %s12295_s9, 512 }
 0x7a4   : > { %p9591_p4 = scmp.ne.s32.totalorder %s12239_s22, %s9590_s26  ;;  %p9595_p9 = scmp.lt.u32.totalorder %s12239_s22, %s12295_s9 }
 0x7a5   : > { %p9596_p10 = scmp.lt.u32.totalorder %s9594_s29, %s9590_s26  ;;  %p9598_p12 = scmp.lt.u32.totalorder %s9590_s26, %s12239_s22 }
 0x7a6   : > { %p9592_p7 = pnand %p9591_p4, %p9733_p5 }
 0x7a7   : > { %p9597_p11 = por %p9596_p10, %p9595_p9 }
 0x7a8   : > { %p9593_p8 = pneg %p9592_p7 }
 0x7a9   : > { %p9599_p13 = por %p9598_p12, %p9597_p11 }
 0x7ab   : > { %p9600_p0 = pnand %p9599_p13, %p9593_p8 }
 0x7ad   : > { %9603 = shalt.err (!%p9600_p0)
}
 0x7ae   : > { %s9643_s13 = smov 64   ;;  %s9644_s24 = smov 4  }
 0x7af   : > { %9365 = dma.vmem_to_hbm [thread:$0]  (%p9733_p5), %s12241_s14, 256, %s12239_s22, %s12245_s23, %s9643_s13, %s9643_s13, %s9644_s24  }
 0x7b0 PF: > { %p9371_p1 = scmp.ge.s32.totalorder %s9638_s12, 2  ;;  %s7093_s16 = sand.u32 1, %s9626_s30  }
 0x7b1   : > { %s7094_s25 = scalar_lea.sflag [#allocation5], %s7093_s16 }
 0x7b2   : > { %p9368_p2 = pnand %p9371_p1, %p9737_p6 }
 0x7b4   : > { %9621 = dma.done.wait (!%p9368_p2), %s7094_s25, 256  }
 0x7b5   : > { %9623 = vsyncadd (!%p9368_p2), %s7094_s25, 4294967040  ;;  %p19_p3 = scmp.ge.s32.totalorder %s9720_s15, 4   ;;  %s12556_s30 = smov %s9630_s10 }
 0x7b6   : > { %s12557_s10 = smov %s9634_s11  ;;  %s12558_s11 = smov %s9731_s18 }
 0x7b7   : > { %s12559_s12 = smov %s9720_s15  ;;  %21 = sbr.rel (!%p19_p3) target bundleno = 3 (0x3), region = 135 }
 0x7be   :  { %7099 = vsyncpa [#allocation5], 1 }
 0x7bf   :  { %7101 = vsyncpa [#allocation5 + $0x1], 1 }

</bundles_post_ra>
